<compile_context>
chip_gen: v6e
topology: v6e:2x2x1
jax: 0.10.0
libtpu: 0.0.40
codegen_flags: <defaults>
</compile_context>

<pallas_src>
import functools

import jax
import jax.numpy as jnp
from jax.experimental import pallas as pl
from jax.experimental.pallas import tpu as pltpu


def _round_up(n, m):
    return ((n + m - 1) // m) * m


# ----------------------------------------------------------------------------
# exact (erf-based) GELU usable inside Mosaic kernels.  Rational erf approx;
# the division is done with an EUP approximate reciprocal (frees the VALU).
# ----------------------------------------------------------------------------
_ERF_ALPHA = (-2.72614225801306e-10, 2.77068142495902e-08, -2.10102402082508e-06,
              -5.69250639462346e-05, -7.34990630326855e-04, -2.954600054904e-03,
              -1.60960333262415e-02)
_ERF_BETA = (-1.45660718464996e-05, -2.13374055278905e-04, -1.68282697438203e-03,
             -7.37332916720468e-03, -1.42647390514189e-02)


def _erf(x):
    x = jnp.clip(x, -4.0, 4.0)
    x2 = x * x
    p = jnp.float32(_ERF_ALPHA[0])
    for a in _ERF_ALPHA[1:]:
        p = p * x2 + jnp.float32(a)
    p = p * x
    q = jnp.float32(_ERF_BETA[0])
    for b in _ERF_BETA[1:]:
        q = q * x2 + jnp.float32(b)
    return jnp.clip(p * pl.reciprocal(q, approx=True), -1.0, 1.0)


def _gelu(x):
    # matches torch F.gelu / nn.GELU() default (erf-based) up to f32 roundoff
    return 0.5 * x * (1.0 + _erf(x * jnp.float32(0.7071067811865476)))


# ----------------------------------------------------------------------------
# fused, tiled matmul: act(((x @ w + b) * scale + shift) + res)
# ----------------------------------------------------------------------------
def _mm_kernel(*refs, act, has_affine, has_res):
    x_ref, w_ref, b_ref = refs[:3]
    idx = 3
    if has_affine:
        scale_ref, shift_ref = refs[idx], refs[idx + 1]
        idx += 2
    if has_res:
        res_ref = refs[idx]
        idx += 1
    o_ref, acc_ref = refs[idx], refs[idx + 1]

    @pl.when(pl.program_id(2) == 0)
    def _init():
        acc_ref[...] = jnp.zeros_like(acc_ref)

    acc_ref[...] += jnp.dot(x_ref[...], w_ref[...],
                            preferred_element_type=jnp.float32)

    @pl.when(pl.program_id(2) == pl.num_programs(2) - 1)
    def _finalize():
        y = acc_ref[...] + b_ref[...]
        if has_affine:
            y = y * scale_ref[...] + shift_ref[...]
        if has_res:
            y = y + res_ref[...]
        if act == "relu":
            y = jnp.maximum(y, 0.0)
        elif act == "gelu":
            y = _gelu(y)
        o_ref[...] = y.astype(o_ref.dtype)


def matmul_affine_act(x, w, b, scale=None, shift=None, res=None, act="none",
                      out_dtype=jnp.float32):
    """Tiled fused linear layer.  x:(M,K) w:(K,N) b:(N,), optional per-column
    scale/shift (folded BN) and residual (M,N).  MXU operands are bf16, the
    accumulator / epilogue are f32.  K and N are zero-padded to multiples of
    128 (lane-dense stores); the result is sliced back to (M, N)."""
    M, K = x.shape
    N = w.shape[1]
    has_affine = scale is not None
    has_res = res is not None

    Kp = _round_up(K, 128)
    Np = _round_up(N, 128)
    tm = min(256, _round_up(M, 8))
    Mp = _round_up(M, tm)
    tn = 256 if Np % 256 == 0 else 128
    tk = next(t for t in (512, 256, 128) if Kp % t == 0)

    xp = jnp.pad(x.astype(jnp.bfloat16), ((0, Mp - M), (0, Kp - K)))
    wp = jnp.pad(w.astype(jnp.bfloat16), ((0, Kp - K), (0, Np - N)))
    bp = jnp.pad(b.astype(jnp.float32).reshape(1, N), ((0, 0), (0, Np - N)))

    operands = [xp, wp, bp]
    in_specs = [
        pl.BlockSpec((tm, tk), lambda i, j, k: (i, k)),
        pl.BlockSpec((tk, tn), lambda i, j, k: (k, j)),
        pl.BlockSpec((1, tn), lambda i, j, k: (0, j)),
    ]
    if has_affine:
        sp = jnp.pad(scale.astype(jnp.float32).reshape(1, N), ((0, 0), (0, Np - N)))
        tp = jnp.pad(shift.astype(jnp.float32).reshape(1, N), ((0, 0), (0, Np - N)))
        operands += [sp, tp]
        in_specs += [pl.BlockSpec((1, tn), lambda i, j, k: (0, j)),
                     pl.BlockSpec((1, tn), lambda i, j, k: (0, j))]
    if has_res:
        rp = jnp.pad(res.astype(jnp.float32), ((0, Mp - M), (0, Np - N)))
        operands.append(rp)
        in_specs.append(pl.BlockSpec((tm, tn), lambda i, j, k: (i, j)))

    out = pl.pallas_call(
        functools.partial(_mm_kernel, act=act, has_affine=has_affine, has_res=has_res),
        out_shape=jax.ShapeDtypeStruct((Mp, Np), out_dtype),
        grid=(Mp // tm, Np // tn, Kp // tk),
        in_specs=in_specs,
        out_specs=pl.BlockSpec((tm, tn), lambda i, j, k: (i, j)),
        scratch_shapes=[pltpu.VMEM((tm, tn), jnp.float32)],
        compiler_params=pltpu.CompilerParams(
            dimension_semantics=("parallel", "parallel", "arbitrary")),
    )(*operands)
    return out[:M, :N]


# ----------------------------------------------------------------------------
# standalone eval-BatchNorm + GELU on NHWC (per-channel vectors, no broadcasts)
# ----------------------------------------------------------------------------
def _bn_gelu_kernel(x_ref, scale_ref, shift_ref, o_ref):
    y = x_ref[...].astype(jnp.float32) * scale_ref[...] + shift_ref[...]
    o_ref[...] = _gelu(y).astype(o_ref.dtype)


def bn_gelu(x, scale_c, shift_c, out_dtype=jnp.bfloat16):
    """x: (B,H,W,C) NHWC -> GELU(BN(x)).  Scale/shift enter as a (1, W*C) row."""
    B, H, W, C = x.shape
    R, F = B * H, W * C
    x2 = x.reshape(R, F)
    scale = jnp.tile(scale_c.astype(jnp.float32), W).reshape(1, F)
    shift = jnp.tile(shift_c.astype(jnp.float32), W).reshape(1, F)
    tr = min(512, _round_up(R, 8))
    Rp = _round_up(R, tr)
    if Rp != R:
        x2 = jnp.pad(x2, ((0, Rp - R), (0, 0)))
    out = pl.pallas_call(
        _bn_gelu_kernel,
        out_shape=jax.ShapeDtypeStruct((Rp, F), out_dtype),
        grid=(Rp // tr,),
        in_specs=[pl.BlockSpec((tr, F), lambda i: (i, 0)),
                  pl.BlockSpec((1, F), lambda i: (0, 0)),
                  pl.BlockSpec((1, F), lambda i: (0, 0))],
        out_specs=pl.BlockSpec((tr, F), lambda i: (i, 0)),
        compiler_params=pltpu.CompilerParams(dimension_semantics=("parallel",)),
    )(x2, scale, shift)
    return out[:R].reshape(B, H, W, C)


# ----------------------------------------------------------------------------
# bidirectional LSTM recurrence (input projection hoisted outside)
# ----------------------------------------------------------------------------
def _lstm_bidir_kernel(gx_ref, whh_ref, o_ref):
    T, B, _ = gx_ref.shape
    H = o_ref.shape[2]            # lane-padded hidden size (multiple of 128)
    d = pl.program_id(0)          # 0 = forward, 1 = backward in time

    def step(i, carry):
        h, c = carry
        t = jnp.where(d == 0, i, T - 1 - i)
        gates = gx_ref[t] + jnp.dot(h, whh_ref[...],
                                    preferred_element_type=jnp.float32)
        i_g = jax.nn.sigmoid(gates[:, 0 * H:1 * H])
        f_g = jax.nn.sigmoid(gates[:, 1 * H:2 * H])
        g_g = jnp.tanh(gates[:, 2 * H:3 * H])
        o_g = jax.nn.sigmoid(gates[:, 3 * H:4 * H])
        c_new = f_g * c + i_g * g_g
        h_new = o_g * jnp.tanh(c_new)
        o_ref[t] = h_new
        return h_new, c_new

    zeros = jnp.zeros((B, H), jnp.float32)
    jax.lax.fori_loop(0, T, step, (zeros, zeros))


def lstm_bidir(gx, whh):
    """gx: (2, T, B, 4*Hp) precomputed x@W_ih + bias per direction.
       whh: (2, Hp, 4*Hp).  Returns (2, T, B, Hp), both in natural time order."""
    _, T, B, G = gx.shape
    Hp = G // 4
    return pl.pallas_call(
        _lstm_bidir_kernel,
        out_shape=jax.ShapeDtypeStruct((2, T, B, Hp), jnp.float32),
        grid=(2,),
        in_specs=[pl.BlockSpec((None, T, B, G), lambda d: (d, 0, 0, 0)),
                  pl.BlockSpec((None, Hp, G), lambda d: (d, 0, 0))],
        out_specs=pl.BlockSpec((None, T, B, Hp), lambda d: (d, 0, 0, 0)),
        compiler_params=pltpu.CompilerParams(dimension_semantics=("parallel",)),
    )(gx.astype(jnp.float32), whh.astype(jnp.float32))


# ----------------------------------------------------------------------------
# glue: BN folding, im2col (NHWC), conv wrapper, LSTM weight padding
# ----------------------------------------------------------------------------
def bn_fold(bn, eps=1e-5):
    scale = bn["gamma"] * jax.lax.rsqrt(bn["var"] + eps)
    shift = bn["beta"] - bn["mean"] * scale
    return scale, shift


def im2col_nhwc(x, kh, kw, sh, sw, dh, dw, ph, pw):
    B, H, W, C = x.shape
    if ph or pw:
        x = jnp.pad(x, ((0, 0), (ph, ph), (pw, pw), (0, 0)))
    Hp_, Wp_ = x.shape[1], x.shape[2]
    Ho = (Hp_ - (dh * (kh - 1) + 1)) // sh + 1
    Wo = (Wp_ - (dw * (kw - 1) + 1)) // sw + 1
    cols = []
    for i in range(kh):
        for j in range(kw):
            cols.append(x[:, i * dh:i * dh + (Ho - 1) * sh + 1:sh,
                          j * dw:j * dw + (Wo - 1) * sw + 1:sw, :])
    pat = jnp.stack(cols, axis=3)                 # (B, Ho, Wo, kh*kw, C)
    return pat.reshape(B * Ho * Wo, kh * kw * C), (B, Ho, Wo)


def conv2d(x, w, b, *, stride=(1, 1), dilation=(1, 1), padding=(0, 0),
           bn=None, act="none", res=None, out_dtype=jnp.float32):
    """PyTorch-semantics Conv2d on NHWC activations (weight (Cout,Cin,KH,KW)),
    as im2col + fused Pallas matmul with optional BN/activation/residual."""
    C_out, C_in, KH, KW = w.shape
    pat, (B, Ho, Wo) = im2col_nhwc(x.astype(jnp.bfloat16), KH, KW,
                                   stride[0], stride[1],
                                   dilation[0], dilation[1],
                                   padding[0], padding[1])
    w2 = jnp.transpose(w, (2, 3, 1, 0)).reshape(KH * KW * C_in, C_out)
    scale = shift = None
    if bn is not None:
        scale, shift = bn_fold(bn)
    res_flat = None if res is None else res.reshape(B * Ho * Wo, C_out)
    y = matmul_affine_act(pat, w2, b, scale=scale, shift=shift, res=res_flat,
                          act=act, out_dtype=out_dtype)
    return y.reshape(B, Ho, Wo, C_out)


def _gate_pad_cols(w, h, hp):
    """(rows, 4h) -> (rows, 4hp): each gate padded to a full 128-lane group."""
    rows = w.shape[0]
    w = w.reshape(rows, 4, h)
    w = jnp.pad(w, ((0, 0), (0, 0), (0, hp - h)))
    return w.reshape(rows, 4 * hp)


def _pad_feature_rows(w, h, hp, blocks):
    """(blocks*h, cols) -> (blocks*hp, cols): zero rows for padded input lanes."""
    cols = w.shape[1]
    w = w.reshape(blocks, h, cols)
    w = jnp.pad(w, ((0, 0), (0, hp - h), (0, 0)))
    return w.reshape(blocks * hp, cols)


# ----------------------------------------------------------------------------
# full forward pass
# ----------------------------------------------------------------------------
def deepspeech_forward(x, params, cfg):
    nf = cfg["n_feats"] // 2
    rd = cfg["rnn_dim"]
    nc = cfg["n_class"]

    x = x[..., None].astype(jnp.float32)                      # (B, freq, time, 1) NHWC

    # front CNN: Conv(1,nf,(32,1),s=2)+BN+ReLU -> Conv(nf,nf,(32,1),dil=(2,1),s=2)+BN+ReLU
    x = conv2d(x, params["c1_w"], params["c1_b"], stride=(2, 2),
               bn=params["bn1"], act="relu", out_dtype=jnp.bfloat16)
    x = conv2d(x, params["c2_w"], params["c2_b"], stride=(2, 2), dilation=(2, 1),
               bn=params["bn2"], act="relu")                   # f32: first residual

    # ResidualCNN stack: BN1->GELU->cnn1 -> BN2->GELU->cnn2 -> + residual
    # (BN2+GELU fused into cnn1's matmul epilogue)
    for lp in params["rescnn"]:
        residual = x
        s1, t1 = bn_fold(lp["ln1"])
        y = bn_gelu(x, s1, t1)
        y = conv2d(y, lp["w1"], lp["b1"], padding=(1, 1),
                   bn=lp["ln2"], act="gelu", out_dtype=jnp.bfloat16)
        x = conv2d(y, lp["w2"], lp["b2"], padding=(1, 1), res=residual)

    # torch: x.view(B, C*W, H).transpose(1,2)  ->  (B, T=H, C*W), feature = c*W + w
    B, H2, W2, C = x.shape
    T = H2
    x = jnp.transpose(x, (0, 1, 3, 2)).reshape(B, T, C * W2)

    # fully connected: Linear(13*nf, rnn_dim)
    y = matmul_affine_act(x.reshape(B * T, C * W2), params["fc_w"], params["fc_b"])
    X = jnp.transpose(y.reshape(B, T, rd), (1, 0, 2)).reshape(T * B, rd)  # (T*B, rd)

    # bidirectional multi-layer LSTM (batch_first); inter-layer dropout = identity
    Hp = _round_up(rd, 128)
    n_layers = len(params["lstm"])
    h_sum = None
    for li, lw in enumerate(params["lstm"]):
        if li == 0:
            wih_f = _gate_pad_cols(lw["wih_f"], rd, Hp)
            wih_b = _gate_pad_cols(lw["wih_b"], rd, Hp)
        else:
            wih_f = _pad_feature_rows(_gate_pad_cols(lw["wih_f"], rd, Hp), rd, Hp, 2)
            wih_b = _pad_feature_rows(_gate_pad_cols(lw["wih_b"], rd, Hp), rd, Hp, 2)
        whh_f = _pad_feature_rows(_gate_pad_cols(lw["whh_f"], rd, Hp), rd, Hp, 1)
        whh_b = _pad_feature_rows(_gate_pad_cols(lw["whh_b"], rd, Hp), rd, Hp, 1)
        b_f = _gate_pad_cols(lw["b_f"].reshape(1, 4 * rd), rd, Hp).reshape(4 * Hp)
        b_b = _gate_pad_cols(lw["b_b"].reshape(1, 4 * rd), rd, Hp).reshape(4 * Hp)

        # hoisted, time-independent input projection (one big fused matmul each)
        gx_f = matmul_affine_act(X, wih_f, b_f).reshape(T, B, 4 * Hp)
        gx_b = matmul_affine_act(X, wih_b, b_b).reshape(T, B, 4 * Hp)

        h_all = lstm_bidir(jnp.stack([gx_f, gx_b]), jnp.stack([whh_f, whh_b]))

        if li == n_layers - 1:
            # torch: x.view(B, T, 2, -1).sum(2)  ->  fwd + bwd
            h_sum = (h_all[0] + h_all[1]).reshape(T * B, Hp)
        else:
            X = jnp.concatenate([h_all[0], h_all[1]], axis=-1).reshape(T * B, 2 * Hp)

    # classifier: Linear -> GELU -> Dropout(id) -> Linear
    w1 = jnp.pad(params["cls_w1"], ((0, Hp - rd), (0, 0)))     # padded lanes are zero
    y = matmul_affine_act(h_sum, w1, params["cls_b1"], act="gelu")
    y = matmul_affine_act(y, params["cls_w2"], params["cls_b2"])
    return jnp.transpose(y.reshape(T, B, nc), (1, 0, 2))       # (B, T, n_class)


# ----------------------------------------------------------------------------
# deterministic parameter init (shapes follow the PyTorch module's __init__)
# ----------------------------------------------------------------------------
def init_params(key, cfg):
    nf = cfg["n_feats"] // 2
    rd = cfg["rnn_dim"]
    nc = cfg["n_class"]
    keys = iter(jax.random.split(key, 256))

    def nrm(shape, s=0.1):
        return jax.random.normal(next(keys), shape, jnp.float32) * s

    def bn(c):
        return dict(gamma=jax.random.uniform(next(keys), (c,), jnp.float32, 0.5, 1.5),
                    beta=nrm((c,)),
                    mean=nrm((c,)),
                    var=jax.random.uniform(next(keys), (c,), jnp.float32, 0.5, 1.5))

    lstm = []
    for l in range(cfg["n_rnn_layers"]):
        din = rd if l == 0 else 2 * rd
        lstm.append(dict(
            wih_f=nrm((din, 4 * rd)), whh_f=nrm((rd, 4 * rd)), b_f=nrm((4 * rd,)),
            wih_b=nrm((din, 4 * rd)), whh_b=nrm((rd, 4 * rd)), b_b=nrm((4 * rd,))))

    return dict(
        c1_w=nrm((nf, 1, 32, 1)), c1_b=nrm((nf,)), bn1=bn(nf),
        c2_w=nrm((nf, nf, 32, 1)), c2_b=nrm((nf,)), bn2=bn(nf),
        rescnn=[dict(ln1=bn(nf), w1=nrm((nf, nf, 3, 3)), b1=nrm((nf,)),
                     ln2=bn(nf), w2=nrm((nf, nf, 3, 3)), b2=nrm((nf,)))
                for _ in range(cfg["n_cnn_layers"])],
        fc_w=nrm((13 * nf, rd)), fc_b=nrm((rd,)),
        lstm=lstm,
        cls_w1=nrm((rd, rd // 2)), cls_b1=nrm((rd // 2,)),
        cls_w2=nrm((rd // 2, nc)), cls_b2=nrm((nc,)),
    )


if __name__ == "__main__":
    cfg = dict(n_cnn_layers=2, n_rnn_layers=2, rnn_dim=32, n_class=10, n_feats=8)
    key = jax.random.PRNGKey(0)
    kp, kx = jax.random.split(key)
    params = init_params(kp, cfg)

    # input (batch, freq, time) = (2, 168, 49):
    #   freq 168 -> conv1 (k=32,s=2): 69 -> conv2 (k=32,dil=2,s=2): 4   (LSTM seq len)
    #   time  49 -> 25 -> 13, matching Linear(13 * n_feats, rnn_dim)
    x = jax.random.normal(kx, (2, 168, 49), jnp.float32)

    fwd = jax.jit(functools.partial(deepspeech_forward, cfg=cfg))
    out = jax.block_until_ready(fwd(x, params))
    assert out.shape == (2, 4, cfg["n_class"]), out.shape
    assert bool(jnp.all(jnp.isfinite(out)))
    print("KERNEL_OK")
</pallas_src>

<mosaic_0001>
module attributes {stable_mosaic.version = 11 : i64} {
  func.func @_mm_kernel(%arg0: i32, %arg1: i32, %arg2: i32, %arg3: memref<256x128xbf16, #tpu.memory_space<vmem>>, %arg4: memref<128x128xbf16, #tpu.memory_space<vmem>>, %arg5: memref<1x128xf32, #tpu.memory_space<vmem>>, %arg6: memref<1x128xf32, #tpu.memory_space<vmem>>, %arg7: memref<1x128xf32, #tpu.memory_space<vmem>>, %arg8: memref<256x128xbf16, #tpu.memory_space<vmem>>, %arg9: memref<256x128xf32, #tpu.memory_space<vmem>>) attributes {dimension_semantics = [#tpu.dimension_semantics<parallel>, #tpu.dimension_semantics<parallel>, #tpu.dimension_semantics<arbitrary>], iteration_bounds = array<i64: 14, 1, 1>, scalar_prefetch = 0 : i64, scratch_operands = 1 : i64, tpu.core_type = #tpu.core_type<tc>, window_params = [{transform_indices = @transform_0, window_bounds = array<i64: 256, 128>}, {transform_indices = @transform_1, window_bounds = array<i64: 128, 128>}, {transform_indices = @transform_2, window_bounds = array<i64: 1, 128>}, {transform_indices = @transform_3, window_bounds = array<i64: 1, 128>}, {transform_indices = @transform_4, window_bounds = array<i64: 1, 128>}, {transform_indices = @transform_5, window_bounds = array<i64: 256, 128>}]} {
    %c0_i32 = arith.constant 0 : i32
    %0 = arith.cmpi eq, %arg2, %c0_i32 : i32
    %1 = arith.extui %0 : i1 to i32
    %c0_i32_0 = arith.constant 0 : i32
    %2 = arith.cmpi ne, %1, %c0_i32_0 : i32
    scf.if %2 {
      %cst_10 = arith.constant 0.000000e+00 : f32
      %12 = vector.broadcast %cst_10 : f32 to vector<256x128xf32>
      %c0_11 = arith.constant 0 : index
      %c0_12 = arith.constant 0 : index
      %13 = vector.load %arg9[%c0_11, %c0_12] : memref<256x128xf32, #tpu.memory_space<vmem>>, vector<256x128xf32>
      tpu.vector_store %arg9[%c0_11, %c0_12], %12 {strides = array<i32>} : memref<256x128xf32, #tpu.memory_space<vmem>>, vector<256x128xf32>,
    } else {
    }
    %c0 = arith.constant 0 : index
    %c0_1 = arith.constant 0 : index
    %3 = vector.load %arg9[%c0, %c0_1] : memref<256x128xf32, #tpu.memory_space<vmem>>, vector<256x128xf32>
    %c0_2 = arith.constant 0 : index
    %c0_3 = arith.constant 0 : index
    %4 = vector.load %arg3[%c0_2, %c0_3] : memref<256x128xbf16, #tpu.memory_space<vmem>>, vector<256x128xbf16>
    %c0_4 = arith.constant 0 : index
    %c0_5 = arith.constant 0 : index
    %5 = vector.load %arg4[%c0_4, %c0_5] : memref<128x128xbf16, #tpu.memory_space<vmem>>, vector<128x128xbf16>
    %cst = arith.constant dense<0.000000e+00> : vector<256x128xf32>
    %6 = tpu.matmul %4, %5, %cst {dimension_numbers = #tpu.dot_dimension_numbers<[1], [0], [0], [1], [0, 0, 1, 1], [], []>} : vector<256x128xbf16>, vector<128x128xbf16>, vector<256x128xf32> -> vector<256x128xf32>
    %7 = arith.addf %3, %6 : vector<256x128xf32>
    %c0_6 = arith.constant 0 : index
    %c0_7 = arith.constant 0 : index
    %8 = vector.load %arg9[%c0_6, %c0_7] : memref<256x128xf32, #tpu.memory_space<vmem>>, vector<256x128xf32>
    tpu.vector_store %arg9[%c0_6, %c0_7], %7 {strides = array<i32>} : memref<256x128xf32, #tpu.memory_space<vmem>>, vector<256x128xf32>,
    %c0_i32_8 = arith.constant 0 : i32
    %9 = arith.cmpi eq, %arg2, %c0_i32_8 : i32
    %10 = arith.extui %9 : i1 to i32
    %c0_i32_9 = arith.constant 0 : i32
    %11 = arith.cmpi ne, %10, %c0_i32_9 : i32
    scf.if %11 {
      %c0_10 = arith.constant 0 : index
      %c0_11 = arith.constant 0 : index
      %12 = vector.load %arg9[%c0_10, %c0_11] : memref<256x128xf32, #tpu.memory_space<vmem>>, vector<256x128xf32>
      %c0_12 = arith.constant 0 : index
      %c0_13 = arith.constant 0 : index
      %13 = vector.load %arg5[%c0_12, %c0_13] : memref<1x128xf32, #tpu.memory_space<vmem>>, vector<1x128xf32>
      %14 = vector.broadcast %13 : vector<1x128xf32> to vector<256x128xf32>
      %15 = arith.addf %12, %14 : vector<256x128xf32>
      %c0_14 = arith.constant 0 : index
      %c0_15 = arith.constant 0 : index
      %16 = vector.load %arg6[%c0_14, %c0_15] : memref<1x128xf32, #tpu.memory_space<vmem>>, vector<1x128xf32>
      %17 = vector.broadcast %16 : vector<1x128xf32> to vector<256x128xf32>
      %18 = arith.mulf %15, %17 : vector<256x128xf32>
      %c0_16 = arith.constant 0 : index
      %c0_17 = arith.constant 0 : index
      %19 = vector.load %arg7[%c0_16, %c0_17] : memref<1x128xf32, #tpu.memory_space<vmem>>, vector<1x128xf32>
      %20 = vector.broadcast %19 : vector<1x128xf32> to vector<256x128xf32>
      %21 = arith.addf %18, %20 : vector<256x128xf32>
      %cst_18 = arith.constant 0.000000e+00 : f32
      %22 = vector.broadcast %cst_18 : f32 to vector<256x128xf32>
      %23 = arith.maximumf %21, %22 : vector<256x128xf32>
      %24 = arith.truncf %23 : vector<256x128xf32> to vector<256x128xbf16>
      %c0_19 = arith.constant 0 : index
      %c0_20 = arith.constant 0 : index
      %25 = vector.load %arg8[%c0_19, %c0_20] : memref<256x128xbf16, #tpu.memory_space<vmem>>, vector<256x128xbf16>
      tpu.vector_store %arg8[%c0_19, %c0_20], %24 {strides = array<i32>} : memref<256x128xbf16, #tpu.memory_space<vmem>>, vector<256x128xbf16>,
    } else {
    }
    return
  }
  func.func @transform_0(%arg0: i32, %arg1: i32, %arg2: i32) -> (i32, i32) {
    %c0_i32 = arith.constant 0 : i32
    return %arg0, %arg2 : i32, i32
  }
  func.func @transform_1(%arg0: i32, %arg1: i32, %arg2: i32) -> (i32, i32) {
    %c0_i32 = arith.constant 0 : i32
    return %arg2, %arg1 : i32, i32
  }
  func.func @transform_2(%arg0: i32, %arg1: i32, %arg2: i32) -> (i32, i32) {
    %c0_i32 = arith.constant 0 : i32
    %c0_i32_0 = arith.constant 0 : i32
    return %c0_i32, %arg1 : i32, i32
  }
  func.func @transform_3(%arg0: i32, %arg1: i32, %arg2: i32) -> (i32, i32) {
    %c0_i32 = arith.constant 0 : i32
    %c0_i32_0 = arith.constant 0 : i32
    return %c0_i32, %arg1 : i32, i32
  }
  func.func @transform_4(%arg0: i32, %arg1: i32, %arg2: i32) -> (i32, i32) {
    %c0_i32 = arith.constant 0 : i32
    %c0_i32_0 = arith.constant 0 : i32
    return %c0_i32, %arg1 : i32, i32
  }
  func.func @transform_5(%arg0: i32, %arg1: i32, %arg2: i32) -> (i32, i32) {
    %c0_i32 = arith.constant 0 : i32
    return %arg0, %arg1 : i32, i32
  }
}

module attributes {stable_mosaic.version = 11 : i64} {
  func.func @_mm_kernel(%arg0: i32, %arg1: i32, %arg2: i32, %arg3: memref<104x128xbf16, #tpu.memory_space<vmem>>, %arg4: memref<128x128xbf16, #tpu.memory_space<vmem>>, %arg5: memref<1x128xf32, #tpu.memory_space<vmem>>, %arg6: memref<1x128xf32, #tpu.memory_space<vmem>>, %arg7: memref<1x128xf32, #tpu.memory_space<vmem>>, %arg8: memref<104x128xf32, #tpu.memory_space<vmem>>, %arg9: memref<104x128xf32, #tpu.memory_space<vmem>>) attributes {dimension_semantics = [#tpu.dimension_semantics<parallel>, #tpu.dimension_semantics<parallel>, #tpu.dimension_semantics<arbitrary>], iteration_bounds = array<i64: 1, 1, 1>, scalar_prefetch = 0 : i64, scratch_operands = 1 : i64, tpu.core_type = #tpu.core_type<tc>, window_params = [{transform_indices = @transform_0, window_bounds = array<i64: 104, 128>}, {transform_indices = @transform_1, window_bounds = array<i64: 128, 128>}, {transform_indices = @transform_2, window_bounds = array<i64: 1, 128>}, {transform_indices = @transform_3, window_bounds = array<i64: 1, 128>}, {transform_indices = @transform_4, window_bounds = array<i64: 1, 128>}, {transform_indices = @transform_5, window_bounds = array<i64: 104, 128>}]} {
    %c0_i32 = arith.constant 0 : i32
    %0 = arith.cmpi eq, %arg2, %c0_i32 : i32
    %1 = arith.extui %0 : i1 to i32
    %c0_i32_0 = arith.constant 0 : i32
    %2 = arith.cmpi ne, %1, %c0_i32_0 : i32
    scf.if %2 {
      %cst_10 = arith.constant 0.000000e+00 : f32
      %12 = vector.broadcast %cst_10 : f32 to vector<104x128xf32>
      %c0_11 = arith.constant 0 : index
      %c0_12 = arith.constant 0 : index
      %13 = vector.load %arg9[%c0_11, %c0_12] : memref<104x128xf32, #tpu.memory_space<vmem>>, vector<104x128xf32>
      tpu.vector_store %arg9[%c0_11, %c0_12], %12 {strides = array<i32>} : memref<104x128xf32, #tpu.memory_space<vmem>>, vector<104x128xf32>,
    } else {
    }
    %c0 = arith.constant 0 : index
    %c0_1 = arith.constant 0 : index
    %3 = vector.load %arg9[%c0, %c0_1] : memref<104x128xf32, #tpu.memory_space<vmem>>, vector<104x128xf32>
    %c0_2 = arith.constant 0 : index
    %c0_3 = arith.constant 0 : index
    %4 = vector.load %arg3[%c0_2, %c0_3] : memref<104x128xbf16, #tpu.memory_space<vmem>>, vector<104x128xbf16>
    %c0_4 = arith.constant 0 : index
    %c0_5 = arith.constant 0 : index
    %5 = vector.load %arg4[%c0_4, %c0_5] : memref<128x128xbf16, #tpu.memory_space<vmem>>, vector<128x128xbf16>
    %cst = arith.constant dense<0.000000e+00> : vector<104x128xf32>
    %6 = tpu.matmul %4, %5, %cst {dimension_numbers = #tpu.dot_dimension_numbers<[1], [0], [0], [1], [0, 0, 1, 1], [], []>} : vector<104x128xbf16>, vector<128x128xbf16>, vector<104x128xf32> -> vector<104x128xf32>
    %7 = arith.addf %3, %6 : vector<104x128xf32>
    %c0_6 = arith.constant 0 : index
    %c0_7 = arith.constant 0 : index
    %8 = vector.load %arg9[%c0_6, %c0_7] : memref<104x128xf32, #tpu.memory_space<vmem>>, vector<104x128xf32>
    tpu.vector_store %arg9[%c0_6, %c0_7], %7 {strides = array<i32>} : memref<104x128xf32, #tpu.memory_space<vmem>>, vector<104x128xf32>,
    %c0_i32_8 = arith.constant 0 : i32
    %9 = arith.cmpi eq, %arg2, %c0_i32_8 : i32
    %10 = arith.extui %9 : i1 to i32
    %c0_i32_9 = arith.constant 0 : i32
    %11 = arith.cmpi ne, %10, %c0_i32_9 : i32
    scf.if %11 {
      %c0_10 = arith.constant 0 : index
      %c0_11 = arith.constant 0 : index
      %12 = vector.load %arg9[%c0_10, %c0_11] : memref<104x128xf32, #tpu.memory_space<vmem>>, vector<104x128xf32>
      %c0_12 = arith.constant 0 : index
      %c0_13 = arith.constant 0 : index
      %13 = vector.load %arg5[%c0_12, %c0_13] : memref<1x128xf32, #tpu.memory_space<vmem>>, vector<1x128xf32>
      %14 = vector.broadcast %13 : vector<1x128xf32> to vector<104x128xf32>
      %15 = arith.addf %12, %14 : vector<104x128xf32>
      %c0_14 = arith.constant 0 : index
      %c0_15 = arith.constant 0 : index
      %16 = vector.load %arg6[%c0_14, %c0_15] : memref<1x128xf32, #tpu.memory_space<vmem>>, vector<1x128xf32>
      %17 = vector.broadcast %16 : vector<1x128xf32> to vector<104x128xf32>
      %18 = arith.mulf %15, %17 : vector<104x128xf32>
      %c0_16 = arith.constant 0 : index
      %c0_17 = arith.constant 0 : index
      %19 = vector.load %arg7[%c0_16, %c0_17] : memref<1x128xf32, #tpu.memory_space<vmem>>, vector<1x128xf32>
      %20 = vector.broadcast %19 : vector<1x128xf32> to vector<104x128xf32>
      %21 = arith.addf %18, %20 : vector<104x128xf32>
      %cst_18 = arith.constant 0.000000e+00 : f32
      %22 = vector.broadcast %cst_18 : f32 to vector<104x128xf32>
      %23 = arith.maximumf %21, %22 : vector<104x128xf32>
      %c0_19 = arith.constant 0 : index
      %c0_20 = arith.constant 0 : index
      %24 = vector.load %arg8[%c0_19, %c0_20] : memref<104x128xf32, #tpu.memory_space<vmem>>, vector<104x128xf32>
      tpu.vector_store %arg8[%c0_19, %c0_20], %23 {strides = array<i32>} : memref<104x128xf32, #tpu.memory_space<vmem>>, vector<104x128xf32>,
    } else {
    }
    return
  }
  func.func @transform_0(%arg0: i32, %arg1: i32, %arg2: i32) -> (i32, i32) {
    %c0_i32 = arith.constant 0 : i32
    return %arg0, %arg2 : i32, i32
  }
  func.func @transform_1(%arg0: i32, %arg1: i32, %arg2: i32) -> (i32, i32) {
    %c0_i32 = arith.constant 0 : i32
    return %arg2, %arg1 : i32, i32
  }
  func.func @transform_2(%arg0: i32, %arg1: i32, %arg2: i32) -> (i32, i32) {
    %c0_i32 = arith.constant 0 : i32
    %c0_i32_0 = arith.constant 0 : i32
    return %c0_i32, %arg1 : i32, i32
  }
  func.func @transform_3(%arg0: i32, %arg1: i32, %arg2: i32) -> (i32, i32) {
    %c0_i32 = arith.constant 0 : i32
    %c0_i32_0 = arith.constant 0 : i32
    return %c0_i32, %arg1 : i32, i32
  }
  func.func @transform_4(%arg0: i32, %arg1: i32, %arg2: i32) -> (i32, i32) {
    %c0_i32 = arith.constant 0 : i32
    %c0_i32_0 = arith.constant 0 : i32
    return %c0_i32, %arg1 : i32, i32
  }
  func.func @transform_5(%arg0: i32, %arg1: i32, %arg2: i32) -> (i32, i32) {
    %c0_i32 = arith.constant 0 : i32
    return %arg0, %arg1 : i32, i32
  }
}

module attributes {stable_mosaic.version = 11 : i64} {
  func.func @_bn_gelu_kernel(%arg0: i32, %arg1: memref<8x52xf32, #tpu.memory_space<vmem>>, %arg2: memref<1x52xf32, #tpu.memory_space<vmem>>, %arg3: memref<1x52xf32, #tpu.memory_space<vmem>>, %arg4: memref<8x52xbf16, #tpu.memory_space<vmem>>) attributes {dimension_semantics = [#tpu.dimension_semantics<parallel>], iteration_bounds = array<i64: 1>, scalar_prefetch = 0 : i64, scratch_operands = 0 : i64, tpu.core_type = #tpu.core_type<tc>, window_params = [{transform_indices = @transform_0, window_bounds = array<i64: 8, 52>}, {pipeline_mode = #tpu.pipeline_mode<synchronous>, transform_indices = @transform_1, window_bounds = array<i64: 1, 52>}, {pipeline_mode = #tpu.pipeline_mode<synchronous>, transform_indices = @transform_2, window_bounds = array<i64: 1, 52>}, {transform_indices = @transform_3, window_bounds = array<i64: 8, 52>}]} {
    %c0 = arith.constant 0 : index
    %c0_0 = arith.constant 0 : index
    %0 = vector.load %arg1[%c0, %c0_0] : memref<8x52xf32, #tpu.memory_space<vmem>>, vector<8x52xf32>
    %c0_1 = arith.constant 0 : index
    %c0_2 = arith.constant 0 : index
    %1 = vector.load %arg2[%c0_1, %c0_2] : memref<1x52xf32, #tpu.memory_space<vmem>>, vector<1x52xf32>
    %2 = vector.broadcast %1 : vector<1x52xf32> to vector<8x52xf32>
    %3 = arith.mulf %0, %2 : vector<8x52xf32>
    %c0_3 = arith.constant 0 : index
    %c0_4 = arith.constant 0 : index
    %4 = vector.load %arg3[%c0_3, %c0_4] : memref<1x52xf32, #tpu.memory_space<vmem>>, vector<1x52xf32>
    %5 = vector.broadcast %4 : vector<1x52xf32> to vector<8x52xf32>
    %6 = arith.addf %3, %5 : vector<8x52xf32>
    %cst = arith.constant 5.000000e-01 : f32
    %7 = vector.broadcast %cst : f32 to vector<8x52xf32>
    %8 = arith.mulf %7, %6 : vector<8x52xf32>
    %cst_5 = arith.constant 0.707106769 : f32
    %9 = vector.broadcast %cst_5 : f32 to vector<8x52xf32>
    %10 = arith.mulf %6, %9 : vector<8x52xf32>
    %cst_6 = arith.constant -4.000000e+00 : f32
    %cst_7 = arith.constant 4.000000e+00 : f32
    %11 = vector.broadcast %cst_6 : f32 to vector<8x52xf32>
    %12 = arith.maximumf %11, %10 : vector<8x52xf32>
    %13 = vector.broadcast %cst_7 : f32 to vector<8x52xf32>
    %14 = arith.minimumf %13, %12 : vector<8x52xf32>
    %15 = arith.mulf %14, %14 : vector<8x52xf32>
    %cst_8 = arith.constant -2.72614237E-10 : f32
    %16 = vector.broadcast %cst_8 : f32 to vector<8x52xf32>
    %17 = arith.mulf %16, %15 : vector<8x52xf32>
    %cst_9 = arith.constant 2.77068146E-8 : f32
    %18 = vector.broadcast %cst_9 : f32 to vector<8x52xf32>
    %19 = arith.addf %17, %18 : vector<8x52xf32>
    %20 = arith.mulf %19, %15 : vector<8x52xf32>
    %cst_10 = arith.constant -2.10102394E-6 : f32
    %21 = vector.broadcast %cst_10 : f32 to vector<8x52xf32>
    %22 = arith.addf %20, %21 : vector<8x52xf32>
    %23 = arith.mulf %22, %15 : vector<8x52xf32>
    %cst_11 = arith.constant -5.69250624E-5 : f32
    %24 = vector.broadcast %cst_11 : f32 to vector<8x52xf32>
    %25 = arith.addf %23, %24 : vector<8x52xf32>
    %26 = arith.mulf %25, %15 : vector<8x52xf32>
    %cst_12 = arith.constant -7.34990637E-4 : f32
    %27 = vector.broadcast %cst_12 : f32 to vector<8x52xf32>
    %28 = arith.addf %26, %27 : vector<8x52xf32>
    %29 = arith.mulf %28, %15 : vector<8x52xf32>
    %cst_13 = arith.constant -0.00295460015 : f32
    %30 = vector.broadcast %cst_13 : f32 to vector<8x52xf32>
    %31 = arith.addf %29, %30 : vector<8x52xf32>
    %32 = arith.mulf %31, %15 : vector<8x52xf32>
    %cst_14 = arith.constant -0.0160960332 : f32
    %33 = vector.broadcast %cst_14 : f32 to vector<8x52xf32>
    %34 = arith.addf %32, %33 : vector<8x52xf32>
    %35 = arith.mulf %34, %14 : vector<8x52xf32>
    %cst_15 = arith.constant -1.45660715E-5 : f32
    %36 = vector.broadcast %cst_15 : f32 to vector<8x52xf32>
    %37 = arith.mulf %36, %15 : vector<8x52xf32>
    %cst_16 = arith.constant -2.13374049E-4 : f32
    %38 = vector.broadcast %cst_16 : f32 to vector<8x52xf32>
    %39 = arith.addf %37, %38 : vector<8x52xf32>
    %40 = arith.mulf %39, %15 : vector<8x52xf32>
    %cst_17 = arith.constant -0.00168282702 : f32
    %41 = vector.broadcast %cst_17 : f32 to vector<8x52xf32>
    %42 = arith.addf %40, %41 : vector<8x52xf32>
    %43 = arith.mulf %42, %15 : vector<8x52xf32>
    %cst_18 = arith.constant -0.00737332925 : f32
    %44 = vector.broadcast %cst_18 : f32 to vector<8x52xf32>
    %45 = arith.addf %43, %44 : vector<8x52xf32>
    %46 = arith.mulf %45, %15 : vector<8x52xf32>
    %cst_19 = arith.constant -0.0142647391 : f32
    %47 = vector.broadcast %cst_19 : f32 to vector<8x52xf32>
    %48 = arith.addf %46, %47 : vector<8x52xf32>
    %49 = tpu.reciprocal %48 {approx = true} : vector<8x52xf32> -> vector<8x52xf32>
    %50 = arith.mulf %35, %49 : vector<8x52xf32>
    %cst_20 = arith.constant -1.000000e+00 : f32
    %cst_21 = arith.constant 1.000000e+00 : f32
    %51 = vector.broadcast %cst_20 : f32 to vector<8x52xf32>
    %52 = arith.maximumf %51, %50 : vector<8x52xf32>
    %53 = vector.broadcast %cst_21 : f32 to vector<8x52xf32>
    %54 = arith.minimumf %53, %52 : vector<8x52xf32>
    %cst_22 = arith.constant 1.000000e+00 : f32
    %55 = vector.broadcast %cst_22 : f32 to vector<8x52xf32>
    %56 = arith.addf %55, %54 : vector<8x52xf32>
    %57 = arith.mulf %8, %56 : vector<8x52xf32>
    %58 = arith.truncf %57 : vector<8x52xf32> to vector<8x52xbf16>
    %c0_23 = arith.constant 0 : index
    %c0_24 = arith.constant 0 : index
    %59 = vector.load %arg4[%c0_23, %c0_24] : memref<8x52xbf16, #tpu.memory_space<vmem>>, vector<8x52xbf16>
    tpu.vector_store %arg4[%c0_23, %c0_24], %58 {strides = array<i32>} : memref<8x52xbf16, #tpu.memory_space<vmem>>, vector<8x52xbf16>,
    return
  }
  func.func @transform_0(%arg0: i32) -> (i32, i32) {
    %c0_i32 = arith.constant 0 : i32
    %c0_i32_0 = arith.constant 0 : i32
    return %arg0, %c0_i32 : i32, i32
  }
  func.func @transform_1(%arg0: i32) -> (i32, i32) {
    %c0_i32 = arith.constant 0 : i32
    %c0_i32_0 = arith.constant 0 : i32
    %c0_i32_1 = arith.constant 0 : i32
    return %c0_i32, %c0_i32_0 : i32, i32
  }
  func.func @transform_2(%arg0: i32) -> (i32, i32) {
    %c0_i32 = arith.constant 0 : i32
    %c0_i32_0 = arith.constant 0 : i32
    %c0_i32_1 = arith.constant 0 : i32
    return %c0_i32, %c0_i32_0 : i32, i32
  }
  func.func @transform_3(%arg0: i32) -> (i32, i32) {
    %c0_i32 = arith.constant 0 : i32
    %c0_i32_0 = arith.constant 0 : i32
    return %arg0, %c0_i32 : i32, i32
  }
}

module attributes {stable_mosaic.version = 11 : i64} {
  func.func @_mm_kernel(%arg0: i32, %arg1: i32, %arg2: i32, %arg3: memref<104x128xbf16, #tpu.memory_space<vmem>>, %arg4: memref<128x128xbf16, #tpu.memory_space<vmem>>, %arg5: memref<1x128xf32, #tpu.memory_space<vmem>>, %arg6: memref<1x128xf32, #tpu.memory_space<vmem>>, %arg7: memref<1x128xf32, #tpu.memory_space<vmem>>, %arg8: memref<104x128xbf16, #tpu.memory_space<vmem>>, %arg9: memref<104x128xf32, #tpu.memory_space<vmem>>) attributes {dimension_semantics = [#tpu.dimension_semantics<parallel>, #tpu.dimension_semantics<parallel>, #tpu.dimension_semantics<arbitrary>], iteration_bounds = array<i64: 1, 1, 1>, scalar_prefetch = 0 : i64, scratch_operands = 1 : i64, tpu.core_type = #tpu.core_type<tc>, window_params = [{transform_indices = @transform_0, window_bounds = array<i64: 104, 128>}, {transform_indices = @transform_1, window_bounds = array<i64: 128, 128>}, {transform_indices = @transform_2, window_bounds = array<i64: 1, 128>}, {transform_indices = @transform_3, window_bounds = array<i64: 1, 128>}, {transform_indices = @transform_4, window_bounds = array<i64: 1, 128>}, {transform_indices = @transform_5, window_bounds = array<i64: 104, 128>}]} {
    %c0_i32 = arith.constant 0 : i32
    %0 = arith.cmpi eq, %arg2, %c0_i32 : i32
    %1 = arith.extui %0 : i1 to i32
    %c0_i32_0 = arith.constant 0 : i32
    %2 = arith.cmpi ne, %1, %c0_i32_0 : i32
    scf.if %2 {
      %cst_10 = arith.constant 0.000000e+00 : f32
      %12 = vector.broadcast %cst_10 : f32 to vector<104x128xf32>
      %c0_11 = arith.constant 0 : index
      %c0_12 = arith.constant 0 : index
      %13 = vector.load %arg9[%c0_11, %c0_12] : memref<104x128xf32, #tpu.memory_space<vmem>>, vector<104x128xf32>
      tpu.vector_store %arg9[%c0_11, %c0_12], %12 {strides = array<i32>} : memref<104x128xf32, #tpu.memory_space<vmem>>, vector<104x128xf32>,
    } else {
    }
    %c0 = arith.constant 0 : index
    %c0_1 = arith.constant 0 : index
    %3 = vector.load %arg9[%c0, %c0_1] : memref<104x128xf32, #tpu.memory_space<vmem>>, vector<104x128xf32>
    %c0_2 = arith.constant 0 : index
    %c0_3 = arith.constant 0 : index
    %4 = vector.load %arg3[%c0_2, %c0_3] : memref<104x128xbf16, #tpu.memory_space<vmem>>, vector<104x128xbf16>
    %c0_4 = arith.constant 0 : index
    %c0_5 = arith.constant 0 : index
    %5 = vector.load %arg4[%c0_4, %c0_5] : memref<128x128xbf16, #tpu.memory_space<vmem>>, vector<128x128xbf16>
    %cst = arith.constant dense<0.000000e+00> : vector<104x128xf32>
    %6 = tpu.matmul %4, %5, %cst {dimension_numbers = #tpu.dot_dimension_numbers<[1], [0], [0], [1], [0, 0, 1, 1], [], []>} : vector<104x128xbf16>, vector<128x128xbf16>, vector<104x128xf32> -> vector<104x128xf32>
    %7 = arith.addf %3, %6 : vector<104x128xf32>
    %c0_6 = arith.constant 0 : index
    %c0_7 = arith.constant 0 : index
    %8 = vector.load %arg9[%c0_6, %c0_7] : memref<104x128xf32, #tpu.memory_space<vmem>>, vector<104x128xf32>
    tpu.vector_store %arg9[%c0_6, %c0_7], %7 {strides = array<i32>} : memref<104x128xf32, #tpu.memory_space<vmem>>, vector<104x128xf32>,
    %c0_i32_8 = arith.constant 0 : i32
    %9 = arith.cmpi eq, %arg2, %c0_i32_8 : i32
    %10 = arith.extui %9 : i1 to i32
    %c0_i32_9 = arith.constant 0 : i32
    %11 = arith.cmpi ne, %10, %c0_i32_9 : i32
    scf.if %11 {
      %c0_10 = arith.constant 0 : index
      %c0_11 = arith.constant 0 : index
      %12 = vector.load %arg9[%c0_10, %c0_11] : memref<104x128xf32, #tpu.memory_space<vmem>>, vector<104x128xf32>
      %c0_12 = arith.constant 0 : index
      %c0_13 = arith.constant 0 : index
      %13 = vector.load %arg5[%c0_12, %c0_13] : memref<1x128xf32, #tpu.memory_space<vmem>>, vector<1x128xf32>
      %14 = vector.broadcast %13 : vector<1x128xf32> to vector<104x128xf32>
      %15 = arith.addf %12, %14 : vector<104x128xf32>
      %c0_14 = arith.constant 0 : index
      %c0_15 = arith.constant 0 : index
      %16 = vector.load %arg6[%c0_14, %c0_15] : memref<1x128xf32, #tpu.memory_space<vmem>>, vector<1x128xf32>
      %17 = vector.broadcast %16 : vector<1x128xf32> to vector<104x128xf32>
      %18 = arith.mulf %15, %17 : vector<104x128xf32>
      %c0_16 = arith.constant 0 : index
      %c0_17 = arith.constant 0 : index
      %19 = vector.load %arg7[%c0_16, %c0_17] : memref<1x128xf32, #tpu.memory_space<vmem>>, vector<1x128xf32>
      %20 = vector.broadcast %19 : vector<1x128xf32> to vector<104x128xf32>
      %21 = arith.addf %18, %20 : vector<104x128xf32>
      %cst_18 = arith.constant 5.000000e-01 : f32
      %22 = vector.broadcast %cst_18 : f32 to vector<104x128xf32>
      %23 = arith.mulf %22, %21 : vector<104x128xf32>
      %cst_19 = arith.constant 0.707106769 : f32
      %24 = vector.broadcast %cst_19 : f32 to vector<104x128xf32>
      %25 = arith.mulf %21, %24 : vector<104x128xf32>
      %cst_20 = arith.constant -4.000000e+00 : f32
      %cst_21 = arith.constant 4.000000e+00 : f32
      %26 = vector.broadcast %cst_20 : f32 to vector<104x128xf32>
      %27 = arith.maximumf %26, %25 : vector<104x128xf32>
      %28 = vector.broadcast %cst_21 : f32 to vector<104x128xf32>
      %29 = arith.minimumf %28, %27 : vector<104x128xf32>
      %30 = arith.mulf %29, %29 : vector<104x128xf32>
      %cst_22 = arith.constant -2.72614237E-10 : f32
      %31 = vector.broadcast %cst_22 : f32 to vector<104x128xf32>
      %32 = arith.mulf %31, %30 : vector<104x128xf32>
      %cst_23 = arith.constant 2.77068146E-8 : f32
      %33 = vector.broadcast %cst_23 : f32 to vector<104x128xf32>
      %34 = arith.addf %32, %33 : vector<104x128xf32>
      %35 = arith.mulf %34, %30 : vector<104x128xf32>
      %cst_24 = arith.constant -2.10102394E-6 : f32
      %36 = vector.broadcast %cst_24 : f32 to vector<104x128xf32>
      %37 = arith.addf %35, %36 : vector<104x128xf32>
      %38 = arith.mulf %37, %30 : vector<104x128xf32>
      %cst_25 = arith.constant -5.69250624E-5 : f32
      %39 = vector.broadcast %cst_25 : f32 to vector<104x128xf32>
      %40 = arith.addf %38, %39 : vector<104x128xf32>
      %41 = arith.mulf %40, %30 : vector<104x128xf32>
      %cst_26 = arith.constant -7.34990637E-4 : f32
      %42 = vector.broadcast %cst_26 : f32 to vector<104x128xf32>
      %43 = arith.addf %41, %42 : vector<104x128xf32>
      %44 = arith.mulf %43, %30 : vector<104x128xf32>
      %cst_27 = arith.constant -0.00295460015 : f32
      %45 = vector.broadcast %cst_27 : f32 to vector<104x128xf32>
      %46 = arith.addf %44, %45 : vector<104x128xf32>
      %47 = arith.mulf %46, %30 : vector<104x128xf32>
      %cst_28 = arith.constant -0.0160960332 : f32
      %48 = vector.broadcast %cst_28 : f32 to vector<104x128xf32>
      %49 = arith.addf %47, %48 : vector<104x128xf32>
      %50 = arith.mulf %49, %29 : vector<104x128xf32>
      %cst_29 = arith.constant -1.45660715E-5 : f32
      %51 = vector.broadcast %cst_29 : f32 to vector<104x128xf32>
      %52 = arith.mulf %51, %30 : vector<104x128xf32>
      %cst_30 = arith.constant -2.13374049E-4 : f32
      %53 = vector.broadcast %cst_30 : f32 to vector<104x128xf32>
      %54 = arith.addf %52, %53 : vector<104x128xf32>
      %55 = arith.mulf %54, %30 : vector<104x128xf32>
      %cst_31 = arith.constant -0.00168282702 : f32
      %56 = vector.broadcast %cst_31 : f32 to vector<104x128xf32>
      %57 = arith.addf %55, %56 : vector<104x128xf32>
      %58 = arith.mulf %57, %30 : vector<104x128xf32>
      %cst_32 = arith.constant -0.00737332925 : f32
      %59 = vector.broadcast %cst_32 : f32 to vector<104x128xf32>
      %60 = arith.addf %58, %59 : vector<104x128xf32>
      %61 = arith.mulf %60, %30 : vector<104x128xf32>
      %cst_33 = arith.constant -0.0142647391 : f32
      %62 = vector.broadcast %cst_33 : f32 to vector<104x128xf32>
      %63 = arith.addf %61, %62 : vector<104x128xf32>
      %64 = tpu.reciprocal %63 {approx = true} : vector<104x128xf32> -> vector<104x128xf32>
      %65 = arith.mulf %50, %64 : vector<104x128xf32>
      %cst_34 = arith.constant -1.000000e+00 : f32
      %cst_35 = arith.constant 1.000000e+00 : f32
      %66 = vector.broadcast %cst_34 : f32 to vector<104x128xf32>
      %67 = arith.maximumf %66, %65 : vector<104x128xf32>
      %68 = vector.broadcast %cst_35 : f32 to vector<104x128xf32>
      %69 = arith.minimumf %68, %67 : vector<104x128xf32>
      %cst_36 = arith.constant 1.000000e+00 : f32
      %70 = vector.broadcast %cst_36 : f32 to vector<104x128xf32>
      %71 = arith.addf %70, %69 : vector<104x128xf32>
      %72 = arith.mulf %23, %71 : vector<104x128xf32>
      %73 = arith.truncf %72 : vector<104x128xf32> to vector<104x128xbf16>
      %c0_37 = arith.constant 0 : index
      %c0_38 = arith.constant 0 : index
      %74 = vector.load %arg8[%c0_37, %c0_38] : memref<104x128xbf16, #tpu.memory_space<vmem>>, vector<104x128xbf16>
      tpu.vector_store %arg8[%c0_37, %c0_38], %73 {strides = array<i32>} : memref<104x128xbf16, #tpu.memory_space<vmem>>, vector<104x128xbf16>,
    } else {
    }
    return
  }
  func.func @transform_0(%arg0: i32, %arg1: i32, %arg2: i32) -> (i32, i32) {
    %c0_i32 = arith.constant 0 : i32
    return %arg0, %arg2 : i32, i32
  }
  func.func @transform_1(%arg0: i32, %arg1: i32, %arg2: i32) -> (i32, i32) {
    %c0_i32 = arith.constant 0 : i32
    return %arg2, %arg1 : i32, i32
  }
  func.func @transform_2(%arg0: i32, %arg1: i32, %arg2: i32) -> (i32, i32) {
    %c0_i32 = arith.constant 0 : i32
    %c0_i32_0 = arith.constant 0 : i32
    return %c0_i32, %arg1 : i32, i32
  }
  func.func @transform_3(%arg0: i32, %arg1: i32, %arg2: i32) -> (i32, i32) {
    %c0_i32 = arith.constant 0 : i32
    %c0_i32_0 = arith.constant 0 : i32
    return %c0_i32, %arg1 : i32, i32
  }
  func.func @transform_4(%arg0: i32, %arg1: i32, %arg2: i32) -> (i32, i32) {
    %c0_i32 = arith.constant 0 : i32
    %c0_i32_0 = arith.constant 0 : i32
    return %c0_i32, %arg1 : i32, i32
  }
  func.func @transform_5(%arg0: i32, %arg1: i32, %arg2: i32) -> (i32, i32) {
    %c0_i32 = arith.constant 0 : i32
    return %arg0, %arg1 : i32, i32
  }
}

module attributes {stable_mosaic.version = 11 : i64} {
  func.func @_mm_kernel(%arg0: i32, %arg1: i32, %arg2: i32, %arg3: memref<104x128xbf16, #tpu.memory_space<vmem>>, %arg4: memref<128x128xbf16, #tpu.memory_space<vmem>>, %arg5: memref<1x128xf32, #tpu.memory_space<vmem>>, %arg6: memref<104x128xf32, #tpu.memory_space<vmem>>, %arg7: memref<104x128xf32, #tpu.memory_space<vmem>>, %arg8: memref<104x128xf32, #tpu.memory_space<vmem>>) attributes {dimension_semantics = [#tpu.dimension_semantics<parallel>, #tpu.dimension_semantics<parallel>, #tpu.dimension_semantics<arbitrary>], iteration_bounds = array<i64: 1, 1, 1>, scalar_prefetch = 0 : i64, scratch_operands = 1 : i64, tpu.core_type = #tpu.core_type<tc>, window_params = [{transform_indices = @transform_0, window_bounds = array<i64: 104, 128>}, {transform_indices = @transform_1, window_bounds = array<i64: 128, 128>}, {transform_indices = @transform_2, window_bounds = array<i64: 1, 128>}, {transform_indices = @transform_3, window_bounds = array<i64: 104, 128>}, {transform_indices = @transform_4, window_bounds = array<i64: 104, 128>}]} {
    %c0_i32 = arith.constant 0 : i32
    %0 = arith.cmpi eq, %arg2, %c0_i32 : i32
    %1 = arith.extui %0 : i1 to i32
    %c0_i32_0 = arith.constant 0 : i32
    %2 = arith.cmpi ne, %1, %c0_i32_0 : i32
    scf.if %2 {
      %cst_10 = arith.constant 0.000000e+00 : f32
      %12 = vector.broadcast %cst_10 : f32 to vector<104x128xf32>
      %c0_11 = arith.constant 0 : index
      %c0_12 = arith.constant 0 : index
      %13 = vector.load %arg8[%c0_11, %c0_12] : memref<104x128xf32, #tpu.memory_space<vmem>>, vector<104x128xf32>
      tpu.vector_store %arg8[%c0_11, %c0_12], %12 {strides = array<i32>} : memref<104x128xf32, #tpu.memory_space<vmem>>, vector<104x128xf32>,
    } else {
    }
    %c0 = arith.constant 0 : index
    %c0_1 = arith.constant 0 : index
    %3 = vector.load %arg8[%c0, %c0_1] : memref<104x128xf32, #tpu.memory_space<vmem>>, vector<104x128xf32>
    %c0_2 = arith.constant 0 : index
    %c0_3 = arith.constant 0 : index
    %4 = vector.load %arg3[%c0_2, %c0_3] : memref<104x128xbf16, #tpu.memory_space<vmem>>, vector<104x128xbf16>
    %c0_4 = arith.constant 0 : index
    %c0_5 = arith.constant 0 : index
    %5 = vector.load %arg4[%c0_4, %c0_5] : memref<128x128xbf16, #tpu.memory_space<vmem>>, vector<128x128xbf16>
    %cst = arith.constant dense<0.000000e+00> : vector<104x128xf32>
    %6 = tpu.matmul %4, %5, %cst {dimension_numbers = #tpu.dot_dimension_numbers<[1], [0], [0], [1], [0, 0, 1, 1], [], []>} : vector<104x128xbf16>, vector<128x128xbf16>, vector<104x128xf32> -> vector<104x128xf32>
    %7 = arith.addf %3, %6 : vector<104x128xf32>
    %c0_6 = arith.constant 0 : index
    %c0_7 = arith.constant 0 : index
    %8 = vector.load %arg8[%c0_6, %c0_7] : memref<104x128xf32, #tpu.memory_space<vmem>>, vector<104x128xf32>
    tpu.vector_store %arg8[%c0_6, %c0_7], %7 {strides = array<i32>} : memref<104x128xf32, #tpu.memory_space<vmem>>, vector<104x128xf32>,
    %c0_i32_8 = arith.constant 0 : i32
    %9 = arith.cmpi eq, %arg2, %c0_i32_8 : i32
    %10 = arith.extui %9 : i1 to i32
    %c0_i32_9 = arith.constant 0 : i32
    %11 = arith.cmpi ne, %10, %c0_i32_9 : i32
    scf.if %11 {
      %c0_10 = arith.constant 0 : index
      %c0_11 = arith.constant 0 : index
      %12 = vector.load %arg8[%c0_10, %c0_11] : memref<104x128xf32, #tpu.memory_space<vmem>>, vector<104x128xf32>
      %c0_12 = arith.constant 0 : index
      %c0_13 = arith.constant 0 : index
      %13 = vector.load %arg5[%c0_12, %c0_13] : memref<1x128xf32, #tpu.memory_space<vmem>>, vector<1x128xf32>
      %14 = vector.broadcast %13 : vector<1x128xf32> to vector<104x128xf32>
      %15 = arith.addf %12, %14 : vector<104x128xf32>
      %c0_14 = arith.constant 0 : index
      %c0_15 = arith.constant 0 : index
      %16 = vector.load %arg6[%c0_14, %c0_15] : memref<104x128xf32, #tpu.memory_space<vmem>>, vector<104x128xf32>
      %17 = arith.addf %15, %16 : vector<104x128xf32>
      %c0_16 = arith.constant 0 : index
      %c0_17 = arith.constant 0 : index
      %18 = vector.load %arg7[%c0_16, %c0_17] : memref<104x128xf32, #tpu.memory_space<vmem>>, vector<104x128xf32>
      tpu.vector_store %arg7[%c0_16, %c0_17], %17 {strides = array<i32>} : memref<104x128xf32, #tpu.memory_space<vmem>>, vector<104x128xf32>,
    } else {
    }
    return
  }
  func.func @transform_0(%arg0: i32, %arg1: i32, %arg2: i32) -> (i32, i32) {
    %c0_i32 = arith.constant 0 : i32
    return %arg0, %arg2 : i32, i32
  }
  func.func @transform_1(%arg0: i32, %arg1: i32, %arg2: i32) -> (i32, i32) {
    %c0_i32 = arith.constant 0 : i32
    return %arg2, %arg1 : i32, i32
  }
  func.func @transform_2(%arg0: i32, %arg1: i32, %arg2: i32) -> (i32, i32) {
    %c0_i32 = arith.constant 0 : i32
    %c0_i32_0 = arith.constant 0 : i32
    return %c0_i32, %arg1 : i32, i32
  }
  func.func @transform_3(%arg0: i32, %arg1: i32, %arg2: i32) -> (i32, i32) {
    %c0_i32 = arith.constant 0 : i32
    return %arg0, %arg1 : i32, i32
  }
  func.func @transform_4(%arg0: i32, %arg1: i32, %arg2: i32) -> (i32, i32) {
    %c0_i32 = arith.constant 0 : i32
    return %arg0, %arg1 : i32, i32
  }
}

module attributes {stable_mosaic.version = 11 : i64} {
  func.func @_mm_kernel(%arg0: i32, %arg1: i32, %arg2: i32, %arg3: memref<8x128xbf16, #tpu.memory_space<vmem>>, %arg4: memref<128x128xbf16, #tpu.memory_space<vmem>>, %arg5: memref<1x128xf32, #tpu.memory_space<vmem>>, %arg6: memref<8x128xf32, #tpu.memory_space<vmem>>, %arg7: memref<8x128xf32, #tpu.memory_space<vmem>>) attributes {dimension_semantics = [#tpu.dimension_semantics<parallel>, #tpu.dimension_semantics<parallel>, #tpu.dimension_semantics<arbitrary>], iteration_bounds = array<i64: 1, 1, 1>, scalar_prefetch = 0 : i64, scratch_operands = 1 : i64, tpu.core_type = #tpu.core_type<tc>, window_params = [{transform_indices = @transform_0, window_bounds = array<i64: 8, 128>}, {transform_indices = @transform_1, window_bounds = array<i64: 128, 128>}, {transform_indices = @transform_2, window_bounds = array<i64: 1, 128>}, {transform_indices = @transform_3, window_bounds = array<i64: 8, 128>}]} {
    %c0_i32 = arith.constant 0 : i32
    %0 = arith.cmpi eq, %arg2, %c0_i32 : i32
    %1 = arith.extui %0 : i1 to i32
    %c0_i32_0 = arith.constant 0 : i32
    %2 = arith.cmpi ne, %1, %c0_i32_0 : i32
    scf.if %2 {
      %cst_10 = arith.constant 0.000000e+00 : f32
      %12 = vector.broadcast %cst_10 : f32 to vector<8x128xf32>
      %c0_11 = arith.constant 0 : index
      %c0_12 = arith.constant 0 : index
      %13 = vector.load %arg7[%c0_11, %c0_12] : memref<8x128xf32, #tpu.memory_space<vmem>>, vector<8x128xf32>
      tpu.vector_store %arg7[%c0_11, %c0_12], %12 {strides = array<i32>} : memref<8x128xf32, #tpu.memory_space<vmem>>, vector<8x128xf32>,
    } else {
    }
    %c0 = arith.constant 0 : index
    %c0_1 = arith.constant 0 : index
    %3 = vector.load %arg7[%c0, %c0_1] : memref<8x128xf32, #tpu.memory_space<vmem>>, vector<8x128xf32>
    %c0_2 = arith.constant 0 : index
    %c0_3 = arith.constant 0 : index
    %4 = vector.load %arg3[%c0_2, %c0_3] : memref<8x128xbf16, #tpu.memory_space<vmem>>, vector<8x128xbf16>
    %c0_4 = arith.constant 0 : index
    %c0_5 = arith.constant 0 : index
    %5 = vector.load %arg4[%c0_4, %c0_5] : memref<128x128xbf16, #tpu.memory_space<vmem>>, vector<128x128xbf16>
    %cst = arith.constant dense<0.000000e+00> : vector<8x128xf32>
    %6 = tpu.matmul %4, %5, %cst {dimension_numbers = #tpu.dot_dimension_numbers<[1], [0], [0], [1], [0, 0, 1, 1], [], []>} : vector<8x128xbf16>, vector<128x128xbf16>, vector<8x128xf32> -> vector<8x128xf32>
    %7 = arith.addf %3, %6 : vector<8x128xf32>
    %c0_6 = arith.constant 0 : index
    %c0_7 = arith.constant 0 : index
    %8 = vector.load %arg7[%c0_6, %c0_7] : memref<8x128xf32, #tpu.memory_space<vmem>>, vector<8x128xf32>
    tpu.vector_store %arg7[%c0_6, %c0_7], %7 {strides = array<i32>} : memref<8x128xf32, #tpu.memory_space<vmem>>, vector<8x128xf32>,
    %c0_i32_8 = arith.constant 0 : i32
    %9 = arith.cmpi eq, %arg2, %c0_i32_8 : i32
    %10 = arith.extui %9 : i1 to i32
    %c0_i32_9 = arith.constant 0 : i32
    %11 = arith.cmpi ne, %10, %c0_i32_9 : i32
    scf.if %11 {
      %c0_10 = arith.constant 0 : index
      %c0_11 = arith.constant 0 : index
      %12 = vector.load %arg7[%c0_10, %c0_11] : memref<8x128xf32, #tpu.memory_space<vmem>>, vector<8x128xf32>
      %c0_12 = arith.constant 0 : index
      %c0_13 = arith.constant 0 : index
      %13 = vector.load %arg5[%c0_12, %c0_13] : memref<1x128xf32, #tpu.memory_space<vmem>>, vector<1x128xf32>
      %14 = vector.broadcast %13 : vector<1x128xf32> to vector<8x128xf32>
      %15 = arith.addf %12, %14 : vector<8x128xf32>
      %c0_14 = arith.constant 0 : index
      %c0_15 = arith.constant 0 : index
      %16 = vector.load %arg6[%c0_14, %c0_15] : memref<8x128xf32, #tpu.memory_space<vmem>>, vector<8x128xf32>
      tpu.vector_store %arg6[%c0_14, %c0_15], %15 {strides = array<i32>} : memref<8x128xf32, #tpu.memory_space<vmem>>, vector<8x128xf32>,
    } else {
    }
    return
  }
  func.func @transform_0(%arg0: i32, %arg1: i32, %arg2: i32) -> (i32, i32) {
    %c0_i32 = arith.constant 0 : i32
    return %arg0, %arg2 : i32, i32
  }
  func.func @transform_1(%arg0: i32, %arg1: i32, %arg2: i32) -> (i32, i32) {
    %c0_i32 = arith.constant 0 : i32
    return %arg2, %arg1 : i32, i32
  }
  func.func @transform_2(%arg0: i32, %arg1: i32, %arg2: i32) -> (i32, i32) {
    %c0_i32 = arith.constant 0 : i32
    %c0_i32_0 = arith.constant 0 : i32
    return %c0_i32, %arg1 : i32, i32
  }
  func.func @transform_3(%arg0: i32, %arg1: i32, %arg2: i32) -> (i32, i32) {
    %c0_i32 = arith.constant 0 : i32
    return %arg0, %arg1 : i32, i32
  }
}

module attributes {stable_mosaic.version = 11 : i64} {
  func.func @_mm_kernel(%arg0: i32, %arg1: i32, %arg2: i32, %arg3: memref<8x128xbf16, #tpu.memory_space<vmem>>, %arg4: memref<128x256xbf16, #tpu.memory_space<vmem>>, %arg5: memref<1x256xf32, #tpu.memory_space<vmem>>, %arg6: memref<8x256xf32, #tpu.memory_space<vmem>>, %arg7: memref<8x256xf32, #tpu.memory_space<vmem>>) attributes {dimension_semantics = [#tpu.dimension_semantics<parallel>, #tpu.dimension_semantics<parallel>, #tpu.dimension_semantics<arbitrary>], iteration_bounds = array<i64: 1, 2, 1>, scalar_prefetch = 0 : i64, scratch_operands = 1 : i64, tpu.core_type = #tpu.core_type<tc>, window_params = [{transform_indices = @transform_0, window_bounds = array<i64: 8, 128>}, {transform_indices = @transform_1, window_bounds = array<i64: 128, 256>}, {transform_indices = @transform_2, window_bounds = array<i64: 1, 256>}, {transform_indices = @transform_3, window_bounds = array<i64: 8, 256>}]} {
    %c0_i32 = arith.constant 0 : i32
    %0 = arith.cmpi eq, %arg2, %c0_i32 : i32
    %1 = arith.extui %0 : i1 to i32
    %c0_i32_0 = arith.constant 0 : i32
    %2 = arith.cmpi ne, %1, %c0_i32_0 : i32
    scf.if %2 {
      %cst_10 = arith.constant 0.000000e+00 : f32
      %12 = vector.broadcast %cst_10 : f32 to vector<8x256xf32>
      %c0_11 = arith.constant 0 : index
      %c0_12 = arith.constant 0 : index
      %13 = vector.load %arg7[%c0_11, %c0_12] : memref<8x256xf32, #tpu.memory_space<vmem>>, vector<8x256xf32>
      tpu.vector_store %arg7[%c0_11, %c0_12], %12 {strides = array<i32>} : memref<8x256xf32, #tpu.memory_space<vmem>>, vector<8x256xf32>,
    } else {
    }
    %c0 = arith.constant 0 : index
    %c0_1 = arith.constant 0 : index
    %3 = vector.load %arg7[%c0, %c0_1] : memref<8x256xf32, #tpu.memory_space<vmem>>, vector<8x256xf32>
    %c0_2 = arith.constant 0 : index
    %c0_3 = arith.constant 0 : index
    %4 = vector.load %arg3[%c0_2, %c0_3] : memref<8x128xbf16, #tpu.memory_space<vmem>>, vector<8x128xbf16>
    %c0_4 = arith.constant 0 : index
    %c0_5 = arith.constant 0 : index
    %5 = vector.load %arg4[%c0_4, %c0_5] : memref<128x256xbf16, #tpu.memory_space<vmem>>, vector<128x256xbf16>
    %cst = arith.constant dense<0.000000e+00> : vector<8x256xf32>
    %6 = tpu.matmul %4, %5, %cst {dimension_numbers = #tpu.dot_dimension_numbers<[1], [0], [0], [1], [0, 0, 1, 1], [], []>} : vector<8x128xbf16>, vector<128x256xbf16>, vector<8x256xf32> -> vector<8x256xf32>
    %7 = arith.addf %3, %6 : vector<8x256xf32>
    %c0_6 = arith.constant 0 : index
    %c0_7 = arith.constant 0 : index
    %8 = vector.load %arg7[%c0_6, %c0_7] : memref<8x256xf32, #tpu.memory_space<vmem>>, vector<8x256xf32>
    tpu.vector_store %arg7[%c0_6, %c0_7], %7 {strides = array<i32>} : memref<8x256xf32, #tpu.memory_space<vmem>>, vector<8x256xf32>,
    %c0_i32_8 = arith.constant 0 : i32
    %9 = arith.cmpi eq, %arg2, %c0_i32_8 : i32
    %10 = arith.extui %9 : i1 to i32
    %c0_i32_9 = arith.constant 0 : i32
    %11 = arith.cmpi ne, %10, %c0_i32_9 : i32
    scf.if %11 {
      %c0_10 = arith.constant 0 : index
      %c0_11 = arith.constant 0 : index
      %12 = vector.load %arg7[%c0_10, %c0_11] : memref<8x256xf32, #tpu.memory_space<vmem>>, vector<8x256xf32>
      %c0_12 = arith.constant 0 : index
      %c0_13 = arith.constant 0 : index
      %13 = vector.load %arg5[%c0_12, %c0_13] : memref<1x256xf32, #tpu.memory_space<vmem>>, vector<1x256xf32>
      %14 = vector.broadcast %13 : vector<1x256xf32> to vector<8x256xf32>
      %15 = arith.addf %12, %14 : vector<8x256xf32>
      %c0_14 = arith.constant 0 : index
      %c0_15 = arith.constant 0 : index
      %16 = vector.load %arg6[%c0_14, %c0_15] : memref<8x256xf32, #tpu.memory_space<vmem>>, vector<8x256xf32>
      tpu.vector_store %arg6[%c0_14, %c0_15], %15 {strides = array<i32>} : memref<8x256xf32, #tpu.memory_space<vmem>>, vector<8x256xf32>,
    } else {
    }
    return
  }
  func.func @transform_0(%arg0: i32, %arg1: i32, %arg2: i32) -> (i32, i32) {
    %c0_i32 = arith.constant 0 : i32
    return %arg0, %arg2 : i32, i32
  }
  func.func @transform_1(%arg0: i32, %arg1: i32, %arg2: i32) -> (i32, i32) {
    %c0_i32 = arith.constant 0 : i32
    return %arg2, %arg1 : i32, i32
  }
  func.func @transform_2(%arg0: i32, %arg1: i32, %arg2: i32) -> (i32, i32) {
    %c0_i32 = arith.constant 0 : i32
    %c0_i32_0 = arith.constant 0 : i32
    return %c0_i32, %arg1 : i32, i32
  }
  func.func @transform_3(%arg0: i32, %arg1: i32, %arg2: i32) -> (i32, i32) {
    %c0_i32 = arith.constant 0 : i32
    return %arg0, %arg1 : i32, i32
  }
}

module attributes {stable_mosaic.version = 11 : i64} {
  func.func @_lstm_bidir_kernel(%arg0: i32, %arg1: memref<1x4x2x512xf32, #tpu.memory_space<vmem>>, %arg2: memref<1x128x512xf32, #tpu.memory_space<vmem>>, %arg3: memref<1x4x2x128xf32, #tpu.memory_space<vmem>>) attributes {dimension_semantics = [#tpu.dimension_semantics<parallel>], iteration_bounds = array<i64: 2>, scalar_prefetch = 0 : i64, scratch_operands = 0 : i64, tpu.core_type = #tpu.core_type<tc>, window_params = [{transform_indices = @transform_0, window_bounds = array<i64: 1, 4, 2, 512>}, {transform_indices = @transform_1, window_bounds = array<i64: 1, 128, 512>}, {transform_indices = @transform_2, window_bounds = array<i64: 1, 4, 2, 128>}]} {
    %cst = arith.constant 0.000000e+00 : f32
    %0 = vector.broadcast %cst : f32 to vector<2x128xf32>
    %c0_i32 = arith.constant 0 : i32
    %c4_i32 = arith.constant 4 : i32
    %1 = arith.addi %c0_i32, %c4_i32 : i32
    %c1_i32 = arith.constant 1 : i32
    %2:2 = scf.for %arg4 = %c0_i32 to %1 step %c1_i32 iter_args(%arg5 = %0, %arg6 = %0) -> (vector<2x128xf32>, vector<2x128xf32>)  : i32 {
      %c0_i32_1 = arith.constant 0 : i32
      %3 = arith.cmpi eq, %arg0, %c0_i32_1 : i32
      %c3_i32 = arith.constant 3 : i32
      %4 = arith.subi %c3_i32, %arg4 : i32
      %5 = arith.select %3, %arg4, %4 : i32
      %c0 = arith.constant 0 : index
      %6 = arith.index_cast %5 : i32 to index
      %c0_2 = arith.constant 0 : index
      %c0_3 = arith.constant 0 : index
      %7 = vector.load %arg1[%c0, %6, %c0_2, %c0_3] : memref<1x4x2x512xf32, #tpu.memory_space<vmem>>, vector<1x1x2x512xf32>
      %8 = vector.shape_cast %7 : vector<1x1x2x512xf32> to vector<2x512xf32>
      %c0_4 = arith.constant 0 : index
      %c0_5 = arith.constant 0 : index
      %c0_6 = arith.constant 0 : index
      %9 = vector.load %arg2[%c0_4, %c0_5, %c0_6] : memref<1x128x512xf32, #tpu.memory_space<vmem>>, vector<1x128x512xf32>
      %10 = vector.shape_cast %9 : vector<1x128x512xf32> to vector<128x512xf32>
      %cst_7 = arith.constant dense<0.000000e+00> : vector<2x512xf32>
      %11 = tpu.matmul %arg5, %10, %cst_7 {dimension_numbers = #tpu.dot_dimension_numbers<[1], [0], [0], [1], [0, 0, 1, 1], [], []>} : vector<2x128xf32>, vector<128x512xf32>, vector<2x512xf32> -> vector<2x512xf32>
      %12 = arith.addf %8, %11 : vector<2x512xf32>
      %13 = vector.extract_strided_slice %12 {offsets = [0, 0], sizes = [2, 128], strides = [1, 1]} : vector<2x512xf32> to vector<2x128xf32>
      %14 = arith.negf %13 : vector<2x128xf32>
      %15 = math.exp %14 : vector<2x128xf32>
      %cst_8 = arith.constant 1.000000e+00 : f32
      %16 = vector.broadcast %cst_8 : f32 to vector<2x128xf32>
      %17 = arith.addf %16, %15 : vector<2x128xf32>
      %18 = arith.divf %16, %17 : vector<2x128xf32>
      %19 = vector.extract_strided_slice %12 {offsets = [0, 128], sizes = [2, 128], strides = [1, 1]} : vector<2x512xf32> to vector<2x128xf32>
      %20 = arith.negf %19 : vector<2x128xf32>
      %21 = math.exp %20 : vector<2x128xf32>
      %cst_9 = arith.constant 1.000000e+00 : f32
      %22 = vector.broadcast %cst_9 : f32 to vector<2x128xf32>
      %23 = arith.addf %22, %21 : vector<2x128xf32>
      %24 = arith.divf %22, %23 : vector<2x128xf32>
      %25 = vector.extract_strided_slice %12 {offsets = [0, 256], sizes = [2, 128], strides = [1, 1]} : vector<2x512xf32> to vector<2x128xf32>
      %26 = math.tanh %25 : vector<2x128xf32>
      %27 = vector.extract_strided_slice %12 {offsets = [0, 384], sizes = [2, 128], strides = [1, 1]} : vector<2x512xf32> to vector<2x128xf32>
      %28 = arith.negf %27 : vector<2x128xf32>
      %29 = math.exp %28 : vector<2x128xf32>
      %cst_10 = arith.constant 1.000000e+00 : f32
      %30 = vector.broadcast %cst_10 : f32 to vector<2x128xf32>
      %31 = arith.addf %30, %29 : vector<2x128xf32>
      %32 = arith.divf %30, %31 : vector<2x128xf32>
      %33 = arith.mulf %24, %arg6 : vector<2x128xf32>
      %34 = arith.mulf %18, %26 : vector<2x128xf32>
      %35 = arith.addf %33, %34 : vector<2x128xf32>
      %36 = math.tanh %35 : vector<2x128xf32>
      %37 = arith.mulf %32, %36 : vector<2x128xf32>
      %c0_11 = arith.constant 0 : index
      %38 = arith.index_cast %5 : i32 to index
      %c0_12 = arith.constant 0 : index
      %c0_13 = arith.constant 0 : index
      %39 = vector.load %arg3[%c0_11, %38, %c0_12, %c0_13] : memref<1x4x2x128xf32, #tpu.memory_space<vmem>>, vector<1x1x2x128xf32>
      %40 = vector.shape_cast %39 : vector<1x1x2x128xf32> to vector<2x128xf32>
      %41 = vector.shape_cast %37 : vector<2x128xf32> to vector<1x1x2x128xf32>
      tpu.vector_store %arg3[%c0_11, %38, %c0_12, %c0_13], %41 {strides = array<i32>} : memref<1x4x2x128xf32, #tpu.memory_space<vmem>>, vector<1x1x2x128xf32>,
      scf.yield %37, %35 : vector<2x128xf32>, vector<2x128xf32>
    }
    %c4_i32_0 = arith.constant 4 : i32
    return
  }
  func.func @transform_0(%arg0: i32) -> (i32, i32, i32, i32) {
    %c0_i32 = arith.constant 0 : i32
    %c0_i32_0 = arith.constant 0 : i32
    %c0_i32_1 = arith.constant 0 : i32
    %c0_i32_2 = arith.constant 0 : i32
    return %arg0, %c0_i32, %c0_i32_0, %c0_i32_1 : i32, i32, i32, i32
  }
  func.func @transform_1(%arg0: i32) -> (i32, i32, i32) {
    %c0_i32 = arith.constant 0 : i32
    %c0_i32_0 = arith.constant 0 : i32
    %c0_i32_1 = arith.constant 0 : i32
    return %arg0, %c0_i32, %c0_i32_0 : i32, i32, i32
  }
  func.func @transform_2(%arg0: i32) -> (i32, i32, i32, i32) {
    %c0_i32 = arith.constant 0 : i32
    %c0_i32_0 = arith.constant 0 : i32
    %c0_i32_1 = arith.constant 0 : i32
    %c0_i32_2 = arith.constant 0 : i32
    return %arg0, %c0_i32, %c0_i32_0, %c0_i32_1 : i32, i32, i32, i32
  }
}

module attributes {stable_mosaic.version = 11 : i64} {
  func.func @_mm_kernel(%arg0: i32, %arg1: i32, %arg2: i32, %arg3: memref<8x256xbf16, #tpu.memory_space<vmem>>, %arg4: memref<256x256xbf16, #tpu.memory_space<vmem>>, %arg5: memref<1x256xf32, #tpu.memory_space<vmem>>, %arg6: memref<8x256xf32, #tpu.memory_space<vmem>>, %arg7: memref<8x256xf32, #tpu.memory_space<vmem>>) attributes {dimension_semantics = [#tpu.dimension_semantics<parallel>, #tpu.dimension_semantics<parallel>, #tpu.dimension_semantics<arbitrary>], iteration_bounds = array<i64: 1, 2, 1>, scalar_prefetch = 0 : i64, scratch_operands = 1 : i64, tpu.core_type = #tpu.core_type<tc>, window_params = [{transform_indices = @transform_0, window_bounds = array<i64: 8, 256>}, {transform_indices = @transform_1, window_bounds = array<i64: 256, 256>}, {transform_indices = @transform_2, window_bounds = array<i64: 1, 256>}, {transform_indices = @transform_3, window_bounds = array<i64: 8, 256>}]} {
    %c0_i32 = arith.constant 0 : i32
    %0 = arith.cmpi eq, %arg2, %c0_i32 : i32
    %1 = arith.extui %0 : i1 to i32
    %c0_i32_0 = arith.constant 0 : i32
    %2 = arith.cmpi ne, %1, %c0_i32_0 : i32
    scf.if %2 {
      %cst_10 = arith.constant 0.000000e+00 : f32
      %12 = vector.broadcast %cst_10 : f32 to vector<8x256xf32>
      %c0_11 = arith.constant 0 : index
      %c0_12 = arith.constant 0 : index
      %13 = vector.load %arg7[%c0_11, %c0_12] : memref<8x256xf32, #tpu.memory_space<vmem>>, vector<8x256xf32>
      tpu.vector_store %arg7[%c0_11, %c0_12], %12 {strides = array<i32>} : memref<8x256xf32, #tpu.memory_space<vmem>>, vector<8x256xf32>,
    } else {
    }
    %c0 = arith.constant 0 : index
    %c0_1 = arith.constant 0 : index
    %3 = vector.load %arg7[%c0, %c0_1] : memref<8x256xf32, #tpu.memory_space<vmem>>, vector<8x256xf32>
    %c0_2 = arith.constant 0 : index
    %c0_3 = arith.constant 0 : index
    %4 = vector.load %arg3[%c0_2, %c0_3] : memref<8x256xbf16, #tpu.memory_space<vmem>>, vector<8x256xbf16>
    %c0_4 = arith.constant 0 : index
    %c0_5 = arith.constant 0 : index
    %5 = vector.load %arg4[%c0_4, %c0_5] : memref<256x256xbf16, #tpu.memory_space<vmem>>, vector<256x256xbf16>
    %cst = arith.constant dense<0.000000e+00> : vector<8x256xf32>
    %6 = tpu.matmul %4, %5, %cst {dimension_numbers = #tpu.dot_dimension_numbers<[1], [0], [0], [1], [0, 0, 1, 1], [], []>} : vector<8x256xbf16>, vector<256x256xbf16>, vector<8x256xf32> -> vector<8x256xf32>
    %7 = arith.addf %3, %6 : vector<8x256xf32>
    %c0_6 = arith.constant 0 : index
    %c0_7 = arith.constant 0 : index
    %8 = vector.load %arg7[%c0_6, %c0_7] : memref<8x256xf32, #tpu.memory_space<vmem>>, vector<8x256xf32>
    tpu.vector_store %arg7[%c0_6, %c0_7], %7 {strides = array<i32>} : memref<8x256xf32, #tpu.memory_space<vmem>>, vector<8x256xf32>,
    %c0_i32_8 = arith.constant 0 : i32
    %9 = arith.cmpi eq, %arg2, %c0_i32_8 : i32
    %10 = arith.extui %9 : i1 to i32
    %c0_i32_9 = arith.constant 0 : i32
    %11 = arith.cmpi ne, %10, %c0_i32_9 : i32
    scf.if %11 {
      %c0_10 = arith.constant 0 : index
      %c0_11 = arith.constant 0 : index
      %12 = vector.load %arg7[%c0_10, %c0_11] : memref<8x256xf32, #tpu.memory_space<vmem>>, vector<8x256xf32>
      %c0_12 = arith.constant 0 : index
      %c0_13 = arith.constant 0 : index
      %13 = vector.load %arg5[%c0_12, %c0_13] : memref<1x256xf32, #tpu.memory_space<vmem>>, vector<1x256xf32>
      %14 = vector.broadcast %13 : vector<1x256xf32> to vector<8x256xf32>
      %15 = arith.addf %12, %14 : vector<8x256xf32>
      %c0_14 = arith.constant 0 : index
      %c0_15 = arith.constant 0 : index
      %16 = vector.load %arg6[%c0_14, %c0_15] : memref<8x256xf32, #tpu.memory_space<vmem>>, vector<8x256xf32>
      tpu.vector_store %arg6[%c0_14, %c0_15], %15 {strides = array<i32>} : memref<8x256xf32, #tpu.memory_space<vmem>>, vector<8x256xf32>,
    } else {
    }
    return
  }
  func.func @transform_0(%arg0: i32, %arg1: i32, %arg2: i32) -> (i32, i32) {
    %c0_i32 = arith.constant 0 : i32
    return %arg0, %arg2 : i32, i32
  }
  func.func @transform_1(%arg0: i32, %arg1: i32, %arg2: i32) -> (i32, i32) {
    %c0_i32 = arith.constant 0 : i32
    return %arg2, %arg1 : i32, i32
  }
  func.func @transform_2(%arg0: i32, %arg1: i32, %arg2: i32) -> (i32, i32) {
    %c0_i32 = arith.constant 0 : i32
    %c0_i32_0 = arith.constant 0 : i32
    return %c0_i32, %arg1 : i32, i32
  }
  func.func @transform_3(%arg0: i32, %arg1: i32, %arg2: i32) -> (i32, i32) {
    %c0_i32 = arith.constant 0 : i32
    return %arg0, %arg1 : i32, i32
  }
}

module attributes {stable_mosaic.version = 11 : i64} {
  func.func @_mm_kernel(%arg0: i32, %arg1: i32, %arg2: i32, %arg3: memref<8x128xbf16, #tpu.memory_space<vmem>>, %arg4: memref<128x128xbf16, #tpu.memory_space<vmem>>, %arg5: memref<1x128xf32, #tpu.memory_space<vmem>>, %arg6: memref<8x128xf32, #tpu.memory_space<vmem>>, %arg7: memref<8x128xf32, #tpu.memory_space<vmem>>) attributes {dimension_semantics = [#tpu.dimension_semantics<parallel>, #tpu.dimension_semantics<parallel>, #tpu.dimension_semantics<arbitrary>], iteration_bounds = array<i64: 1, 1, 1>, scalar_prefetch = 0 : i64, scratch_operands = 1 : i64, tpu.core_type = #tpu.core_type<tc>, window_params = [{transform_indices = @transform_0, window_bounds = array<i64: 8, 128>}, {transform_indices = @transform_1, window_bounds = array<i64: 128, 128>}, {transform_indices = @transform_2, window_bounds = array<i64: 1, 128>}, {transform_indices = @transform_3, window_bounds = array<i64: 8, 128>}]} {
    %c0_i32 = arith.constant 0 : i32
    %0 = arith.cmpi eq, %arg2, %c0_i32 : i32
    %1 = arith.extui %0 : i1 to i32
    %c0_i32_0 = arith.constant 0 : i32
    %2 = arith.cmpi ne, %1, %c0_i32_0 : i32
    scf.if %2 {
      %cst_10 = arith.constant 0.000000e+00 : f32
      %12 = vector.broadcast %cst_10 : f32 to vector<8x128xf32>
      %c0_11 = arith.constant 0 : index
      %c0_12 = arith.constant 0 : index
      %13 = vector.load %arg7[%c0_11, %c0_12] : memref<8x128xf32, #tpu.memory_space<vmem>>, vector<8x128xf32>
      tpu.vector_store %arg7[%c0_11, %c0_12], %12 {strides = array<i32>} : memref<8x128xf32, #tpu.memory_space<vmem>>, vector<8x128xf32>,
    } else {
    }
    %c0 = arith.constant 0 : index
    %c0_1 = arith.constant 0 : index
    %3 = vector.load %arg7[%c0, %c0_1] : memref<8x128xf32, #tpu.memory_space<vmem>>, vector<8x128xf32>
    %c0_2 = arith.constant 0 : index
    %c0_3 = arith.constant 0 : index
    %4 = vector.load %arg3[%c0_2, %c0_3] : memref<8x128xbf16, #tpu.memory_space<vmem>>, vector<8x128xbf16>
    %c0_4 = arith.constant 0 : index
    %c0_5 = arith.constant 0 : index
    %5 = vector.load %arg4[%c0_4, %c0_5] : memref<128x128xbf16, #tpu.memory_space<vmem>>, vector<128x128xbf16>
    %cst = arith.constant dense<0.000000e+00> : vector<8x128xf32>
    %6 = tpu.matmul %4, %5, %cst {dimension_numbers = #tpu.dot_dimension_numbers<[1], [0], [0], [1], [0, 0, 1, 1], [], []>} : vector<8x128xbf16>, vector<128x128xbf16>, vector<8x128xf32> -> vector<8x128xf32>
    %7 = arith.addf %3, %6 : vector<8x128xf32>
    %c0_6 = arith.constant 0 : index
    %c0_7 = arith.constant 0 : index
    %8 = vector.load %arg7[%c0_6, %c0_7] : memref<8x128xf32, #tpu.memory_space<vmem>>, vector<8x128xf32>
    tpu.vector_store %arg7[%c0_6, %c0_7], %7 {strides = array<i32>} : memref<8x128xf32, #tpu.memory_space<vmem>>, vector<8x128xf32>,
    %c0_i32_8 = arith.constant 0 : i32
    %9 = arith.cmpi eq, %arg2, %c0_i32_8 : i32
    %10 = arith.extui %9 : i1 to i32
    %c0_i32_9 = arith.constant 0 : i32
    %11 = arith.cmpi ne, %10, %c0_i32_9 : i32
    scf.if %11 {
      %c0_10 = arith.constant 0 : index
      %c0_11 = arith.constant 0 : index
      %12 = vector.load %arg7[%c0_10, %c0_11] : memref<8x128xf32, #tpu.memory_space<vmem>>, vector<8x128xf32>
      %c0_12 = arith.constant 0 : index
      %c0_13 = arith.constant 0 : index
      %13 = vector.load %arg5[%c0_12, %c0_13] : memref<1x128xf32, #tpu.memory_space<vmem>>, vector<1x128xf32>
      %14 = vector.broadcast %13 : vector<1x128xf32> to vector<8x128xf32>
      %15 = arith.addf %12, %14 : vector<8x128xf32>
      %cst_14 = arith.constant 5.000000e-01 : f32
      %16 = vector.broadcast %cst_14 : f32 to vector<8x128xf32>
      %17 = arith.mulf %16, %15 : vector<8x128xf32>
      %cst_15 = arith.constant 0.707106769 : f32
      %18 = vector.broadcast %cst_15 : f32 to vector<8x128xf32>
      %19 = arith.mulf %15, %18 : vector<8x128xf32>
      %cst_16 = arith.constant -4.000000e+00 : f32
      %cst_17 = arith.constant 4.000000e+00 : f32
      %20 = vector.broadcast %cst_16 : f32 to vector<8x128xf32>
      %21 = arith.maximumf %20, %19 : vector<8x128xf32>
      %22 = vector.broadcast %cst_17 : f32 to vector<8x128xf32>
      %23 = arith.minimumf %22, %21 : vector<8x128xf32>
      %24 = arith.mulf %23, %23 : vector<8x128xf32>
      %cst_18 = arith.constant -2.72614237E-10 : f32
      %25 = vector.broadcast %cst_18 : f32 to vector<8x128xf32>
      %26 = arith.mulf %25, %24 : vector<8x128xf32>
      %cst_19 = arith.constant 2.77068146E-8 : f32
      %27 = vector.broadcast %cst_19 : f32 to vector<8x128xf32>
      %28 = arith.addf %26, %27 : vector<8x128xf32>
      %29 = arith.mulf %28, %24 : vector<8x128xf32>
      %cst_20 = arith.constant -2.10102394E-6 : f32
      %30 = vector.broadcast %cst_20 : f32 to vector<8x128xf32>
      %31 = arith.addf %29, %30 : vector<8x128xf32>
      %32 = arith.mulf %31, %24 : vector<8x128xf32>
      %cst_21 = arith.constant -5.69250624E-5 : f32
      %33 = vector.broadcast %cst_21 : f32 to vector<8x128xf32>
      %34 = arith.addf %32, %33 : vector<8x128xf32>
      %35 = arith.mulf %34, %24 : vector<8x128xf32>
      %cst_22 = arith.constant -7.34990637E-4 : f32
      %36 = vector.broadcast %cst_22 : f32 to vector<8x128xf32>
      %37 = arith.addf %35, %36 : vector<8x128xf32>
      %38 = arith.mulf %37, %24 : vector<8x128xf32>
      %cst_23 = arith.constant -0.00295460015 : f32
      %39 = vector.broadcast %cst_23 : f32 to vector<8x128xf32>
      %40 = arith.addf %38, %39 : vector<8x128xf32>
      %41 = arith.mulf %40, %24 : vector<8x128xf32>
      %cst_24 = arith.constant -0.0160960332 : f32
      %42 = vector.broadcast %cst_24 : f32 to vector<8x128xf32>
      %43 = arith.addf %41, %42 : vector<8x128xf32>
      %44 = arith.mulf %43, %23 : vector<8x128xf32>
      %cst_25 = arith.constant -1.45660715E-5 : f32
      %45 = vector.broadcast %cst_25 : f32 to vector<8x128xf32>
      %46 = arith.mulf %45, %24 : vector<8x128xf32>
      %cst_26 = arith.constant -2.13374049E-4 : f32
      %47 = vector.broadcast %cst_26 : f32 to vector<8x128xf32>
      %48 = arith.addf %46, %47 : vector<8x128xf32>
      %49 = arith.mulf %48, %24 : vector<8x128xf32>
      %cst_27 = arith.constant -0.00168282702 : f32
      %50 = vector.broadcast %cst_27 : f32 to vector<8x128xf32>
      %51 = arith.addf %49, %50 : vector<8x128xf32>
      %52 = arith.mulf %51, %24 : vector<8x128xf32>
      %cst_28 = arith.constant -0.00737332925 : f32
      %53 = vector.broadcast %cst_28 : f32 to vector<8x128xf32>
      %54 = arith.addf %52, %53 : vector<8x128xf32>
      %55 = arith.mulf %54, %24 : vector<8x128xf32>
      %cst_29 = arith.constant -0.0142647391 : f32
      %56 = vector.broadcast %cst_29 : f32 to vector<8x128xf32>
      %57 = arith.addf %55, %56 : vector<8x128xf32>
      %58 = tpu.reciprocal %57 {approx = true} : vector<8x128xf32> -> vector<8x128xf32>
      %59 = arith.mulf %44, %58 : vector<8x128xf32>
      %cst_30 = arith.constant -1.000000e+00 : f32
      %cst_31 = arith.constant 1.000000e+00 : f32
      %60 = vector.broadcast %cst_30 : f32 to vector<8x128xf32>
      %61 = arith.maximumf %60, %59 : vector<8x128xf32>
      %62 = vector.broadcast %cst_31 : f32 to vector<8x128xf32>
      %63 = arith.minimumf %62, %61 : vector<8x128xf32>
      %cst_32 = arith.constant 1.000000e+00 : f32
      %64 = vector.broadcast %cst_32 : f32 to vector<8x128xf32>
      %65 = arith.addf %64, %63 : vector<8x128xf32>
      %66 = arith.mulf %17, %65 : vector<8x128xf32>
      %c0_33 = arith.constant 0 : index
      %c0_34 = arith.constant 0 : index
      %67 = vector.load %arg6[%c0_33, %c0_34] : memref<8x128xf32, #tpu.memory_space<vmem>>, vector<8x128xf32>
      tpu.vector_store %arg6[%c0_33, %c0_34], %66 {strides = array<i32>} : memref<8x128xf32, #tpu.memory_space<vmem>>, vector<8x128xf32>,
    } else {
    }
    return
  }
  func.func @transform_0(%arg0: i32, %arg1: i32, %arg2: i32) -> (i32, i32) {
    %c0_i32 = arith.constant 0 : i32
    return %arg0, %arg2 : i32, i32
  }
  func.func @transform_1(%arg0: i32, %arg1: i32, %arg2: i32) -> (i32, i32) {
    %c0_i32 = arith.constant 0 : i32
    return %arg2, %arg1 : i32, i32
  }
  func.func @transform_2(%arg0: i32, %arg1: i32, %arg2: i32) -> (i32, i32) {
    %c0_i32 = arith.constant 0 : i32
    %c0_i32_0 = arith.constant 0 : i32
    return %c0_i32, %arg1 : i32, i32
  }
  func.func @transform_3(%arg0: i32, %arg1: i32, %arg2: i32) -> (i32, i32) {
    %c0_i32 = arith.constant 0 : i32
    return %arg0, %arg1 : i32, i32
  }
}

</mosaic_0001>

<bundles_post_ra>
// kernel: deepspeech_forward.17
= control target key start
LH: loop header
LB: loop body
LE: loop exit
PB: predicated region body
PF: predicated region fallthrough
CT: control target
= control target key end

     0   :  { %s1697_s18 = smov 0   ;;  %s1699_s19 = smov 0   ;;  %s1908_s0 = inlined_call_operand.vmem [shape: bf16[3584,128], index: 0, kind: input, shape index: {}]   ;;  %s1909_s1 = inlined_call_operand.vmem [shape: bf16[128,128], index: 1, kind: input, shape index: {}]   ;;  %s1910_s2 = inlined_call_operand.vmem [shape: f32[1,128], index: 2, kind: input, shape index: {}]   ;;  %s1911_s3 = inlined_call_operand.vmem [shape: f32[1,128], index: 3, kind: input, shape index: {}]   ;;  %s1912_s4 = inlined_call_operand.vmem [shape: f32[1,128], index: 4, kind: input, shape index: {}]   ;;  %s1913_s5 = inlined_call_operand.vmem [shape: bf16[3584,128], index: 5, kind: output, shape index: {}]  }
   0x1   :  { %s1701_s20 = smov 0  }
   0x2 LB: > { %s34_s21 = sadd.s32 1, %s1661_s19  ;;  %p1314_p0 = scmp.ge.s32.totalorder %s1665_s20, 1  ;;  %s1665_s20 = sphi %s1701_s20, %s15_s20   ;;  %s1661_s19 = sphi %s1699_s19, %s1915_s19   ;;  %s1657_s18 = sphi %s1697_s18, %s1914_s18  }
   0x3   : > { %p36_p1 = scmp.ge.s32.totalorder %s34_s21, 14  ;;  %p254_p2 = scmp.lt.s32.totalorder %s1665_s20, 15 }
   0x5   : > { %s1917_s21 = smov (%p36_p1, %s34_s21), 0  ;;  %p255_p3 = pnand %p1314_p0, %p254_p2 }
   0x6   : > { %s1315_s24 = sshll.u32 (!%p255_p3), %s1657_s18, 5 }
   0x7   : > { %258 = sbr.rel (%p255_p3) target bundleno = 282 (0x11a), region = 40  ;;  %p306_p4 = scmp.lt.s32.totalorder (!%p255_p3), %s1315_s24, 447 }
   0xc   : > { %v1619_v0 = vld [vmem:[%s1909_s1 + $0x38] sm:$0xff]   ;;  %v1620_v1 = vld [vmem:[%s1909_s1 + $0x30] sm:$0xff]   ;;  %s1919_s24 = smov (!%p306_p4, %s1315_s24), 447  ;;  %v1621_v2 = vld [vmem:[%s1909_s1 + $0x28] sm:$0xff]  }
   0xd   : > { %1531 = vmatprep.subr.bf16.mxu0 %v1619_v0  ;;  %1579 = vmatprep.subr.bf16.mxu1 %v1619_v0  ;;  %s1316_s29 = sshll.u32 %s1919_s24, 2  ;;  %v1622_v3 = vld [vmem:[%s1909_s1 + $0x20] sm:$0xff]   ;;  %v1623_v6 = vld [vmem:[%s1909_s1 + $0x18] sm:$0xff]   ;;  %v1624_v7 = vld [vmem:[%s1909_s1 + $0x10] sm:$0xff]  }
   0xe   : > { %1532 = vmatpush3.bf16.msra.mxu0 %v1619_v0  ;;  %1587 = vmatpush3.bf16.msra.mxu1 %v1619_v0  ;;  %s1732_s7 = scalar_lea.vmem %s1908_s0, %s1316_s29  ;;  %v1625_v8 = vld [vmem:[%s1909_s1 + $0x8] sm:$0xff]   ;;  %v1626_v9 = vld [vmem:[%s1909_s1] sm:$0xff]   ;;  %s1815_s6 = scalar_lea.vmem %s1913_s5, %s1316_s29 }
   0xf   : > { %1533 = vmatprep.subr.bf16.mxu0 %v1620_v1  ;;  %1580 = vmatprep.subr.bf16.mxu1 %v1620_v1  ;;  %v1627_v4 = vld [vmem:[%s1732_s7] sm:$0xff]   ;;  %v1629_v10 = vld [vmem:[%s1732_s7 + $0x8] sm:$0xff]   ;;  %v1631_v12 = vld [vmem:[%s1732_s7 + $0x10] sm:$0xff]  }
  0x10   : > { %v1628_v5 = vld [vmem:[%s1732_s7 + $0x40] sm:$0xff]   ;;  %1547 = vmatprep.mubr.bf16.mxu0 %v1627_v4  ;;  %v1630_v11 = vld [vmem:[%s1732_s7 + $0x48] sm:$0xff]   ;;  %v1632_v13 = vld [vmem:[%s1732_s7 + $0x50] sm:$0xff]  }
  0x11   : > { %1563 = vmatprep.mubr.bf16.mxu1 %v1628_v5  ;;  %v1633_v14 = vld [vmem:[%s1732_s7 + $0x18] sm:$0xff]   ;;  %v1635_v16 = vld [vmem:[%s1732_s7 + $0x20] sm:$0xff]   ;;  %v1637_v18 = vld [vmem:[%s1732_s7 + $0x28] sm:$0xff]  }
  0x12   : > { %1534 = vmatpush3.bf16.msra.mxu0 %v1620_v1  ;;  %1588 = vmatpush3.bf16.msra.mxu1 %v1620_v1  ;;  %v1634_v15 = vld [vmem:[%s1732_s7 + $0x58] sm:$0xff]   ;;  %v1636_v17 = vld [vmem:[%s1732_s7 + $0x60] sm:$0xff]   ;;  %v1638_v19 = vld [vmem:[%s1732_s7 + $0x68] sm:$0xff]  }
  0x13   : > { %1535 = vmatprep.subr.bf16.mxu0 %v1621_v2  ;;  %1581 = vmatprep.subr.bf16.mxu1 %v1621_v2  ;;  %v1639_v20 = vld [vmem:[%s1732_s7 + $0x30] sm:$0xff]   ;;  %v1641_v22 = vld [vmem:[%s1732_s7 + $0x38] sm:$0xff]   ;;  %v1768_v24 = vld [vmem:[%s1910_s2] ss:$0 sm:$0xff] }
  0x14   : > { %v1640_v21 = vld [vmem:[%s1732_s7 + $0x70] sm:$0xff]   ;;  %v1642_v23 = vld [vmem:[%s1732_s7 + $0x78] sm:$0xff]   ;;  %v1773_v26 = vld [vmem:[%s1911_s3] ss:$0 sm:$0xff] }
  0x15   : > { %v1780_v30 = vld [vmem:[%s1912_s4] ss:$0 sm:$0xff] }
  0x16   : > { %1536 = vmatpush3.bf16.msra.mxu0 %v1621_v2  ;;  %1589 = vmatpush3.bf16.msra.mxu1 %v1621_v2 }
  0x17   : > { %1537 = vmatprep.subr.bf16.mxu0 %v1622_v3  ;;  %1582 = vmatprep.subr.bf16.mxu1 %v1622_v3 }
  0x1a   : > { %1538 = vmatpush3.bf16.msra.mxu0 %v1622_v3  ;;  %1590 = vmatpush3.bf16.msra.mxu1 %v1622_v3 }
  0x1b   : > { %1539 = vmatprep.subr.bf16.mxu0 %v1623_v6  ;;  %1583 = vmatprep.subr.bf16.mxu1 %v1623_v6 }
  0x1e   : > { %1540 = vmatpush3.bf16.msra.mxu0 %v1623_v6  ;;  %1591 = vmatpush3.bf16.msra.mxu1 %v1623_v6 }
  0x1f   : > { %1541 = vmatprep.subr.bf16.mxu0 %v1624_v7  ;;  %1584 = vmatprep.subr.bf16.mxu1 %v1624_v7 }
  0x22   : > { %1542 = vmatpush3.bf16.msra.mxu0 %v1624_v7  ;;  %1592 = vmatpush3.bf16.msra.mxu1 %v1624_v7 }
  0x23   : > { %1543 = vmatprep.subr.bf16.mxu0 %v1625_v8  ;;  %1585 = vmatprep.subr.bf16.mxu1 %v1625_v8 }
  0x26   : > { %1544 = vmatpush3.bf16.msra.mxu0 %v1625_v8  ;;  %1593 = vmatpush3.bf16.msra.mxu1 %v1625_v8 }
  0x27   : > { %1545 = vmatprep.subr.bf16.mxu0 %v1626_v9  ;;  %1586 = vmatprep.subr.bf16.mxu1 %v1626_v9 }
  0x2a   : > { %1546 = vmatpush3.bf16.msra.mxu0 %v1626_v9  ;;  %1594 = vmatpush3.bf16.msra.mxu1 %v1626_v9 }
  0x2d   : > { %1548 = vmatmul.mubr.bf16.vlgmr.msra.gmra.mxu0 %v1629_v10  ;;  %1564 = vmatmul.mubr.bf16.vlgmr.msra.gmra.mxu1 %v1630_v11 }
  0x2e   : > { %1551 = vmatprep.mubr.bf16.mxu0 %v1631_v12  ;;  %1567 = vmatprep.mubr.bf16.mxu1 %v1632_v13 }
  0x35   : > { %1552 = vmatmul.mubr.bf16.gmra.mxu0 %v1633_v14  ;;  %1568 = vmatmul.mubr.bf16.gmra.mxu1 %v1634_v15 }
  0x36   : > { %1555 = vmatprep.mubr.bf16.mxu0 %v1635_v16  ;;  %1571 = vmatprep.mubr.bf16.mxu1 %v1636_v17 }
  0x3d   : > { %1556 = vmatmul.mubr.bf16.gmra.mxu0 %v1637_v18  ;;  %1572 = vmatmul.mubr.bf16.gmra.mxu1 %v1638_v19 }
  0x3e   : > { %1559 = vmatprep.mubr.bf16.mxu0 %v1639_v20  ;;  %1575 = vmatprep.mubr.bf16.mxu1 %v1640_v21 }
  0x45   : > { %1560 = vmatmul.mubr.bf16.gmra.mxu0 %v1641_v22  ;;  %1576 = vmatmul.mubr.bf16.gmra.mxu1 %v1642_v23 }
  0xed   : > { %v1549_v25 = vpop.f32.mrf.mxu0  ;;  %v1565_v27 = vpop.f32.mrf.mxu1 }
  0xee   : > { %v871_v28 = vadd.f32 %v1549_v25, %v1768_v24  ;;  %v887_v29 = vadd.f32 %v1565_v27, %v1768_v24 }
  0xef   : > { %v636_v31 = vpop.f32.mrf.mxu0  ;;  %v700_v32 = vpop.f32.mrf.mxu1 }
  0xf0   : > { %v910_v33 = vmul.f32 %v1773_v26, %v871_v28  ;;  %v926_v34 = vmul.f32 %v1773_v26, %v887_v29  ;;  %v869_v35 = vadd.f32 %v1768_v24, %v636_v31  ;;  %v885_v36 = vadd.f32 %v1768_v24, %v700_v32 }
  0xf1   : > { %v1550_v37 = vpop.f32.mrf.mxu0  ;;  %v1566_v38 = vpop.f32.mrf.mxu1 }
  0xf2   : > { %v949_v39 = vadd.f32 %v1780_v30, %v910_v33  ;;  %v965_v40 = vadd.f32 %v1780_v30, %v926_v34  ;;  %v908_v41 = vmul.f32 %v1773_v26, %v869_v35  ;;  %v924_v42 = vmul.f32 %v1773_v26, %v885_v36 }
  0xf3   : > { %v872_v43 = vadd.f32 %v1550_v37, %v1768_v24  ;;  %v888_v44 = vadd.f32 %v1566_v38, %v1768_v24  ;;  %v639_v45 = vpop.f32.mrf.mxu0  ;;  %v703_v46 = vpop.f32.mrf.mxu1 }
  0xf4   : > { %v981_v47 = vmax.f32 %v949_v39, 0.0  ;;  %v997_v48 = vmax.f32 %v965_v40, 0.0  ;;  %v870_v51 = vadd.f32 %v1768_v24, %v639_v45  ;;  %v886_v52 = vadd.f32 %v1768_v24, %v703_v46 }
  0xf5   : > { %v911_v49 = vmul.f32 %v1773_v26, %v872_v43  ;;  %v927_v50 = vmul.f32 %v1773_v26, %v888_v44  ;;  %v1553_v53 = vpop.f32.mrf.mxu0  ;;  %v1569_v54 = vpop.f32.mrf.mxu1  ;;  %v947_v55 = vadd.f32 %v1780_v30, %v908_v41  ;;  %v963_v56 = vadd.f32 %v1780_v30, %v924_v42 }
  0xf6   : > { %v875_v57 = vadd.f32 %v1553_v53, %v1768_v24  ;;  %v891_v58 = vadd.f32 %v1569_v54, %v1768_v24  ;;  %v909_v61 = vmul.f32 %v1773_v26, %v870_v51  ;;  %v925_v62 = vmul.f32 %v1773_v26, %v886_v52 }
  0xf7   : > { %v950_v59 = vadd.f32 %v1780_v30, %v911_v49  ;;  %v966_v60 = vadd.f32 %v1780_v30, %v927_v50  ;;  %v652_v63 = vpop.f32.mrf.mxu0  ;;  %v716_v0 = vpop.f32.mrf.mxu1  ;;  %v979_v11 = vmax.f32 %v947_v55, 0.0  ;;  %v995_v12 = vmax.f32 %v963_v56, 0.0 }
  0xf8   : > { %v914_v1 = vmul.f32 %v1773_v26, %v875_v57  ;;  %v930_v2 = vmul.f32 %v1773_v26, %v891_v58  ;;  %v873_v3 = vadd.f32 %v1768_v24, %v652_v63  ;;  %v889_v4 = vadd.f32 %v1768_v24, %v716_v0 }
  0xf9   : > { %v982_v5 = vmax.f32 %v950_v59, 0.0  ;;  %v998_v6 = vmax.f32 %v966_v60, 0.0  ;;  %v948_v7 = vadd.f32 %v1780_v30, %v909_v61  ;;  %v964_v8 = vadd.f32 %v1780_v30, %v925_v62  ;;  %v1554_v9 = vpop.f32.mrf.mxu0  ;;  %v1570_v10 = vpop.f32.mrf.mxu1 }
  0xfa   : > { %v912_v13 = vmul.f32 %v1773_v26, %v873_v3  ;;  %v928_v14 = vmul.f32 %v1773_v26, %v889_v4  ;;  %v953_v21 = vadd.f32 %v1780_v30, %v914_v1  ;;  %v969_v22 = vadd.f32 %v1780_v30, %v930_v2 }
  0xfb   : > { %v1420_v15 = vpack.c.bf16 %v982_v5, %v981_v47  ;;  %v1460_v16 = vpack.c.bf16 %v998_v6, %v997_v48  ;;  %v980_v17 = vmax.f32 %v948_v7, 0.0  ;;  %v996_v18 = vmax.f32 %v964_v8, 0.0  ;;  %v655_v19 = vpop.f32.mrf.mxu0  ;;  %v719_v20 = vpop.f32.mrf.mxu1 }
  0xfc   : > { %v876_v27 = vadd.f32 %v1554_v9, %v1768_v24  ;;  %v892_v28 = vadd.f32 %v1570_v10, %v1768_v24  ;;  %v951_v32 = vadd.f32 %v1780_v30, %v912_v13  ;;  %v967_v33 = vadd.f32 %v1780_v30, %v928_v14 }
  0xfd   : > { %1492 = vst [vmem:[%s1815_s6 + $0x8] sm:$0xff] %v1420_v15   ;;  %1500 = vst [vmem:[%s1815_s6 + $0x48] sm:$0xff] %v1460_v16   ;;  %v1415_v23 = vpack.c.bf16 %v980_v17, %v979_v11  ;;  %v1455_v25 = vpack.c.bf16 %v996_v18, %v995_v12  ;;  %v1557_v29 = vpop.f32.mrf.mxu0  ;;  %v1573_v31 = vpop.f32.mrf.mxu1  ;;  %v874_v34 = vadd.f32 %v1768_v24, %v655_v19  ;;  %v985_v56 = vmax.f32 %v953_v21, 0.0 }
  0xfe   : > { %v890_v35 = vadd.f32 %v1768_v24, %v719_v20  ;;  %v915_v36 = vmul.f32 %v1773_v26, %v876_v27  ;;  %v931_v37 = vmul.f32 %v1773_v26, %v892_v28  ;;  %v879_v38 = vadd.f32 %v1557_v29, %v1768_v24 }
  0xff   : > { %1416 = vst [vmem:[%s1815_s6] sm:$0xff] %v1415_v23   ;;  %1499 = vst [vmem:[%s1815_s6 + $0x40] sm:$0xff] %v1455_v25   ;;  %v895_v39 = vadd.f32 %v1573_v31, %v1768_v24  ;;  %v668_v40 = vpop.f32.mrf.mxu0  ;;  %v732_v41 = vpop.f32.mrf.mxu1  ;;  %v913_v42 = vmul.f32 %v1773_v26, %v874_v34  ;;  %v1001_v57 = vmax.f32 %v969_v22, 0.0  ;;  %v983_v62 = vmax.f32 %v951_v32, 0.0 }
 0x100   : > { %v929_v43 = vmul.f32 %v1773_v26, %v890_v35  ;;  %v877_v44 = vadd.f32 %v1768_v24, %v668_v40  ;;  %v893_v45 = vadd.f32 %v1768_v24, %v732_v41  ;;  %v954_v46 = vadd.f32 %v1780_v30, %v915_v36 }
 0x101   : > { %v970_v47 = vadd.f32 %v1780_v30, %v931_v37  ;;  %v918_v48 = vmul.f32 %v1773_v26, %v879_v38  ;;  %v934_v49 = vmul.f32 %v1773_v26, %v895_v39  ;;  %v1558_v50 = vpop.f32.mrf.mxu0  ;;  %v1574_v51 = vpop.f32.mrf.mxu1  ;;  %v952_v52 = vadd.f32 %v1780_v30, %v913_v42 }
 0x102   : > { %v968_v53 = vadd.f32 %v1780_v30, %v929_v43  ;;  %v916_v54 = vmul.f32 %v1773_v26, %v877_v44  ;;  %v932_v55 = vmul.f32 %v1773_v26, %v893_v45  ;;  %v986_v58 = vmax.f32 %v954_v46, 0.0 }
 0x103   : > { %v1002_v59 = vmax.f32 %v970_v47, 0.0  ;;  %v671_v60 = vpop.f32.mrf.mxu0  ;;  %v735_v61 = vpop.f32.mrf.mxu1  ;;  %v999_v63 = vmax.f32 %v967_v33, 0.0  ;;  %v984_v0 = vmax.f32 %v952_v52, 0.0  ;;  %v957_v4 = vadd.f32 %v1780_v30, %v918_v48 }
 0x104   : > { %v1000_v1 = vmax.f32 %v968_v53, 0.0  ;;  %v1430_v2 = vpack.c.bf16 %v986_v58, %v985_v56  ;;  %v973_v5 = vadd.f32 %v1780_v30, %v934_v49  ;;  %v955_v10 = vadd.f32 %v1780_v30, %v916_v54 }
 0x105   : > { %v1470_v3 = vpack.c.bf16 %v1002_v59, %v1001_v57  ;;  %v1561_v6 = vpop.f32.mrf.mxu0  ;;  %v1577_v7 = vpop.f32.mrf.mxu1  ;;  %v1425_v8 = vpack.c.bf16 %v984_v0, %v983_v62  ;;  %v971_v11 = vadd.f32 %v1780_v30, %v932_v55  ;;  %v880_v12 = vadd.f32 %v1558_v50, %v1768_v24 }
 0x106   : > { %v1465_v9 = vpack.c.bf16 %v1000_v1, %v999_v63  ;;  %1494 = vst [vmem:[%s1815_s6 + $0x18] sm:$0xff] %v1430_v2   ;;  %v896_v13 = vadd.f32 %v1574_v51, %v1768_v24  ;;  %v878_v14 = vadd.f32 %v1768_v24, %v671_v60  ;;  %v894_v15 = vadd.f32 %v1768_v24, %v735_v61 }
 0x107   : > { %1502 = vst [vmem:[%s1815_s6 + $0x58] sm:$0xff] %v1470_v3   ;;  %v684_v16 = vpop.f32.mrf.mxu0  ;;  %v748_v17 = vpop.f32.mrf.mxu1  ;;  %1493 = vst [vmem:[%s1815_s6 + $0x10] sm:$0xff] %v1425_v8   ;;  %v883_v18 = vadd.f32 %v1561_v6, %v1768_v24  ;;  %v899_v19 = vadd.f32 %v1577_v7, %v1768_v24  ;;  %v919_v22 = vmul.f32 %v1773_v26, %v880_v12  ;;  %v989_v31 = vmax.f32 %v957_v4, 0.0 }
 0x108   : > { %1501 = vst [vmem:[%s1815_s6 + $0x50] sm:$0xff] %v1465_v9   ;;  %v881_v20 = vadd.f32 %v1768_v24, %v684_v16  ;;  %v897_v21 = vadd.f32 %v1768_v24, %v748_v17  ;;  %v935_v23 = vmul.f32 %v1773_v26, %v896_v13  ;;  %v917_v25 = vmul.f32 %v1773_v26, %v878_v14 }
 0x109   : > { %v933_v27 = vmul.f32 %v1773_v26, %v894_v15  ;;  %v1562_v28 = vpop.f32.mrf.mxu0  ;;  %v1578_v29 = vpop.f32.mrf.mxu1  ;;  %v1005_v32 = vmax.f32 %v973_v5, 0.0  ;;  %v987_v33 = vmax.f32 %v955_v10, 0.0  ;;  %v1003_v34 = vmax.f32 %v971_v11, 0.0 }
 0x10a   : > { %v958_v35 = vadd.f32 %v1780_v30, %v919_v22  ;;  %v974_v36 = vadd.f32 %v1780_v30, %v935_v23  ;;  %v956_v37 = vadd.f32 %v1780_v30, %v917_v25  ;;  %v922_v39 = vmul.f32 %v1773_v26, %v883_v18 }
 0x10b   : > { %v972_v38 = vadd.f32 %v1780_v30, %v933_v27  ;;  %v938_v40 = vmul.f32 %v1773_v26, %v899_v19  ;;  %v920_v41 = vmul.f32 %v1773_v26, %v881_v20  ;;  %v936_v42 = vmul.f32 %v1773_v26, %v897_v21  ;;  %v687_v47 = vpop.f32.mrf.mxu0  ;;  %v751_v48 = vpop.f32.mrf.mxu1 }
 0x10c   : > { %v990_v43 = vmax.f32 %v958_v35, 0.0  ;;  %v1006_v44 = vmax.f32 %v974_v36, 0.0  ;;  %v988_v45 = vmax.f32 %v956_v37, 0.0  ;;  %v884_v53 = vadd.f32 %v1562_v28, %v1768_v24 }
 0x10d   : > { %v1004_v46 = vmax.f32 %v972_v38, 0.0  ;;  %v900_v54 = vadd.f32 %v1578_v29, %v1768_v24  ;;  %v882_v55 = vadd.f32 %v1768_v24, %v687_v47  ;;  %v898_v56 = vadd.f32 %v1768_v24, %v751_v48 }
 0x10e   : > { %v1440_v49 = vpack.c.bf16 %v990_v43, %v989_v31  ;;  %v1480_v50 = vpack.c.bf16 %v1006_v44, %v1005_v32  ;;  %v1435_v51 = vpack.c.bf16 %v988_v45, %v987_v33  ;;  %v961_v57 = vadd.f32 %v1780_v30, %v922_v39 }
 0x10f   : > { %v1475_v52 = vpack.c.bf16 %v1004_v46, %v1003_v34  ;;  %v977_v58 = vadd.f32 %v1780_v30, %v938_v40  ;;  %v959_v59 = vadd.f32 %v1780_v30, %v920_v41  ;;  %v975_v60 = vadd.f32 %v1780_v30, %v936_v42 }
 0x110   : > { %1496 = vst [vmem:[%s1815_s6 + $0x28] sm:$0xff] %v1440_v49   ;;  %1504 = vst [vmem:[%s1815_s6 + $0x68] sm:$0xff] %v1480_v50   ;;  %v923_v61 = vmul.f32 %v1773_v26, %v884_v53  ;;  %v939_v62 = vmul.f32 %v1773_v26, %v900_v54  ;;  %v921_v63 = vmul.f32 %v1773_v26, %v882_v55  ;;  %v993_v4 = vmax.f32 %v961_v57, 0.0 }
 0x111   : > { %1495 = vst [vmem:[%s1815_s6 + $0x20] sm:$0xff] %v1435_v51   ;;  %1503 = vst [vmem:[%s1815_s6 + $0x60] sm:$0xff] %v1475_v52   ;;  %v937_v24 = vmul.f32 %v1773_v26, %v898_v56  ;;  %v1009_v5 = vmax.f32 %v977_v58, 0.0  ;;  %v991_v6 = vmax.f32 %v959_v59, 0.0  ;;  %v1007_v7 = vmax.f32 %v975_v60, 0.0 }
 0x112   : > { %v962_v0 = vadd.f32 %v1780_v30, %v923_v61  ;;  %v978_v1 = vadd.f32 %v1780_v30, %v939_v62  ;;  %v960_v2 = vadd.f32 %v1780_v30, %v921_v63 }
 0x113   : > { %v976_v3 = vadd.f32 %v1780_v30, %v937_v24 }
 0x114   : > { %v994_v8 = vmax.f32 %v962_v0, 0.0  ;;  %v1010_v9 = vmax.f32 %v978_v1, 0.0  ;;  %v992_v10 = vmax.f32 %v960_v2, 0.0 }
 0x115   : > { %v1008_v26 = vmax.f32 %v976_v3, 0.0 }
 0x116   : > { %v1450_v11 = vpack.c.bf16 %v994_v8, %v993_v4  ;;  %v1490_v12 = vpack.c.bf16 %v1010_v9, %v1009_v5  ;;  %v1445_v13 = vpack.c.bf16 %v992_v10, %v991_v6 }
 0x117   : > { %v1485_v14 = vpack.c.bf16 %v1008_v26, %v1007_v7 }
 0x118   : > { %1498 = vst [vmem:[%s1815_s6 + $0x38] sm:$0xff] %v1450_v11   ;;  %1506 = vst [vmem:[%s1815_s6 + $0x78] sm:$0xff] %v1490_v12  }
 0x119   : > { %1497 = vst [vmem:[%s1815_s6 + $0x30] sm:$0xff] %v1445_v13   ;;  %1505 = vst [vmem:[%s1815_s6 + $0x70] sm:$0xff] %v1485_v14  }
 0x11a PF: > { %s15_s20 = sadd.s32 1, %s1665_s20   ;;  %s1914_s18 = smov %s1661_s19 }
 0x11b   : > { %p12_p5 = scmp.ge.s32.totalorder %s15_s20, 16   ;;  %s1915_s19 = smov %s1917_s21 }
 0x11d   :  { %14 = sbr.rel (!%p12_p5) target bundleno = 2 (0x2), region = 90 }

// kernel: tile.24
= control target key start
LH: loop header
LB: loop body
LE: loop exit
PB: predicated region body
PF: predicated region fallthrough
CT: control target
= control target key end

     0   :  { %s109_s10 = smov 48   ;;  %s110_s11 = smov 40   ;;  %vm3_vm0 = vcmask 31744   ;;  %vm9_vm1 = vcmask 425344   ;;  %vm15_vm2 = vcmask 392544   ;;  %vm21_vm3 = vcmask 359744   ;;  %s173_s0 = inlined_call_operand.vmem [shape: f32[13,4], index: 0, kind: input, shape index: {}]   ;;  %s174_s1 = inlined_call_operand.vmem [shape: f32[1,52], index: 1, kind: output, shape index: {}]  }
   0x1   :  { %v85_v0 = vld [vmem:[%s173_s0 + $0xc] sm:$0x1]   ;;  %v87_v1 = vld [vmem:[%s173_s0 + $0xa] sm:$0x1]   ;;  %v86_v2 = vld [vmem:[%s173_s0 + $0xb] sm:$0x1]  }
   0x2   :  { %7 = vrot.lane.b32.xlu0 %v85_v0, %s109_s10  ;;  %19 = vrot.lane.b32.xlu1 %v87_v1, %s110_s11  ;;  %v88_v3 = vld [vmem:[%s173_s0 + $0x9] sm:$0x1]   ;;  %s111_s16 = smov 44   ;;  %s112_s17 = smov 36   ;;  %v89_v4 = vld [vmem:[%s173_s0 + $0x8] sm:$0x1]  }
   0x3   :  { %v90_v5 = vld [vmem:[%s173_s0 + $0x7] sm:$0x1]   ;;  %v2_v6 = vld [vmem:[%s173_s0] sm:$0x1]   ;;  %s113_s24 = smov 32   ;;  %s114_s25 = smov 28  }
   0x4   :  { %4 = vst.msk [vmem:[#allocation0] sm:$0x1] %vm3_vm0, %v2_v6   ;;  %v91_v7 = vld [vmem:[%s173_s0 + $0x6] sm:$0x1]   ;;  %v92_v8 = vld [vmem:[%s173_s0 + $0x5] sm:$0x1]  }
   0x5   :  { %s115_s30 = smov 24   ;;  %s116_s2 = smov 20   ;;  %v93_v9 = vld [vmem:[%s173_s0 + $0x4] sm:$0x1]   ;;  %v94_v10 = vld [vmem:[%s173_s0 + $0x3] sm:$0x1]  }
   0x6   :  { %13 = vrot.lane.b32.xlu0 %v86_v2, %s111_s16  ;;  %25 = vrot.lane.b32.xlu1 %v88_v3, %s112_s17  ;;  %s117_s7 = smov 16   ;;  %s118_s8 = smov 12   ;;  %v95_v11 = vld [vmem:[%s173_s0 + $0x2] sm:$0x1]   ;;  %v96_v12 = vld [vmem:[%s173_s0 + $0x1] sm:$0x1]  }
   0x7   :  { %s119_s0 = smov 8   ;;  %s120_s13 = smov 4   ;;  %vm27_vm4 = vcmask 326944   ;;  %vm33_vm5 = vcmask 294144   ;;  %vm39_vm6 = vcmask 261344   ;;  %vm45_vm7 = vcmask 228544  }
   0x8   :  { %vm51_vm8 = vcmask 195744   ;;  %vm57_vm9 = vcmask 162944   ;;  %vm63_vm10 = vcmask 130144   ;;  %vm69_vm11 = vcmask 97344  }
   0x9   :  { %vm75_vm12 = vcmask 64544  }
   0xa   :  { %31 = vrot.lane.b32.xlu0 %v89_v4, %s113_s24  ;;  %37 = vrot.lane.b32.xlu1 %v90_v5, %s114_s25 }
   0xe   :  { %43 = vrot.lane.b32.xlu0 %v91_v7, %s115_s30  ;;  %49 = vrot.lane.b32.xlu1 %v92_v8, %s116_s2 }
  0x12   :  { %55 = vrot.lane.b32.xlu0 %v93_v9, %s117_s7  ;;  %61 = vrot.lane.b32.xlu1 %v94_v10, %s118_s8 }
  0x16   :  { %67 = vrot.lane.b32.xlu0 %v95_v11, %s119_s0  ;;  %73 = vrot.lane.b32.xlu1 %v96_v12, %s120_s13 }
  0x74   :  { %v8_v13 = vpop.permute.xlu0 %7   ;;  %v20_v14 = vpop.permute.xlu1 %19  }
  0x75   :  { %10 = vst.msk [vmem:[#allocation0] sm:$0x1] %vm9_vm1, %v8_v13  }
  0x78   :  { %v14_v15 = vpop.permute.xlu0 %13   ;;  %v26_v16 = vpop.permute.xlu1 %25  }
  0x79   :  { %16 = vst.msk [vmem:[#allocation0] sm:$0x1] %vm15_vm2, %v14_v15  }
  0x7a   :  { %22 = vst.msk [vmem:[#allocation0] sm:$0x1] %vm21_vm3, %v20_v14  }
  0x7b   :  { %28 = vst.msk [vmem:[#allocation0] sm:$0x1] %vm27_vm4, %v26_v16  }
  0x7c   :  { %v32_v17 = vpop.permute.xlu0 %31   ;;  %v38_v18 = vpop.permute.xlu1 %37  }
  0x7d   :  { %34 = vst.msk [vmem:[#allocation0] sm:$0x1] %vm33_vm5, %v32_v17  }
  0x7e   :  { %40 = vst.msk [vmem:[#allocation0] sm:$0x1] %vm39_vm6, %v38_v18  }
  0x80   :  { %v44_v19 = vpop.permute.xlu0 %43   ;;  %v50_v20 = vpop.permute.xlu1 %49  }
  0x81   :  { %46 = vst.msk [vmem:[#allocation0] sm:$0x1] %vm45_vm7, %v44_v19  }
  0x82   :  { %52 = vst.msk [vmem:[#allocation0] sm:$0x1] %vm51_vm8, %v50_v20  }
  0x84   :  { %v56_v21 = vpop.permute.xlu0 %55   ;;  %v62_v22 = vpop.permute.xlu1 %61  }
  0x85   :  { %58 = vst.msk [vmem:[#allocation0] sm:$0x1] %vm57_vm9, %v56_v21  }
  0x86   :  { %64 = vst.msk [vmem:[#allocation0] sm:$0x1] %vm63_vm10, %v62_v22  }
  0x88   :  { %v68_v23 = vpop.permute.xlu0 %67   ;;  %v74_v24 = vpop.permute.xlu1 %73  }
  0x89   :  { %70 = vst.msk [vmem:[#allocation0] sm:$0x1] %vm69_vm11, %v68_v23  }
  0x8a   :  { %76 = vst.msk [vmem:[#allocation0] sm:$0x1] %vm75_vm12, %v74_v24  }
  0x91   :  { %v81_v25 = vld [vmem:[#allocation0] sm:$0x1] }
  0x92   :  { %84 = vst [vmem:[%s174_s1] sm:$0x1] %v81_v25 }

// kernel: tile.23
= control target key start
LH: loop header
LB: loop body
LE: loop exit
PB: predicated region body
PF: predicated region fallthrough
CT: control target
= control target key end

     0   :  { %s28_s0 = inlined_call_operand.vmem [shape: f32[4], index: 0, kind: input, shape index: {}]   ;;  %s29_s1 = inlined_call_operand.vmem [shape: f32[13,4], index: 1, kind: output, shape index: {}]  }
   0x1   :  { %v4_v0 = vld [vmem:[%s28_s0] ss:$0 sm:$0xff] }
   0x2   :  { %5 = vst [vmem:[%s29_s1] sm:$0xff] %v4_v0  ;;  %8 = vst [vmem:[%s29_s1 + $0x8] sm:$0xff] %v4_v0 }

// kernel: deepspeech_forward.18
= control target key start
LH: loop header
LB: loop body
LE: loop exit
PB: predicated region body
PF: predicated region fallthrough
CT: control target
= control target key end

     0   :  { %v498_v0 = vmov 0.0   ;;  %vm499_vm0 = vmmov 0   ;;  %s675_s1 = inlined_call_operand.vmem [shape: bf16[128,128], index: 1, kind: input, shape index: {}]   ;;  %s676_s0 = inlined_call_operand.vmem [shape: bf16[104,128], index: 0, kind: input, shape index: {}]   ;;  %s677_s2 = inlined_call_operand.vmem [shape: f32[1,128], index: 2, kind: input, shape index: {}]   ;;  %s678_s3 = inlined_call_operand.vmem [shape: f32[1,128], index: 3, kind: input, shape index: {}]   ;;  %s679_s4 = inlined_call_operand.vmem [shape: f32[1,128], index: 4, kind: input, shape index: {}]   ;;  %s680_s5 = inlined_call_operand.vmem [shape: f32[104,128], index: 5, kind: output, shape index: {}]  }
   0x1   :  { %421 = vmatprep.subr.bf16.mxu0 %v498_v0  ;;  %v483_v1 = vld [vmem:[%s675_s1 + $0x38] sm:$0xff]   ;;  %465 = vmatprep.subr.bf16.mxu1 %v498_v0  ;;  %v484_v2 = vld [vmem:[%s675_s1 + $0x30] sm:$0xff]   ;;  %v485_v3 = vld [vmem:[%s675_s1 + $0x28] sm:$0xff]  }
   0x2   :  { %437 = vmatprep.mubr.msk.bf16.mxu0 %vm499_vm0, %v498_v0  ;;  %453 = vmatprep.mubr.msk.bf16.mxu1 %vm499_vm0, %v498_v0  ;;  %v486_v4 = vld [vmem:[%s675_s1 + $0x20] sm:$0xff]   ;;  %v487_v5 = vld [vmem:[%s675_s1 + $0x18] sm:$0xff]   ;;  %v488_v6 = vld [vmem:[%s675_s1 + $0x10] sm:$0xff]  }
   0x3   :  { %422 = vmatpush3.bf16.msra.mxu0 %v483_v1  ;;  %473 = vmatpush3.bf16.msra.mxu1 %v483_v1  ;;  %v489_v7 = vld [vmem:[%s675_s1 + $0x8] sm:$0xff]   ;;  %v490_v8 = vld [vmem:[%s675_s1] sm:$0xff]   ;;  %v495_v13 = vld [vmem:[%s676_s0 + $0x10] sm:$0xff]  }
   0x4   :  { %423 = vmatprep.subr.bf16.mxu0 %v498_v0  ;;  %466 = vmatprep.subr.bf16.mxu1 %v498_v0  ;;  %v491_v9 = vld [vmem:[%s676_s0] sm:$0xff]   ;;  %v493_v11 = vld [vmem:[%s676_s0 + $0x8] sm:$0xff]   ;;  %v496_v14 = vld [vmem:[%s676_s0 + $0x30] ss:$0 sps:$4 sm:$0xff]  }
   0x5   :  { %v492_v10 = vld [vmem:[%s676_s0 + $0x20] sm:$0xff]   ;;  %v494_v12 = vld [vmem:[%s676_s0 + $0x28] sm:$0xff]   ;;  %v497_v15 = vld [vmem:[%s676_s0 + $0x18] sm:$0xff]  }
   0x6   :  { %v585_v16 = vld [vmem:[%s677_s2] ss:$0 sm:$0xff] }
   0x7   :  { %424 = vmatpush3.bf16.msra.mxu0 %v484_v2  ;;  %474 = vmatpush3.bf16.msra.mxu1 %v484_v2  ;;  %v590_v18 = vld [vmem:[%s678_s3] ss:$0 sm:$0xff] }
   0x8   :  { %425 = vmatprep.subr.bf16.mxu0 %v498_v0  ;;  %467 = vmatprep.subr.bf16.mxu1 %v498_v0  ;;  %v597_v22 = vld [vmem:[%s679_s4] ss:$0 sm:$0xff] }
   0xb   :  { %426 = vmatpush3.bf16.msra.mxu0 %v485_v3  ;;  %475 = vmatpush3.bf16.msra.mxu1 %v485_v3 }
   0xc   :  { %427 = vmatprep.subr.bf16.mxu0 %v498_v0  ;;  %468 = vmatprep.subr.bf16.mxu1 %v498_v0 }
   0xf   :  { %428 = vmatpush3.bf16.msra.mxu0 %v486_v4  ;;  %476 = vmatpush3.bf16.msra.mxu1 %v486_v4 }
  0x10   :  { %429 = vmatprep.subr.bf16.mxu0 %v498_v0  ;;  %469 = vmatprep.subr.bf16.mxu1 %v498_v0 }
  0x13   :  { %430 = vmatpush3.bf16.msra.mxu0 %v487_v5  ;;  %477 = vmatpush3.bf16.msra.mxu1 %v487_v5 }
  0x14   :  { %431 = vmatprep.subr.bf16.mxu0 %v498_v0  ;;  %470 = vmatprep.subr.bf16.mxu1 %v498_v0 }
  0x17   :  { %432 = vmatpush3.bf16.msra.mxu0 %v488_v6  ;;  %478 = vmatpush3.bf16.msra.mxu1 %v488_v6 }
  0x18   :  { %433 = vmatprep.subr.bf16.mxu0 %v498_v0  ;;  %471 = vmatprep.subr.bf16.mxu1 %v498_v0 }
  0x1b   :  { %434 = vmatpush3.bf16.msra.mxu0 %v489_v7  ;;  %479 = vmatpush3.bf16.msra.mxu1 %v489_v7 }
  0x1c   :  { %435 = vmatprep.subr.bf16.mxu0 %v498_v0  ;;  %472 = vmatprep.subr.bf16.mxu1 %v498_v0 }
  0x1f   :  { %436 = vmatpush3.bf16.msra.mxu0 %v490_v8  ;;  %480 = vmatpush3.bf16.msra.mxu1 %v490_v8 }
  0x22   :  { %438 = vmatmul.mubr.bf16.vlgmr.msra.gmra.mxu0 %v491_v9  ;;  %454 = vmatmul.mubr.bf16.vlgmr.msra.gmra.mxu1 %v492_v10 }
  0x23   :  { %441 = vmatprep.mubr.msk.bf16.mxu0 %vm499_vm0, %v498_v0  ;;  %457 = vmatprep.mubr.msk.bf16.mxu1 %vm499_vm0, %v498_v0 }
  0x2a   :  { %442 = vmatmul.mubr.bf16.gmra.mxu0 %v493_v11  ;;  %458 = vmatmul.mubr.bf16.gmra.mxu1 %v494_v12 }
  0x2b   :  { %445 = vmatprep.mubr.msk.bf16.mxu0 %vm499_vm0, %v498_v0  ;;  %461 = vmatprep.mubr.msk.bf16.mxu1 %vm499_vm0, %v498_v0 }
  0x32   :  { %446 = vmatmul.mubr.bf16.gmra.mxu0 %v495_v13  ;;  %462 = vmatmul.mubr.bf16.gmra.mxu1 %v496_v14 }
  0x33   :  { %449 = vmatprep.mubr.msk.bf16.mxu0 %vm499_vm0, %v498_v0 }
  0x3a   :  { %450 = vmatmul.mubr.bf16.gmra.mxu0 %v497_v15 }
  0xe2   :  { %v202_v17 = vpop.f32.mrf.mxu0  ;;  %v234_v19 = vpop.f32.mrf.mxu1 }
  0xe3   :  { %v305_v20 = vadd.f32 %v585_v16, %v202_v17  ;;  %v313_v21 = vadd.f32 %v585_v16, %v234_v19 }
  0xe4   :  { %v439_v23 = vpop.f32.mrf.mxu0  ;;  %v455_v24 = vpop.f32.mrf.mxu1 }
  0xe5   :  { %v325_v25 = vmul.f32 %v590_v18, %v305_v20  ;;  %v333_v26 = vmul.f32 %v590_v18, %v313_v21 }
  0xe6   :  { %v205_v27 = vpop.f32.mrf.mxu0  ;;  %v237_v28 = vpop.f32.mrf.mxu1 }
  0xe7   :  { %v345_v29 = vadd.f32 %v597_v22, %v325_v25  ;;  %v306_v30 = vadd.f32 %v585_v16, %v205_v27  ;;  %v353_v31 = vadd.f32 %v597_v22, %v333_v26  ;;  %v314_v32 = vadd.f32 %v585_v16, %v237_v28 }
  0xe8   :  { %v440_v33 = vpop.f32.mrf.mxu0  ;;  %v456_v34 = vpop.f32.mrf.mxu1 }
  0xe9   :  { %v358_v35 = vmax.f32 %v345_v29, 0.0  ;;  %v326_v36 = vmul.f32 %v590_v18, %v306_v30  ;;  %v366_v37 = vmax.f32 %v353_v31, 0.0  ;;  %v334_v38 = vmul.f32 %v590_v18, %v314_v32 }
  0xea   :  { %v210_v39 = vpop.f32.mrf.mxu0  ;;  %v242_v40 = vpop.f32.mrf.mxu1 }
  0xeb   :  { %371 = vst [vmem:[%s680_s5] sm:$0xff] %v358_v35  ;;  %v346_v41 = vadd.f32 %v597_v22, %v326_v36  ;;  %379 = vst [vmem:[%s680_s5 + $0x40] sm:$0xff] %v366_v37  ;;  %v307_v42 = vadd.f32 %v585_v16, %v210_v39  ;;  %v354_v43 = vadd.f32 %v597_v22, %v334_v38 }
  0xec   :  { %v315_v44 = vadd.f32 %v585_v16, %v242_v40  ;;  %v443_v45 = vpop.f32.mrf.mxu0  ;;  %v459_v46 = vpop.f32.mrf.mxu1 }
  0xed   :  { %v359_v47 = vmax.f32 %v346_v41, 0.0  ;;  %v327_v48 = vmul.f32 %v590_v18, %v307_v42  ;;  %v367_v49 = vmax.f32 %v354_v43, 0.0 }
  0xee   :  { %v335_v50 = vmul.f32 %v590_v18, %v315_v44  ;;  %v213_v51 = vpop.f32.mrf.mxu0  ;;  %v245_v52 = vpop.f32.mrf.mxu1 }
  0xef   :  { %372 = vst [vmem:[%s680_s5 + $0x8] sm:$0xff] %v359_v47  ;;  %v347_v53 = vadd.f32 %v597_v22, %v327_v48  ;;  %380 = vst [vmem:[%s680_s5 + $0x48] sm:$0xff] %v367_v49  ;;  %v308_v54 = vadd.f32 %v585_v16, %v213_v51  ;;  %v316_v56 = vadd.f32 %v585_v16, %v245_v52 }
  0xf0   :  { %v355_v55 = vadd.f32 %v597_v22, %v335_v50  ;;  %v444_v57 = vpop.f32.mrf.mxu0  ;;  %v460_v58 = vpop.f32.mrf.mxu1 }
  0xf1   :  { %v360_v59 = vmax.f32 %v347_v53, 0.0  ;;  %v328_v60 = vmul.f32 %v590_v18, %v308_v54  ;;  %v336_v62 = vmul.f32 %v590_v18, %v316_v56 }
  0xf2   :  { %v368_v61 = vmax.f32 %v355_v55, 0.0  ;;  %v218_v63 = vpop.f32.mrf.mxu0  ;;  %v250_v0 = vpop.f32.mrf.mxu1 }
  0xf3   :  { %373 = vst [vmem:[%s680_s5 + $0x10] sm:$0xff] %v360_v59  ;;  %v348_v1 = vadd.f32 %v597_v22, %v328_v60  ;;  %v309_v2 = vadd.f32 %v585_v16, %v218_v63  ;;  %v356_v3 = vadd.f32 %v597_v22, %v336_v62  ;;  %v317_v4 = vadd.f32 %v585_v16, %v250_v0 }
  0xf4   :  { %381 = vst [vmem:[%s680_s5 + $0x50] sm:$0xff] %v368_v61  ;;  %v447_v5 = vpop.f32.mrf.mxu0  ;;  %v463_v6 = vpop.f32.mrf.mxu1 }
  0xf5   :  { %v361_v7 = vmax.f32 %v348_v1, 0.0  ;;  %v329_v8 = vmul.f32 %v590_v18, %v309_v2  ;;  %v369_v9 = vmax.f32 %v356_v3, 0.0  ;;  %v337_v10 = vmul.f32 %v590_v18, %v317_v4 }
  0xf6   :  { %v221_v11 = vpop.f32.mrf.mxu0  ;;  %v253_v12 = vpop.f32.mrf.mxu1 }
  0xf7   :  { %374 = vst [vmem:[%s680_s5 + $0x18] sm:$0xff] %v361_v7  ;;  %v349_v13 = vadd.f32 %v597_v22, %v329_v8  ;;  %382 = vst [vmem:[%s680_s5 + $0x58] sm:$0xff] %v369_v9  ;;  %v310_v14 = vadd.f32 %v585_v16, %v221_v11  ;;  %v357_v15 = vadd.f32 %v597_v22, %v337_v10 }
  0xf8   :  { %v448_v17 = vpop.f32.mrf.mxu0  ;;  %v464_v19 = vpop.f32.mrf.mxu1 }
  0xf9   :  { %v362_v20 = vmax.f32 %v349_v13, 0.0  ;;  %v330_v21 = vmul.f32 %v590_v18, %v310_v14  ;;  %v370_v23 = vmax.f32 %v357_v15, 0.0 }
  0xfa   :  { %v226_v24 = vpop.f32.mrf.mxu0 }
  0xfb   :  { %375 = vst [vmem:[%s680_s5 + $0x20] sm:$0xff] %v362_v20  ;;  %v350_v25 = vadd.f32 %v597_v22, %v330_v21  ;;  %383 = vst [vmem:[%s680_s5 + $0x60] sm:$0xff] %v370_v23  ;;  %v311_v26 = vadd.f32 %v585_v16, %v226_v24 }
  0xfc   :  { %v451_v27 = vpop.f32.mrf.mxu0 }
  0xfd   :  { %v363_v28 = vmax.f32 %v350_v25, 0.0  ;;  %v331_v29 = vmul.f32 %v590_v18, %v311_v26 }
  0xfe   :  { %v229_v30 = vpop.f32.mrf.mxu0 }
  0xff   :  { %376 = vst [vmem:[%s680_s5 + $0x28] sm:$0xff] %v363_v28  ;;  %v351_v31 = vadd.f32 %v597_v22, %v331_v29  ;;  %v312_v32 = vadd.f32 %v585_v16, %v229_v30 }
 0x100   :  { %v452_v33 = vpop.f32.mrf.mxu0 }
 0x101   :  { %v364_v34 = vmax.f32 %v351_v31, 0.0  ;;  %v332_v35 = vmul.f32 %v590_v18, %v312_v32 }
 0x103   :  { %377 = vst [vmem:[%s680_s5 + $0x30] sm:$0xff] %v364_v34  ;;  %v352_v36 = vadd.f32 %v597_v22, %v332_v35 }
 0x105   :  { %v365_v37 = vmax.f32 %v352_v36, 0.0 }
 0x107   :  { %378 = vst [vmem:[%s680_s5 + $0x38] sm:$0xff] %v365_v37 }

// kernel: deepspeech_forward.19
= control target key start
LH: loop header
LB: loop body
LE: loop exit
PB: predicated region body
PF: predicated region fallthrough
CT: control target
= control target key end

     0   :  { %vm64_vm0 = vcmask 420864   ;;  %s108_s0 = inlined_call_operand.vmem [shape: f32[8,52], index: 0, kind: input, shape index: {}]   ;;  %s109_s1 = inlined_call_operand.vmem [shape: f32[1,52], index: 1, kind: input, shape index: {}]   ;;  %s110_s2 = inlined_call_operand.vmem [shape: f32[1,52], index: 2, kind: input, shape index: {}]   ;;  %s111_s3 = inlined_call_operand.vmem [shape: bf16[8,52], index: 3, kind: output, shape index: {}]  }
   0x1   :  { %v14_v0 = vld [vmem:[%s108_s0] sm:$0xff] }
   0x2   :  { %v70_v1 = vld [vmem:[%s109_s1] ss:$0 sm:$0xff] }
   0x3   :  { %v71_v2 = vld [vmem:[%s110_s2] ss:$0 sm:$0xff]  ;;  %v22_v3 = vmul.f32 %v70_v1, %v14_v0 }
   0x5   :  { %v30_v4 = vadd.f32 %v71_v2, %v22_v3 }
   0x7   :  { %v32_v5 = vmul.f32 0.70710677, %v30_v4  ;;  %v31_v31 = vmul.f32 0.5, %v30_v4 }
   0x9   :  { %v72_v6 = vclamps-f32 %v32_v5, 4.0 }
   0xb   :  { %v35_v7 = vmul.f32 %v72_v6, %v72_v6 }
   0xd   :  { %v36_v8 = vmul.f32 -2.7261424e-10, %v35_v7  ;;  %v49_v9 = vmul.f32 -1.45660715e-05, %v35_v7 }
   0xf   :  { %v37_v10 = vadd.f32 2.7706815e-08, %v36_v8  ;;  %v50_v11 = vadd.f32 -0.00021337405, %v49_v9 }
  0x11   :  { %v38_v12 = vmul.f32 %v37_v10, %v35_v7  ;;  %v51_v13 = vmul.f32 %v50_v11, %v35_v7 }
  0x13   :  { %v39_v14 = vadd.f32 -2.101024e-06, %v38_v12  ;;  %v52_v15 = vadd.f32 -0.001682827, %v51_v13 }
  0x15   :  { %v40_v16 = vmul.f32 %v39_v14, %v35_v7  ;;  %v53_v17 = vmul.f32 %v52_v15, %v35_v7 }
  0x17   :  { %v41_v18 = vadd.f32 -5.6925062e-05, %v40_v16  ;;  %v54_v19 = vadd.f32 -0.0073733293, %v53_v17 }
  0x19   :  { %v42_v20 = vmul.f32 %v41_v18, %v35_v7  ;;  %v55_v21 = vmul.f32 %v54_v19, %v35_v7 }
  0x1b   :  { %v43_v22 = vadd.f32 -0.00073499064, %v42_v20  ;;  %v56_v23 = vadd.f32 -0.014264739, %v55_v21 }
  0x1d   :  { %v44_v24 = vmul.f32 %v43_v22, %v35_v7  ;;  %74 = vrcp.f32 %v56_v23 }
  0x1f   :  { %v45_v25 = vadd.f32 -0.0029546001, %v44_v24 }
  0x21   :  { %v46_v26 = vmul.f32 %v45_v25, %v35_v7 }
  0x23   :  { %v47_v27 = vadd.f32 -0.016096033, %v46_v26 }
  0x25   :  { %v48_v28 = vmul.f32 %v72_v6, %v47_v27 }
  0x2a   :  { %v75_v29 = vpop.eup %74 }
  0x2b   :  { %v58_v30 = vmul.f32 %v75_v29, %v48_v28 }
  0x2d   :  { %v73_v32 = vclamps-f32 %v58_v30, 1.0 }
  0x2f   :  { %v61_v33 = vadd.f32 1.0, %v73_v32 }
  0x31   :  { %v62_v34 = vmul.f32 %v61_v33, %v31_v31 }
  0x33   :  { %v63_v35 = vpack.c.bf16 %v62_v34, %v62_v34 }
  0x35   :  { %65 = vst.msk [vmem:[%s111_s3] sm:$0xf] %vm64_vm0, %v63_v35 }

// kernel: deepspeech_forward.20
= control target key start
LH: loop header
LB: loop body
LE: loop exit
PB: predicated region body
PF: predicated region fallthrough
CT: control target
= control target key end

     0   :  { %v1067_v0 = vmov 0.0   ;;  %vm1068_vm0 = vmmov 0   ;;  %s1525_s1 = inlined_call_operand.vmem [shape: bf16[128,128], index: 1, kind: input, shape index: {}]   ;;  %s1526_s0 = inlined_call_operand.vmem [shape: bf16[104,128], index: 0, kind: input, shape index: {}]   ;;  %s1527_s2 = inlined_call_operand.vmem [shape: f32[1,128], index: 2, kind: input, shape index: {}]   ;;  %s1528_s3 = inlined_call_operand.vmem [shape: f32[1,128], index: 3, kind: input, shape index: {}]   ;;  %s1529_s4 = inlined_call_operand.vmem [shape: f32[1,128], index: 4, kind: input, shape index: {}]   ;;  %s1530_s5 = inlined_call_operand.vmem [shape: bf16[104,128], index: 5, kind: output, shape index: {}]  }
   0x1   :  { %964 = vmatprep.subr.bf16.mxu0 %v1067_v0  ;;  %1008 = vmatprep.subr.bf16.mxu1 %v1067_v0  ;;  %v1026_v1 = vld [vmem:[%s1525_s1 + $0x38] sm:$0xff]   ;;  %v1027_v2 = vld [vmem:[%s1525_s1 + $0x30] sm:$0xff]   ;;  %v1028_v3 = vld [vmem:[%s1525_s1 + $0x28] sm:$0xff]  }
   0x2   :  { %980 = vmatprep.mubr.msk.bf16.mxu0 %vm1068_vm0, %v1067_v0  ;;  %996 = vmatprep.mubr.msk.bf16.mxu1 %vm1068_vm0, %v1067_v0  ;;  %v1029_v4 = vld [vmem:[%s1525_s1 + $0x20] sm:$0xff]   ;;  %v1030_v5 = vld [vmem:[%s1525_s1 + $0x18] sm:$0xff]   ;;  %v1031_v6 = vld [vmem:[%s1525_s1 + $0x10] sm:$0xff]  }
   0x3   :  { %965 = vmatpush3.bf16.msra.mxu0 %v1026_v1  ;;  %1016 = vmatpush3.bf16.msra.mxu1 %v1026_v1  ;;  %v1032_v7 = vld [vmem:[%s1525_s1 + $0x8] sm:$0xff]   ;;  %v1033_v8 = vld [vmem:[%s1525_s1] sm:$0xff]   ;;  %v1038_v13 = vld [vmem:[%s1526_s0 + $0x10] sm:$0xff]  }
   0x4   :  { %966 = vmatprep.subr.bf16.mxu0 %v1067_v0  ;;  %1009 = vmatprep.subr.bf16.mxu1 %v1067_v0  ;;  %v1034_v9 = vld [vmem:[%s1526_s0] sm:$0xff]   ;;  %v1036_v11 = vld [vmem:[%s1526_s0 + $0x8] sm:$0xff]   ;;  %v1039_v14 = vld [vmem:[%s1526_s0 + $0x30] ss:$0 sps:$4 sm:$0xff]  }
   0x5   :  { %v1035_v10 = vld [vmem:[%s1526_s0 + $0x20] sm:$0xff]   ;;  %v1037_v12 = vld [vmem:[%s1526_s0 + $0x28] sm:$0xff]   ;;  %v1040_v15 = vld [vmem:[%s1526_s0 + $0x18] sm:$0xff]  }
   0x6   :  { %v1154_v16 = vld [vmem:[%s1527_s2] ss:$0 sm:$0xff] }
   0x7   :  { %967 = vmatpush3.bf16.msra.mxu0 %v1027_v2  ;;  %1017 = vmatpush3.bf16.msra.mxu1 %v1027_v2  ;;  %v1159_v18 = vld [vmem:[%s1528_s3] ss:$0 sm:$0xff] }
   0x8   :  { %968 = vmatprep.subr.bf16.mxu0 %v1067_v0  ;;  %1010 = vmatprep.subr.bf16.mxu1 %v1067_v0  ;;  %v1166_v22 = vld [vmem:[%s1529_s4] ss:$0 sm:$0xff] }
   0xb   :  { %969 = vmatpush3.bf16.msra.mxu0 %v1028_v3  ;;  %1018 = vmatpush3.bf16.msra.mxu1 %v1028_v3 }
   0xc   :  { %970 = vmatprep.subr.bf16.mxu0 %v1067_v0  ;;  %1011 = vmatprep.subr.bf16.mxu1 %v1067_v0 }
   0xf   :  { %971 = vmatpush3.bf16.msra.mxu0 %v1029_v4  ;;  %1019 = vmatpush3.bf16.msra.mxu1 %v1029_v4 }
  0x10   :  { %972 = vmatprep.subr.bf16.mxu0 %v1067_v0  ;;  %1012 = vmatprep.subr.bf16.mxu1 %v1067_v0 }
  0x13   :  { %973 = vmatpush3.bf16.msra.mxu0 %v1030_v5  ;;  %1020 = vmatpush3.bf16.msra.mxu1 %v1030_v5 }
  0x14   :  { %974 = vmatprep.subr.bf16.mxu0 %v1067_v0  ;;  %1013 = vmatprep.subr.bf16.mxu1 %v1067_v0 }
  0x17   :  { %975 = vmatpush3.bf16.msra.mxu0 %v1031_v6  ;;  %1021 = vmatpush3.bf16.msra.mxu1 %v1031_v6 }
  0x18   :  { %976 = vmatprep.subr.bf16.mxu0 %v1067_v0  ;;  %1014 = vmatprep.subr.bf16.mxu1 %v1067_v0 }
  0x1b   :  { %977 = vmatpush3.bf16.msra.mxu0 %v1032_v7  ;;  %1022 = vmatpush3.bf16.msra.mxu1 %v1032_v7 }
  0x1c   :  { %978 = vmatprep.subr.bf16.mxu0 %v1067_v0  ;;  %1015 = vmatprep.subr.bf16.mxu1 %v1067_v0 }
  0x1f   :  { %979 = vmatpush3.bf16.msra.mxu0 %v1033_v8  ;;  %1023 = vmatpush3.bf16.msra.mxu1 %v1033_v8 }
  0x22   :  { %981 = vmatmul.mubr.bf16.vlgmr.msra.gmra.mxu0 %v1034_v9  ;;  %997 = vmatmul.mubr.bf16.vlgmr.msra.gmra.mxu1 %v1035_v10 }
  0x23   :  { %984 = vmatprep.mubr.msk.bf16.mxu0 %vm1068_vm0, %v1067_v0  ;;  %1000 = vmatprep.mubr.msk.bf16.mxu1 %vm1068_vm0, %v1067_v0 }
  0x2a   :  { %985 = vmatmul.mubr.bf16.gmra.mxu0 %v1036_v11  ;;  %1001 = vmatmul.mubr.bf16.gmra.mxu1 %v1037_v12 }
  0x2b   :  { %988 = vmatprep.mubr.msk.bf16.mxu0 %vm1068_vm0, %v1067_v0  ;;  %1004 = vmatprep.mubr.msk.bf16.mxu1 %vm1068_vm0, %v1067_v0 }
  0x32   :  { %989 = vmatmul.mubr.bf16.gmra.mxu0 %v1038_v13  ;;  %1005 = vmatmul.mubr.bf16.gmra.mxu1 %v1039_v14 }
  0x33   :  { %992 = vmatprep.mubr.msk.bf16.mxu0 %vm1068_vm0, %v1067_v0 }
  0x3a   :  { %993 = vmatmul.mubr.bf16.gmra.mxu0 %v1040_v15 }
  0xe2   :  { %v202_v17 = vpop.f32.mrf.mxu0  ;;  %v234_v19 = vpop.f32.mrf.mxu1 }
  0xe3   :  { %v305_v20 = vadd.f32 %v1154_v16, %v202_v17  ;;  %v313_v21 = vadd.f32 %v1154_v16, %v234_v19 }
  0xe4   :  { %v982_v23 = vpop.f32.mrf.mxu0  ;;  %v998_v24 = vpop.f32.mrf.mxu1 }
  0xe5   :  { %v325_v25 = vmul.f32 %v1159_v18, %v305_v20  ;;  %v333_v26 = vmul.f32 %v1159_v18, %v313_v21 }
  0xe6   :  { %v205_v27 = vpop.f32.mrf.mxu0  ;;  %v237_v28 = vpop.f32.mrf.mxu1 }
  0xe7   :  { %v345_v29 = vadd.f32 %v1166_v22, %v325_v25  ;;  %v1172_v30 = vadd.f32 %v1166_v22, %v333_v26  ;;  %v306_v31 = vadd.f32 %v1154_v16, %v205_v27  ;;  %v314_v32 = vadd.f32 %v1154_v16, %v237_v28 }
  0xe8   :  { %v983_v33 = vpop.f32.mrf.mxu0  ;;  %v999_v34 = vpop.f32.mrf.mxu1 }
  0xe9   :  { %v371_v35 = vmul.f32 0.70710677, %v345_v29  ;;  %v379_v36 = vmul.f32 0.70710677, %v1172_v30  ;;  %v326_v37 = vmul.f32 %v1159_v18, %v306_v31  ;;  %v334_v38 = vmul.f32 %v1159_v18, %v314_v32 }
  0xea   :  { %v210_v39 = vpop.f32.mrf.mxu0  ;;  %v242_v40 = vpop.f32.mrf.mxu1  ;;  %v1216_v5 = vmul.f32 0.5, %v345_v29 }
  0xeb   :  { %v1179_v41 = vclamps-f32 %v371_v35, 4.0  ;;  %v1181_v42 = vclamps-f32 %v379_v36, 4.0  ;;  %v307_v43 = vadd.f32 %v1154_v16, %v210_v39  ;;  %v1185_v44 = vadd.f32 %v1166_v22, %v326_v37 }
  0xec   :  { %v1188_v45 = vadd.f32 %v1166_v22, %v334_v38  ;;  %v986_v46 = vpop.f32.mrf.mxu0  ;;  %v1002_v47 = vpop.f32.mrf.mxu1  ;;  %v315_v51 = vadd.f32 %v1154_v16, %v242_v40 }
  0xed   :  { %v1192_v48 = vmul.f32 %v1179_v41, %v1179_v41  ;;  %v1196_v49 = vmul.f32 %v1181_v42, %v1181_v42  ;;  %v327_v50 = vmul.f32 %v1159_v18, %v307_v43  ;;  %v372_v52 = vmul.f32 0.70710677, %v1185_v44 }
  0xee   :  { %v380_v53 = vmul.f32 0.70710677, %v1188_v45  ;;  %v213_v54 = vpop.f32.mrf.mxu0  ;;  %v1202_v55 = vpop.f32.mrf.mxu1  ;;  %v335_v4 = vmul.f32 %v1159_v18, %v315_v51 }
  0xef   :  { %v423_v56 = vmul.f32 -2.7261424e-10, %v1192_v48  ;;  %v592_v57 = vmul.f32 -1.45660715e-05, %v1192_v48  ;;  %v431_v58 = vmul.f32 -2.7261424e-10, %v1196_v49  ;;  %v1208_v59 = vadd.f32 %v1166_v22, %v327_v50 }
  0xf0   :  { %v600_v60 = vmul.f32 -1.45660715e-05, %v1196_v49  ;;  %v1211_v61 = vclamps-f32 %v372_v52, 4.0  ;;  %v1213_v62 = vclamps-f32 %v380_v53, 4.0  ;;  %v987_v63 = vpop.f32.mrf.mxu0  ;;  %v1003_v0 = vpop.f32.mrf.mxu1  ;;  %v1241_v27 = vadd.f32 %v1166_v22, %v335_v4 }
  0xf1   :  { %v436_v1 = vadd.f32 2.7706815e-08, %v423_v56  ;;  %v605_v2 = vadd.f32 -0.00021337405, %v592_v57  ;;  %v444_v3 = vadd.f32 2.7706815e-08, %v431_v58  ;;  %v308_v32 = vadd.f32 %v1154_v16, %v213_v54 }
  0xf2   :  { %v613_v6 = vadd.f32 -0.00021337405, %v600_v60  ;;  %v1220_v7 = vmul.f32 %v1211_v61, %v1211_v61  ;;  %v1224_v8 = vmul.f32 %v1213_v62, %v1213_v62  ;;  %v1226_v9 = vpop.f32.mrf.mxu0  ;;  %v1228_v10 = vpop.f32.mrf.mxu1  ;;  %v1234_v14 = vmul.f32 0.70710677, %v1208_v59 }
  0xf3   :  { %v449_v11 = vmul.f32 %v436_v1, %v1192_v48  ;;  %v618_v12 = vmul.f32 %v605_v2, %v1192_v48  ;;  %v457_v13 = vmul.f32 %v444_v3, %v1196_v49  ;;  %v328_v60 = vmul.f32 %v1159_v18, %v308_v32 }
  0xf4   :  { %v626_v15 = vmul.f32 %v613_v6, %v1196_v49  ;;  %v424_v17 = vmul.f32 -2.7261424e-10, %v1220_v7  ;;  %v593_v19 = vmul.f32 -1.45660715e-05, %v1220_v7  ;;  %v432_v20 = vmul.f32 -2.7261424e-10, %v1224_v8  ;;  %v990_v21 = vpop.f32.mrf.mxu0  ;;  %v1006_v23 = vpop.f32.mrf.mxu1 }
  0xf5   :  { %v462_v24 = vadd.f32 -2.101024e-06, %v449_v11  ;;  %v631_v25 = vadd.f32 -0.001682827, %v618_v12  ;;  %v470_v26 = vadd.f32 -2.101024e-06, %v457_v13 }
  0xf6   :  { %v639_v28 = vadd.f32 -0.001682827, %v626_v15  ;;  %v437_v29 = vadd.f32 2.7706815e-08, %v424_v17  ;;  %v606_v31 = vadd.f32 -0.00021337405, %v593_v19  ;;  %v1244_v33 = vpop.f32.mrf.mxu0  ;;  %v253_v34 = vpop.f32.mrf.mxu1 }
  0xf7   :  { %v475_v35 = vmul.f32 %v462_v24, %v1192_v48  ;;  %v644_v36 = vmul.f32 %v631_v25, %v1192_v48  ;;  %v483_v37 = vmul.f32 %v470_v26, %v1196_v49  ;;  %v445_v38 = vadd.f32 2.7706815e-08, %v432_v20 }
  0xf8   :  { %v652_v39 = vmul.f32 %v639_v28, %v1196_v49  ;;  %v450_v40 = vmul.f32 %v437_v29, %v1220_v7  ;;  %v619_v43 = vmul.f32 %v606_v31, %v1220_v7  ;;  %v601_v46 = vmul.f32 -1.45660715e-05, %v1224_v8  ;;  %v991_v47 = vpop.f32.mrf.mxu0  ;;  %v1007_v50 = vpop.f32.mrf.mxu1 }
  0xf9   :  { %v488_v51 = vadd.f32 -5.6925062e-05, %v475_v35  ;;  %v657_v52 = vadd.f32 -0.0073733293, %v644_v36  ;;  %v496_v53 = vadd.f32 -5.6925062e-05, %v483_v37  ;;  %v458_v54 = vmul.f32 %v445_v38, %v1224_v8 }
  0xfa   :  { %v665_v56 = vadd.f32 -0.0073733293, %v652_v39  ;;  %v463_v57 = vadd.f32 -2.101024e-06, %v450_v40  ;;  %v632_v58 = vadd.f32 -0.001682827, %v619_v43  ;;  %v1255_v63 = vpop.f32.mrf.mxu0 }
  0xfb   :  { %v501_v0 = vmul.f32 %v488_v51, %v1192_v48  ;;  %v670_v1 = vmul.f32 %v657_v52, %v1192_v48  ;;  %v509_v2 = vmul.f32 %v496_v53, %v1196_v49  ;;  %v471_v3 = vadd.f32 -2.101024e-06, %v458_v54 }
  0xfc   :  { %v678_v4 = vmul.f32 %v665_v56, %v1196_v49  ;;  %v476_v6 = vmul.f32 %v463_v57, %v1220_v7  ;;  %v645_v11 = vmul.f32 %v632_v58, %v1220_v7  ;;  %v614_v12 = vadd.f32 -0.00021337405, %v601_v46  ;;  %v994_v13 = vpop.f32.mrf.mxu0 }
  0xfd   :  { %v514_v15 = vadd.f32 -0.00073499064, %v501_v0  ;;  %v683_v17 = vadd.f32 -0.014264739, %v670_v1  ;;  %v522_v19 = vadd.f32 -0.00073499064, %v509_v2  ;;  %v484_v20 = vmul.f32 %v471_v3, %v1224_v8 }
  0xfe   :  { %v691_v21 = vadd.f32 -0.014264739, %v678_v4  ;;  %v489_v23 = vadd.f32 -5.6925062e-05, %v476_v6  ;;  %v658_v24 = vadd.f32 -0.0073733293, %v645_v11  ;;  %v627_v25 = vmul.f32 %v614_v12, %v1224_v8  ;;  %v1265_v26 = vpop.f32.mrf.mxu0 }
  0xff   :  { %v527_v28 = vmul.f32 %v514_v15, %v1192_v48  ;;  %1041 = vrcp.f32 %v683_v17  ;;  %v535_v29 = vmul.f32 %v522_v19, %v1196_v49  ;;  %v497_v31 = vadd.f32 -5.6925062e-05, %v484_v20 }
 0x100   :  { %1043 = vrcp.f32 %v691_v21  ;;  %v502_v32 = vmul.f32 %v489_v23, %v1220_v7  ;;  %v671_v34 = vmul.f32 %v658_v24, %v1220_v7  ;;  %v640_v35 = vadd.f32 -0.001682827, %v627_v25  ;;  %v995_v36 = vpop.f32.mrf.mxu0 }
 0x101   :  { %v540_v37 = vadd.f32 -0.0029546001, %v527_v28  ;;  %v548_v38 = vadd.f32 -0.0029546001, %v535_v29  ;;  %v510_v39 = vmul.f32 %v497_v31, %v1224_v8  ;;  %v1273_v40 = vclamps-f32 %v1234_v14, 4.0 }
 0x102   :  { %v1276_v43 = vmul.f32 0.5, %v1185_v44  ;;  %v515_v46 = vadd.f32 -0.00073499064, %v502_v32  ;;  %v684_v47 = vadd.f32 -0.014264739, %v671_v34  ;;  %v653_v50 = vmul.f32 %v640_v35, %v1224_v8 }
 0x103   :  { %v553_v51 = vmul.f32 %v540_v37, %v1192_v48  ;;  %v561_v52 = vmul.f32 %v548_v38, %v1196_v49  ;;  %v523_v53 = vadd.f32 -0.00073499064, %v510_v39  ;;  %v1283_v54 = vmul.f32 %v1273_v40, %v1273_v40 }
 0x104   :  { %v528_v56 = vmul.f32 %v515_v46, %v1220_v7  ;;  %1045 = vrcp.f32 %v684_v47  ;;  %v666_v14 = vadd.f32 -0.0073733293, %v653_v50  ;;  %v381_v44 = vmul.f32 0.70710677, %v1241_v27 }
 0x105   :  { %v566_v57 = vadd.f32 -0.016096033, %v553_v51  ;;  %v536_v58 = vmul.f32 %v523_v53, %v1224_v8  ;;  %v425_v0 = vmul.f32 -2.7261424e-10, %v1283_v54  ;;  %v1290_v48 = vadd.f32 %v1166_v22, %v328_v60 }
 0x106   :  { %v541_v49 = vadd.f32 -0.0029546001, %v528_v56  ;;  %v679_v1 = vmul.f32 %v666_v14, %v1224_v8  ;;  %v594_v2 = vmul.f32 -1.45660715e-05, %v1283_v54  ;;  %v1294_v3 = vclamps-f32 %v381_v44, 4.0 }
 0x107   :  { %v574_v4 = vadd.f32 -0.016096033, %v561_v52  ;;  %v549_v6 = vadd.f32 -0.0029546001, %v536_v58  ;;  %v438_v11 = vadd.f32 2.7706815e-08, %v425_v0  ;;  %v316_v21 = vadd.f32 %v1154_v16, %v1202_v55 }
 0x108   :  { %v554_v12 = vmul.f32 %v541_v49, %v1220_v7  ;;  %v692_v13 = vadd.f32 -0.014264739, %v679_v1  ;;  %v607_v15 = vadd.f32 -0.00021337405, %v594_v2  ;;  %v1299_v17 = vmul.f32 %v1294_v3, %v1294_v3 }
 0x109   :  { %v562_v60 = vmul.f32 %v549_v6, %v1224_v8  ;;  %v451_v19 = vmul.f32 %v438_v11, %v1283_v54  ;;  %v374_v20 = vmul.f32 0.70710677, %v1290_v48  ;;  %v579_v25 = vmul.f32 %v1179_v41, %v566_v57 }
 0x10a   :  { %v567_v23 = vadd.f32 -0.016096033, %v554_v12  ;;  %1047 = vrcp.f32 %v692_v13  ;;  %v620_v24 = vmul.f32 %v607_v15, %v1283_v54  ;;  %v433_v7 = vmul.f32 -2.7261424e-10, %v1299_v17 }
 0x10b   :  { %v575_v28 = vadd.f32 -0.016096033, %v562_v60  ;;  %v464_v29 = vadd.f32 -2.101024e-06, %v451_v19  ;;  %v602_v31 = vmul.f32 -1.45660715e-05, %v1299_v17  ;;  %v587_v32 = vmul.f32 %v1181_v42, %v574_v4 }
 0x10c   :  { %v1042_v8 = vpop.eup %1041  ;;  %v633_v34 = vadd.f32 -0.001682827, %v620_v24  ;;  %v446_v35 = vadd.f32 2.7706815e-08, %v433_v7  ;;  %v1311_v36 = vclamps-f32 %v374_v20, 4.0  ;;  %v336_v46 = vmul.f32 %v1159_v18, %v316_v21 }
 0x10d   :  { %v1044_v55 = vpop.eup %1043  ;;  %v709_v37 = vmul.f32 %v1042_v8, %v579_v25  ;;  %v477_v38 = vmul.f32 %v464_v29, %v1283_v54  ;;  %v615_v39 = vadd.f32 -0.00021337405, %v602_v31  ;;  %v580_v52 = vmul.f32 %v1211_v61, %v567_v23 }
 0x10e   :  { %v717_v47 = vmul.f32 %v1044_v55, %v587_v32  ;;  %v646_v41 = vmul.f32 %v633_v34, %v1283_v54  ;;  %v459_v50 = vmul.f32 %v446_v35, %v1299_v17  ;;  %v1319_v51 = vmul.f32 %v1311_v36, %v1311_v36 }
 0x10f   :  { %v875_v42 = vclamps-f32 %v709_v37, 1.0  ;;  %v490_v53 = vadd.f32 -5.6925062e-05, %v477_v38  ;;  %v628_v56 = vmul.f32 %v615_v39, %v1299_v17  ;;  %v588_v44 = vmul.f32 %v1213_v62, %v575_v28 }
 0x110   :  { %v883_v14 = vclamps-f32 %v717_v47, 1.0  ;;  %v659_v57 = vadd.f32 -0.0073733293, %v646_v41  ;;  %v472_v58 = vadd.f32 -2.101024e-06, %v459_v50  ;;  %v1327_v4 = vadd.f32 %v1166_v22, %v336_v46 }
 0x111   :  { %v1046_v0 = vpop.eup %1045  ;;  %v503_v49 = vmul.f32 %v490_v53, %v1283_v54  ;;  %v641_v1 = vadd.f32 -0.001682827, %v628_v56  ;;  %v426_v2 = vmul.f32 -2.7261424e-10, %v1319_v51  ;;  %v748_v6 = vadd.f32 1.0, %v875_v42 }
 0x112   :  { %v710_v11 = vmul.f32 %v1046_v0, %v580_v52  ;;  %v672_v61 = vmul.f32 %v659_v57, %v1283_v54  ;;  %v485_v12 = vmul.f32 %v472_v58, %v1299_v17  ;;  %v309_v60 = vadd.f32 %v1154_v16, %v1226_v9 }
 0x113   :  { %v516_v13 = vadd.f32 -0.00073499064, %v503_v49  ;;  %v654_v62 = vmul.f32 %v641_v1, %v1299_v17  ;;  %v439_v15 = vadd.f32 2.7706815e-08, %v426_v2  ;;  %v756_v19 = vadd.f32 1.0, %v883_v14 }
 0x114   :  { %v876_v20 = vclamps-f32 %v710_v11, 1.0  ;;  %v685_v21 = vadd.f32 -0.014264739, %v672_v61  ;;  %v498_v23 = vadd.f32 -5.6925062e-05, %v485_v12  ;;  %v761_v29 = vmul.f32 %v748_v6, %v1216_v5 }
 0x115   :  { %v529_v24 = vmul.f32 %v516_v13, %v1283_v54  ;;  %v667_v7 = vadd.f32 -0.0073733293, %v654_v62  ;;  %v452_v25 = vmul.f32 %v439_v15, %v1319_v51  ;;  %v595_v28 = vmul.f32 -1.45660715e-05, %v1319_v51 }
 0x116   :  { %v749_v31 = vadd.f32 1.0, %v876_v20  ;;  %1049 = vrcp.f32 %v685_v21  ;;  %v511_v8 = vmul.f32 %v498_v23, %v1299_v17  ;;  %v382_v46 = vmul.f32 0.70710677, %v1327_v4 }
 0x117   :  { %v1048_v32 = vpop.eup %1047  ;;  %v542_v34 = vadd.f32 -0.0029546001, %v529_v24  ;;  %v680_v9 = vmul.f32 %v667_v7, %v1299_v17  ;;  %v465_v35 = vadd.f32 -2.101024e-06, %v452_v25  ;;  %v608_v55 = vadd.f32 -0.00021337405, %v595_v28 }
 0x118   :  { %v762_v37 = vmul.f32 %v749_v31, %v1276_v43  ;;  %v718_v38 = vmul.f32 %v1048_v32, %v588_v44  ;;  %v524_v39 = vadd.f32 -0.00073499064, %v511_v8  ;;  %v366_v47 = vmul.f32 0.5, %v1172_v30 }
 0x119   :  { %v693_v41 = vadd.f32 -0.014264739, %v680_v9  ;;  %v478_v5 = vmul.f32 %v465_v35, %v1319_v51  ;;  %v621_v50 = vmul.f32 %v608_v55, %v1319_v51  ;;  %v1346_v56 = vclamps-f32 %v382_v46, 4.0 }
 0x11a   :  { %v917_v42 = vpack.c.bf16 %v762_v37, %v761_v29  ;;  %v884_v52 = vclamps-f32 %v718_v38, 1.0  ;;  %v537_v53 = vmul.f32 %v524_v39, %v1299_v17  ;;  %v769_v14 = vmul.f32 %v756_v19, %v366_v47 }
 0x11b   :  { %v367_v43 = vmul.f32 0.5, %v1188_v45  ;;  %v491_v44 = vadd.f32 -5.6925062e-05, %v478_v5  ;;  %v634_v57 = vadd.f32 -0.001682827, %v621_v50  ;;  %v555_v58 = vmul.f32 %v542_v34, %v1283_v54 }
 0x11c   :  { %918 = vst [vmem:[%s1530_s5] sm:$0xff] %v917_v42   ;;  %v757_v30 = vadd.f32 1.0, %v884_v52  ;;  %v1355_v0 = vmul.f32 %v1346_v56, %v1346_v56  ;;  %v329_v49 = vmul.f32 %v1159_v18, %v309_v60  ;;  %1051 = vrcp.f32 %v693_v41 }
 0x11d   :  { %v504_v1 = vmul.f32 %v491_v44, %v1319_v51  ;;  %v647_v45 = vmul.f32 %v634_v57, %v1319_v51  ;;  %v317_v2 = vadd.f32 %v1154_v16, %v1228_v10  ;;  %v550_v11 = vadd.f32 -0.0029546001, %v537_v53 }
 0x11e   :  { %v770_v6 = vmul.f32 %v757_v30, %v367_v43  ;;  %v434_v61 = vmul.f32 -2.7261424e-10, %v1355_v0  ;;  %v603_v54 = vmul.f32 -1.45660715e-05, %v1355_v0  ;;  %v1365_v62 = vadd.f32 %v1166_v22, %v329_v49 }
 0x11f   :  { %v517_v12 = vadd.f32 -0.00073499064, %v504_v1  ;;  %v660_v13 = vadd.f32 -0.0073733293, %v647_v45  ;;  %v337_v15 = vmul.f32 %v1159_v18, %v317_v2  ;;  %v568_v19 = vadd.f32 -0.016096033, %v555_v58 }
 0x120   :  { %v937_v60 = vpack.c.bf16 %v770_v6, %v769_v14  ;;  %v447_v20 = vadd.f32 2.7706815e-08, %v434_v61  ;;  %v616_v21 = vadd.f32 -0.00021337405, %v603_v54  ;;  %v375_v24 = vmul.f32 0.70710677, %v1365_v62 }
 0x121   :  { %v530_v23 = vmul.f32 %v517_v12, %v1319_v51  ;;  %v673_v10 = vmul.f32 %v660_v13, %v1319_v51  ;;  %v563_v7 = vmul.f32 %v550_v11, %v1299_v17  ;;  %v1378_v29 = vadd.f32 %v1166_v22, %v337_v15 }
 0x122   :  { %947 = vst [vmem:[%s1530_s5 + $0x20] sm:$0xff] %v937_v60   ;;  %v460_v25 = vmul.f32 %v447_v20, %v1355_v0  ;;  %v629_v28 = vmul.f32 %v616_v21, %v1355_v0  ;;  %v1380_v32 = vclamps-f32 %v375_v24, 4.0  ;;  %v310_v34 = vadd.f32 %v1154_v16, %v1244_v33 }
 0x123   :  { %v1050_v31 = vpop.eup %1049  ;;  %v686_v8 = vadd.f32 -0.014264739, %v673_v10  ;;  %v581_v9 = vmul.f32 %v1273_v40, %v568_v19  ;;  %v543_v37 = vadd.f32 -0.0029546001, %v530_v23  ;;  %v383_v38 = vmul.f32 0.70710677, %v1378_v29 }
 0x124   :  { %v473_v35 = vadd.f32 -2.101024e-06, %v460_v25  ;;  %v642_v55 = vadd.f32 -0.001682827, %v629_v28  ;;  %v1387_v17 = vmul.f32 %v1380_v32, %v1380_v32  ;;  %v576_v39 = vadd.f32 -0.016096033, %v563_v7 }
 0x125   :  { %1053 = vrcp.f32 %v686_v8  ;;  %v711_v41 = vmul.f32 %v1050_v31, %v581_v9  ;;  %v330_v5 = vmul.f32 %v1159_v18, %v310_v34  ;;  %v1395_v52 = vclamps-f32 %v383_v38, 4.0 }
 0x126   :  { %v486_v46 = vmul.f32 %v473_v35, %v1355_v0  ;;  %v655_v47 = vmul.f32 %v642_v55, %v1355_v0  ;;  %v427_v33 = vmul.f32 -2.7261424e-10, %v1387_v17  ;;  %v596_v40 = vmul.f32 -1.45660715e-05, %v1387_v17 }
 0x127   :  { %v311_v53 = vadd.f32 %v1154_v16, %v1255_v63  ;;  %v360_v14 = vmul.f32 0.5, %v1208_v59  ;;  %v556_v43 = vmul.f32 %v543_v37, %v1319_v51  ;;  %v589_v58 = vmul.f32 %v1294_v3, %v576_v39 }
 0x128   :  { %v499_v50 = vadd.f32 -5.6925062e-05, %v486_v46  ;;  %v668_v42 = vadd.f32 -0.0073733293, %v655_v47  ;;  %v440_v44 = vadd.f32 2.7706815e-08, %v427_v33  ;;  %v1406_v45 = vmul.f32 %v1395_v52, %v1395_v52 }
 0x129   :  { %v609_v57 = vadd.f32 -0.00021337405, %v596_v40  ;;  %v1052_v30 = vpop.eup %1051  ;;  %v877_v2 = vclamps-f32 %v711_v41, 1.0  ;;  %v1411_v51 = vadd.f32 %v1166_v22, %v330_v5  ;;  %v331_v61 = vmul.f32 %v1159_v18, %v311_v53 }
 0x12a   :  { %v512_v49 = vmul.f32 %v499_v50, %v1355_v0  ;;  %v681_v1 = vmul.f32 %v668_v42, %v1355_v0  ;;  %v453_v63 = vmul.f32 %v440_v44, %v1387_v17  ;;  %v435_v3 = vmul.f32 -2.7261424e-10, %v1406_v45 }
 0x12b   :  { %v622_v59 = vmul.f32 %v609_v57, %v1387_v17  ;;  %v719_v54 = vmul.f32 %v1052_v30, %v589_v58  ;;  %v569_v12 = vadd.f32 -0.016096033, %v556_v43  ;;  %v604_v20 = vmul.f32 -1.45660715e-05, %v1406_v45 }
 0x12c   :  { %v525_v6 = vadd.f32 -0.00073499064, %v512_v49  ;;  %v694_v11 = vadd.f32 -0.014264739, %v681_v1  ;;  %v466_v13 = vadd.f32 -2.101024e-06, %v453_v63  ;;  %v1425_v31 = vadd.f32 %v1166_v22, %v331_v61 }
 0x12d   :  { %v635_v15 = vadd.f32 -0.001682827, %v622_v59  ;;  %v448_v19 = vadd.f32 2.7706815e-08, %v435_v3  ;;  %v1418_v21 = vmul.f32 0.5, %v1241_v27  ;;  %v750_v8 = vadd.f32 1.0, %v877_v2 }
 0x12e   :  { %v538_v60 = vmul.f32 %v525_v6, %v1355_v0  ;;  %1055 = vrcp.f32 %v694_v11  ;;  %v479_v23 = vmul.f32 %v466_v13, %v1387_v17  ;;  %v376_v24 = vmul.f32 0.70710677, %v1411_v51 }
 0x12f   :  { %v648_v10 = vmul.f32 %v635_v15, %v1387_v17  ;;  %v461_v25 = vmul.f32 %v448_v19, %v1406_v45  ;;  %v617_v28 = vadd.f32 -0.00021337405, %v604_v20  ;;  %v582_v34 = vmul.f32 %v1311_v36, %v569_v12 }
 0x130   :  { %v551_v7 = vadd.f32 -0.0029546001, %v538_v60  ;;  %v492_v9 = vadd.f32 -5.6925062e-05, %v479_v23  ;;  %v1428_v35 = vclamps-f32 %v376_v24, 4.0  ;;  %v885_v55 = vclamps-f32 %v719_v54, 1.0 }
 0x131   :  { %v474_v38 = vadd.f32 -2.101024e-06, %v461_v25  ;;  %v630_v39 = vmul.f32 %v617_v28, %v1406_v45  ;;  %v661_v47 = vadd.f32 -0.0073733293, %v648_v10  ;;  %v312_v33 = vadd.f32 %v1154_v16, %v1265_v26 }
 0x132   :  { %v1054_v27 = vpop.eup %1053  ;;  %v564_v37 = vmul.f32 %v551_v7, %v1355_v0  ;;  %v1434_v41 = vmul.f32 %v1428_v35, %v1428_v35  ;;  %v361_v36 = vmul.f32 0.5, %v1290_v48  ;;  %v377_v50 = vmul.f32 0.70710677, %v1425_v31 }
 0x133   :  { %v712_v46 = vmul.f32 %v1054_v27, %v582_v34  ;;  %v487_v40 = vmul.f32 %v474_v38, %v1406_v45  ;;  %v643_v5 = vadd.f32 -0.001682827, %v630_v39  ;;  %v763_v0 = vmul.f32 %v750_v8, %v360_v14 }
 0x134   :  { %v577_v53 = vadd.f32 -0.016096033, %v564_v37  ;;  %v505_v43 = vmul.f32 %v492_v9, %v1387_v17  ;;  %v758_v44 = vadd.f32 1.0, %v885_v55  ;;  %v428_v58 = vmul.f32 -2.7261424e-10, %v1434_v41 }
 0x135   :  { %v878_v42 = vclamps-f32 %v712_v46, 1.0  ;;  %v500_v57 = vadd.f32 -5.6925062e-05, %v487_v40  ;;  %v656_v30 = vmul.f32 %v643_v5, %v1406_v45  ;;  %v674_v16 = vmul.f32 %v661_v47, %v1387_v17 }
 0x136   :  { %v597_v26 = vmul.f32 -1.45660715e-05, %v1434_v41  ;;  %v332_v48 = vmul.f32 %v1159_v18, %v312_v33  ;;  %v441_v2 = vadd.f32 2.7706815e-08, %v428_v58  ;;  %v1448_v63 = vclamps-f32 %v377_v50, 4.0 }
 0x137   :  { %v751_v49 = vadd.f32 1.0, %v878_v42  ;;  %v513_v1 = vmul.f32 %v500_v57, %v1406_v45  ;;  %v669_v14 = vadd.f32 -0.0073733293, %v656_v30  ;;  %v590_v6 = vmul.f32 %v1346_v56, %v577_v53 }
 0x138   :  { %v518_v11 = vadd.f32 -0.00073499064, %v505_v43  ;;  %v610_v3 = vadd.f32 -0.00021337405, %v597_v26  ;;  %v454_v12 = vmul.f32 %v441_v2, %v1434_v41  ;;  %v1455_v13 = vmul.f32 %v1448_v63, %v1448_v63 }
 0x139   :  { %v764_v59 = vmul.f32 %v751_v49, %v361_v36  ;;  %v526_v61 = vadd.f32 -0.00073499064, %v513_v1  ;;  %v682_v54 = vmul.f32 %v669_v14, %v1406_v45  ;;  %v687_v60 = vadd.f32 -0.014264739, %v674_v16 }
 0x13a   :  { %v623_v19 = vmul.f32 %v610_v3, %v1434_v41  ;;  %v1459_v20 = vadd.f32 %v1166_v22, %v332_v48  ;;  %v467_v24 = vadd.f32 -2.101024e-06, %v454_v12  ;;  %v369_v7 = vmul.f32 0.5, %v1327_v4 }
 0x13b   :  { %v1056_v18 = vpop.eup %1055  ;;  %v922_v15 = vpack.c.bf16 %v764_v59, %v763_v0  ;;  %v539_v23 = vmul.f32 %v526_v61, %v1406_v45  ;;  %v695_v10 = vadd.f32 -0.014264739, %v682_v54  ;;  %v531_v25 = vmul.f32 %v518_v11, %v1387_v17 }
 0x13c   :  { %v720_v56 = vmul.f32 %v1056_v18, %v590_v6  ;;  %v636_v28 = vadd.f32 -0.001682827, %v623_v19  ;;  %v429_v8 = vmul.f32 -2.7261424e-10, %v1455_v13  ;;  %v480_v22 = vmul.f32 %v467_v24, %v1434_v41 }
 0x13d   :  { %944 = vst [vmem:[%s1530_s5 + $0x8] sm:$0xff] %v922_v15   ;;  %v552_v9 = vadd.f32 -0.0029546001, %v539_v23  ;;  %1057 = vrcp.f32 %v695_v10  ;;  %v598_v37 = vmul.f32 -1.45660715e-05, %v1455_v13  ;;  %v771_v38 = vmul.f32 %v758_v44, %v1418_v21 }
 0x13e   :  { %v886_v34 = vclamps-f32 %v720_v56, 1.0  ;;  %1059 = vrcp.f32 %v687_v60  ;;  %v649_v27 = vmul.f32 %v636_v28, %v1434_v41  ;;  %v442_v55 = vadd.f32 2.7706815e-08, %v429_v8 }
 0x13f   :  { %v493_v4 = vadd.f32 -5.6925062e-05, %v480_v22  ;;  %v378_v46 = vmul.f32 0.70710677, %v1459_v20  ;;  %v544_v47 = vadd.f32 -0.0029546001, %v531_v25  ;;  %v565_v50 = vmul.f32 %v552_v9, %v1406_v45 }
 0x140   :  { %v759_v39 = vadd.f32 1.0, %v886_v34  ;;  %v662_v33 = vadd.f32 -0.0073733293, %v649_v27  ;;  %v455_v36 = vmul.f32 %v442_v55, %v1455_v13  ;;  %v611_v40 = vadd.f32 -0.00021337405, %v598_v37 }
 0x141   :  { %v506_v0 = vmul.f32 %v493_v4, %v1434_v41  ;;  %v1476_v42 = vclamps-f32 %v378_v46, 4.0  ;;  %v557_v58 = vmul.f32 %v544_v47, %v1387_v17  ;;  %v578_v26 = vadd.f32 -0.016096033, %v565_v50 }
 0x142   :  { %v772_v5 = vmul.f32 %v759_v39, %v369_v7  ;;  %v675_v53 = vmul.f32 %v662_v33, %v1434_v41  ;;  %v468_v43 = vadd.f32 -2.101024e-06, %v455_v36  ;;  %v624_v21 = vmul.f32 %v611_v40, %v1455_v13 }
 0x143   :  { %v519_v57 = vadd.f32 -0.00073499064, %v506_v0  ;;  %v1482_v30 = vmul.f32 %v1476_v42, %v1476_v42  ;;  %v570_v3 = vadd.f32 -0.016096033, %v557_v58  ;;  %v591_v12 = vmul.f32 %v1395_v52, %v578_v26 }
 0x144   :  { %v942_v44 = vpack.c.bf16 %v772_v5, %v771_v38  ;;  %v688_v49 = vadd.f32 -0.014264739, %v675_v53  ;;  %v481_v45 = vmul.f32 %v468_v43, %v1455_v13  ;;  %v637_v16 = vadd.f32 -0.001682827, %v624_v21 }
 0x145   :  { %v532_v48 = vmul.f32 %v519_v57, %v1434_v41  ;;  %v430_v1 = vmul.f32 -2.7261424e-10, %v1482_v30  ;;  %v599_v14 = vmul.f32 -1.45660715e-05, %v1482_v30  ;;  %v583_v28 = vmul.f32 %v1380_v32, %v570_v3 }
 0x146   :  { %948 = vst [vmem:[%s1530_s5 + $0x28] sm:$0xff] %v942_v44   ;;  %1061 = vrcp.f32 %v688_v49  ;;  %v494_v2 = vadd.f32 -5.6925062e-05, %v481_v45  ;;  %v650_v59 = vmul.f32 %v637_v16, %v1455_v13  ;;  %v370_v37 = vmul.f32 0.5, %v1378_v29 }
 0x147   :  { %v545_v17 = vadd.f32 -0.0029546001, %v532_v48  ;;  %v443_v6 = vadd.f32 2.7706815e-08, %v430_v1  ;;  %v612_v11 = vadd.f32 -0.00021337405, %v599_v14 }
 0x148   :  { %v507_v61 = vmul.f32 %v494_v2, %v1455_v13  ;;  %v663_v54 = vadd.f32 -0.0073733293, %v650_v59  ;;  %v363_v49 = vmul.f32 0.5, %v1411_v51 }
 0x149   :  { %v456_v18 = vmul.f32 %v443_v6, %v1482_v30  ;;  %v625_v15 = vmul.f32 %v612_v11, %v1482_v30  ;;  %v558_v19 = vmul.f32 %v545_v17, %v1434_v41 }
 0x14a   :  { %v1058_v60 = vpop.eup %1057  ;;  %v520_v56 = vadd.f32 -0.00073499064, %v507_v61  ;;  %v676_v23 = vmul.f32 %v663_v54, %v1455_v13  ;;  %v365_v61 = vmul.f32 0.5, %v1459_v20 }
 0x14b   :  { %v1060_v10 = vpop.eup %1059  ;;  %v721_v24 = vmul.f32 %v1058_v60, %v591_v12  ;;  %v469_v7 = vadd.f32 -2.101024e-06, %v456_v18  ;;  %v638_v25 = vadd.f32 -0.001682827, %v625_v15  ;;  %v571_v55 = vadd.f32 -0.016096033, %v558_v19 }
 0x14c   :  { %v533_v8 = vmul.f32 %v520_v56, %v1455_v13  ;;  %v689_v34 = vadd.f32 -0.014264739, %v676_v23  ;;  %v713_v27 = vmul.f32 %v1060_v10, %v583_v28 }
 0x14d   :  { %v887_v52 = vclamps-f32 %v721_v24, 1.0  ;;  %v482_v9 = vmul.f32 %v469_v7, %v1482_v30  ;;  %v651_v22 = vmul.f32 %v638_v25, %v1482_v30  ;;  %v584_v36 = vmul.f32 %v1428_v35, %v571_v55 }
 0x14e   :  { %v546_v41 = vadd.f32 -0.0029546001, %v533_v8  ;;  %1063 = vrcp.f32 %v689_v34  ;;  %v879_v33 = vclamps-f32 %v713_v27, 1.0  ;;  %v362_v35 = vmul.f32 0.5, %v1365_v62 }
 0x14f   :  { %v760_v38 = vadd.f32 1.0, %v887_v52  ;;  %v495_v39 = vadd.f32 -5.6925062e-05, %v482_v9  ;;  %v664_v4 = vadd.f32 -0.0073733293, %v651_v22 }
 0x150   :  { %v559_v50 = vmul.f32 %v546_v41, %v1455_v13  ;;  %v752_v21 = vadd.f32 1.0, %v879_v33 }
 0x151   :  { %v773_v46 = vmul.f32 %v760_v38, %v370_v37  ;;  %v508_v32 = vmul.f32 %v495_v39, %v1482_v30  ;;  %v677_v47 = vmul.f32 %v664_v4, %v1482_v30 }
 0x152   :  { %v572_v57 = vadd.f32 -0.016096033, %v559_v50  ;;  %v765_v16 = vmul.f32 %v752_v21, %v362_v35 }
 0x153   :  { %v1062_v40 = vpop.eup %1061  ;;  %v913_v5 = vpack.c.bf16 %v773_v46, %v773_v46  ;;  %v521_v0 = vadd.f32 -0.00073499064, %v508_v32  ;;  %v690_v53 = vadd.f32 -0.014264739, %v677_v47 }
 0x154   :  { %v714_v43 = vmul.f32 %v1062_v40, %v584_v36  ;;  %v585_v1 = vmul.f32 %v1448_v63, %v572_v57 }
 0x155   :  { %839 = vst [vmem:[%s1530_s5 + $0x30] sm:$0xf] %v913_v5  ;;  %v534_v29 = vmul.f32 %v521_v0, %v1482_v30  ;;  %1065 = vrcp.f32 %v690_v53 }
 0x156   :  { %v880_v44 = vclamps-f32 %v714_v43, 1.0 }
 0x157   :  { %v547_v58 = vadd.f32 -0.0029546001, %v534_v29 }
 0x158   :  { %v753_v45 = vadd.f32 1.0, %v880_v44 }
 0x159   :  { %v560_v13 = vmul.f32 %v547_v58, %v1482_v30  ;;  %v364_v30 = vmul.f32 0.5, %v1425_v31 }
 0x15a   :  { %v766_v26 = vmul.f32 %v753_v45, %v363_v49 }
 0x15b   :  { %v1064_v48 = vpop.eup %1063  ;;  %v573_v59 = vadd.f32 -0.016096033, %v560_v13 }
 0x15c   :  { %v927_v14 = vpack.c.bf16 %v766_v26, %v765_v16  ;;  %v715_v2 = vmul.f32 %v1064_v48, %v585_v1 }
 0x15d   :  { %v586_v62 = vmul.f32 %v1476_v42, %v573_v59 }
 0x15e   :  { %945 = vst [vmem:[%s1530_s5 + $0x10] sm:$0xff] %v927_v14   ;;  %v881_v17 = vclamps-f32 %v715_v2, 1.0 }
 0x160   :  { %v754_v11 = vadd.f32 1.0, %v881_v17 }
 0x162   :  { %v1066_v6 = vpop.eup %1065  ;;  %v767_v63 = vmul.f32 %v754_v11, %v364_v30 }
 0x163   :  { %v716_v51 = vmul.f32 %v1066_v6, %v586_v62 }
 0x165   :  { %v882_v3 = vclamps-f32 %v716_v51, 1.0 }
 0x167   :  { %v755_v54 = vadd.f32 1.0, %v882_v3 }
 0x169   :  { %v768_v12 = vmul.f32 %v755_v54, %v365_v61 }
 0x16b   :  { %v932_v18 = vpack.c.bf16 %v768_v12, %v767_v63 }
 0x16d   :  { %946 = vst [vmem:[%s1530_s5 + $0x18] sm:$0xff] %v932_v18  }

// kernel: deepspeech_forward.21
= control target key start
LH: loop header
LB: loop body
LE: loop exit
PB: predicated region body
PF: predicated region fallthrough
CT: control target
= control target key end

     0   :  { %v466_v0 = vmov 0.0   ;;  %vm467_vm0 = vmmov 0   ;;  %s641_s1 = inlined_call_operand.vmem [shape: bf16[128,128], index: 1, kind: input, shape index: {}]   ;;  %s642_s0 = inlined_call_operand.vmem [shape: bf16[104,128], index: 0, kind: input, shape index: {}]   ;;  %s643_s2 = inlined_call_operand.vmem [shape: f32[1,128], index: 2, kind: input, shape index: {}]   ;;  %s644_s3 = inlined_call_operand.vmem [shape: f32[104,128], index: 3, kind: input, shape index: {}]   ;;  %s645_s4 = inlined_call_operand.vmem [shape: f32[104,128], index: 4, kind: output, shape index: {}]  }
   0x1   :  { %389 = vmatprep.subr.bf16.mxu0 %v466_v0  ;;  %v451_v1 = vld [vmem:[%s641_s1 + $0x38] sm:$0xff]   ;;  %433 = vmatprep.subr.bf16.mxu1 %v466_v0  ;;  %v452_v2 = vld [vmem:[%s641_s1 + $0x30] sm:$0xff]   ;;  %v453_v3 = vld [vmem:[%s641_s1 + $0x28] sm:$0xff]  }
   0x2   :  { %405 = vmatprep.mubr.msk.bf16.mxu0 %vm467_vm0, %v466_v0  ;;  %421 = vmatprep.mubr.msk.bf16.mxu1 %vm467_vm0, %v466_v0  ;;  %v454_v4 = vld [vmem:[%s641_s1 + $0x20] sm:$0xff]   ;;  %v455_v5 = vld [vmem:[%s641_s1 + $0x18] sm:$0xff]   ;;  %v456_v6 = vld [vmem:[%s641_s1 + $0x10] sm:$0xff]  }
   0x3   :  { %390 = vmatpush3.bf16.msra.mxu0 %v451_v1  ;;  %441 = vmatpush3.bf16.msra.mxu1 %v451_v1  ;;  %v457_v7 = vld [vmem:[%s641_s1 + $0x8] sm:$0xff]   ;;  %v458_v8 = vld [vmem:[%s641_s1] sm:$0xff]   ;;  %v463_v13 = vld [vmem:[%s642_s0 + $0x10] sm:$0xff]  }
   0x4   :  { %391 = vmatprep.subr.bf16.mxu0 %v466_v0  ;;  %434 = vmatprep.subr.bf16.mxu1 %v466_v0  ;;  %v459_v9 = vld [vmem:[%s642_s0] sm:$0xff]   ;;  %v461_v11 = vld [vmem:[%s642_s0 + $0x8] sm:$0xff]   ;;  %v464_v14 = vld [vmem:[%s642_s0 + $0x30] ss:$0 sps:$4 sm:$0xff]  }
   0x5   :  { %v460_v10 = vld [vmem:[%s642_s0 + $0x20] sm:$0xff]   ;;  %v462_v12 = vld [vmem:[%s642_s0 + $0x28] sm:$0xff]   ;;  %v465_v15 = vld [vmem:[%s642_s0 + $0x18] sm:$0xff]  }
   0x6   :  { %v548_v16 = vld [vmem:[%s643_s2] ss:$0 sm:$0xff]  ;;  %v316_v28 = vld [vmem:[%s644_s3 + $0x8] sm:$0xff]  ;;  %v317_v38 = vld [vmem:[%s644_s3 + $0x10] sm:$0xff] }
   0x7   :  { %392 = vmatpush3.bf16.msra.mxu0 %v452_v2  ;;  %442 = vmatpush3.bf16.msra.mxu1 %v452_v2  ;;  %v315_v18 = vld [vmem:[%s644_s3] sm:$0xff]  ;;  %v324_v30 = vld [vmem:[%s644_s3 + $0x48] sm:$0xff]  ;;  %v325_v40 = vld [vmem:[%s644_s3 + $0x50] sm:$0xff] }
   0x8   :  { %393 = vmatprep.subr.bf16.mxu0 %v466_v0  ;;  %435 = vmatprep.subr.bf16.mxu1 %v466_v0  ;;  %v323_v20 = vld [vmem:[%s644_s3 + $0x40] sm:$0xff]  ;;  %v318_v48 = vld [vmem:[%s644_s3 + $0x18] sm:$0xff] }
   0x9   :  { %v326_v50 = vld [vmem:[%s644_s3 + $0x58] sm:$0xff]  ;;  %v319_v58 = vld [vmem:[%s644_s3 + $0x20] sm:$0xff] }
   0xa   :  { %v327_v60 = vld [vmem:[%s644_s3 + $0x60] sm:$0xff] }
   0xb   :  { %394 = vmatpush3.bf16.msra.mxu0 %v453_v3  ;;  %443 = vmatpush3.bf16.msra.mxu1 %v453_v3 }
   0xc   :  { %395 = vmatprep.subr.bf16.mxu0 %v466_v0  ;;  %436 = vmatprep.subr.bf16.mxu1 %v466_v0 }
   0xf   :  { %396 = vmatpush3.bf16.msra.mxu0 %v454_v4  ;;  %444 = vmatpush3.bf16.msra.mxu1 %v454_v4  ;;  %v320_v4 = vld [vmem:[%s644_s3 + $0x28] sm:$0xff] }
  0x10   :  { %397 = vmatprep.subr.bf16.mxu0 %v466_v0  ;;  %437 = vmatprep.subr.bf16.mxu1 %v466_v0 }
  0x13   :  { %398 = vmatpush3.bf16.msra.mxu0 %v455_v5  ;;  %445 = vmatpush3.bf16.msra.mxu1 %v455_v5 }
  0x14   :  { %399 = vmatprep.subr.bf16.mxu0 %v466_v0  ;;  %438 = vmatprep.subr.bf16.mxu1 %v466_v0 }
  0x17   :  { %400 = vmatpush3.bf16.msra.mxu0 %v456_v6  ;;  %446 = vmatpush3.bf16.msra.mxu1 %v456_v6 }
  0x18   :  { %401 = vmatprep.subr.bf16.mxu0 %v466_v0  ;;  %439 = vmatprep.subr.bf16.mxu1 %v466_v0 }
  0x1b   :  { %402 = vmatpush3.bf16.msra.mxu0 %v457_v7  ;;  %447 = vmatpush3.bf16.msra.mxu1 %v457_v7 }
  0x1c   :  { %403 = vmatprep.subr.bf16.mxu0 %v466_v0  ;;  %440 = vmatprep.subr.bf16.mxu1 %v466_v0 }
  0x1f   :  { %404 = vmatpush3.bf16.msra.mxu0 %v458_v8  ;;  %448 = vmatpush3.bf16.msra.mxu1 %v458_v8 }
  0x22   :  { %406 = vmatmul.mubr.bf16.vlgmr.msra.gmra.mxu0 %v459_v9  ;;  %422 = vmatmul.mubr.bf16.vlgmr.msra.gmra.mxu1 %v460_v10 }
  0x23   :  { %409 = vmatprep.mubr.msk.bf16.mxu0 %vm467_vm0, %v466_v0  ;;  %425 = vmatprep.mubr.msk.bf16.mxu1 %vm467_vm0, %v466_v0 }
  0x2a   :  { %410 = vmatmul.mubr.bf16.gmra.mxu0 %v461_v11  ;;  %426 = vmatmul.mubr.bf16.gmra.mxu1 %v462_v12  ;;  %v321_v11 = vld [vmem:[%s644_s3 + $0x30] sm:$0xff] }
  0x2b   :  { %413 = vmatprep.mubr.msk.bf16.mxu0 %vm467_vm0, %v466_v0  ;;  %429 = vmatprep.mubr.msk.bf16.mxu1 %vm467_vm0, %v466_v0 }
  0x32   :  { %414 = vmatmul.mubr.bf16.gmra.mxu0 %v463_v13  ;;  %430 = vmatmul.mubr.bf16.gmra.mxu1 %v464_v14 }
  0x33   :  { %417 = vmatprep.mubr.msk.bf16.mxu0 %vm467_vm0, %v466_v0 }
  0x3a   :  { %418 = vmatmul.mubr.bf16.gmra.mxu0 %v465_v15 }
  0xe2   :  { %v199_v17 = vpop.f32.mrf.mxu0  ;;  %v231_v19 = vpop.f32.mrf.mxu1 }
  0xe3   :  { %v302_v21 = vadd.f32 %v548_v16, %v199_v17  ;;  %v310_v22 = vadd.f32 %v548_v16, %v231_v19  ;;  %v322_v17 = vld [vmem:[%s644_s3 + $0x38] sm:$0xff] }
  0xe4   :  { %v407_v23 = vpop.f32.mrf.mxu0  ;;  %v423_v24 = vpop.f32.mrf.mxu1 }
  0xe5   :  { %v328_v25 = vadd.f32 %v315_v18, %v302_v21  ;;  %v336_v26 = vadd.f32 %v323_v20, %v310_v22 }
  0xe6   :  { %v202_v27 = vpop.f32.mrf.mxu0  ;;  %v234_v29 = vpop.f32.mrf.mxu1 }
  0xe7   :  { %341 = vst [vmem:[%s645_s4] sm:$0xff] %v328_v25  ;;  %v303_v31 = vadd.f32 %v548_v16, %v202_v27  ;;  %349 = vst [vmem:[%s645_s4 + $0x40] sm:$0xff] %v336_v26  ;;  %v311_v32 = vadd.f32 %v548_v16, %v234_v29 }
  0xe8   :  { %v408_v33 = vpop.f32.mrf.mxu0  ;;  %v424_v34 = vpop.f32.mrf.mxu1 }
  0xe9   :  { %v329_v35 = vadd.f32 %v316_v28, %v303_v31  ;;  %v337_v36 = vadd.f32 %v324_v30, %v311_v32 }
  0xea   :  { %v207_v37 = vpop.f32.mrf.mxu0  ;;  %v239_v39 = vpop.f32.mrf.mxu1 }
  0xeb   :  { %342 = vst [vmem:[%s645_s4 + $0x8] sm:$0xff] %v329_v35  ;;  %v304_v41 = vadd.f32 %v548_v16, %v207_v37  ;;  %350 = vst [vmem:[%s645_s4 + $0x48] sm:$0xff] %v337_v36  ;;  %v312_v42 = vadd.f32 %v548_v16, %v239_v39 }
  0xec   :  { %v411_v43 = vpop.f32.mrf.mxu0  ;;  %v427_v44 = vpop.f32.mrf.mxu1 }
  0xed   :  { %v330_v45 = vadd.f32 %v317_v38, %v304_v41  ;;  %v338_v46 = vadd.f32 %v325_v40, %v312_v42 }
  0xee   :  { %v210_v47 = vpop.f32.mrf.mxu0  ;;  %v242_v49 = vpop.f32.mrf.mxu1 }
  0xef   :  { %343 = vst [vmem:[%s645_s4 + $0x10] sm:$0xff] %v330_v45  ;;  %v305_v51 = vadd.f32 %v548_v16, %v210_v47  ;;  %351 = vst [vmem:[%s645_s4 + $0x50] sm:$0xff] %v338_v46  ;;  %v313_v52 = vadd.f32 %v548_v16, %v242_v49 }
  0xf0   :  { %v412_v53 = vpop.f32.mrf.mxu0  ;;  %v428_v54 = vpop.f32.mrf.mxu1 }
  0xf1   :  { %v331_v55 = vadd.f32 %v318_v48, %v305_v51  ;;  %v339_v56 = vadd.f32 %v326_v50, %v313_v52 }
  0xf2   :  { %v215_v57 = vpop.f32.mrf.mxu0  ;;  %v247_v59 = vpop.f32.mrf.mxu1 }
  0xf3   :  { %344 = vst [vmem:[%s645_s4 + $0x18] sm:$0xff] %v331_v55  ;;  %v306_v61 = vadd.f32 %v548_v16, %v215_v57  ;;  %352 = vst [vmem:[%s645_s4 + $0x58] sm:$0xff] %v339_v56  ;;  %v314_v62 = vadd.f32 %v548_v16, %v247_v59 }
  0xf4   :  { %v415_v63 = vpop.f32.mrf.mxu0  ;;  %v431_v0 = vpop.f32.mrf.mxu1 }
  0xf5   :  { %v332_v1 = vadd.f32 %v319_v58, %v306_v61  ;;  %v340_v2 = vadd.f32 %v327_v60, %v314_v62 }
  0xf6   :  { %v218_v3 = vpop.f32.mrf.mxu0  ;;  %v250_v5 = vpop.f32.mrf.mxu1 }
  0xf7   :  { %345 = vst [vmem:[%s645_s4 + $0x20] sm:$0xff] %v332_v1  ;;  %v307_v6 = vadd.f32 %v548_v16, %v218_v3  ;;  %353 = vst [vmem:[%s645_s4 + $0x60] sm:$0xff] %v340_v2 }
  0xf8   :  { %v416_v7 = vpop.f32.mrf.mxu0  ;;  %v432_v8 = vpop.f32.mrf.mxu1 }
  0xf9   :  { %v333_v9 = vadd.f32 %v320_v4, %v307_v6 }
  0xfa   :  { %v223_v10 = vpop.f32.mrf.mxu0 }
  0xfb   :  { %346 = vst [vmem:[%s645_s4 + $0x28] sm:$0xff] %v333_v9  ;;  %v308_v12 = vadd.f32 %v548_v16, %v223_v10 }
  0xfc   :  { %v419_v13 = vpop.f32.mrf.mxu0 }
  0xfd   :  { %v334_v14 = vadd.f32 %v321_v11, %v308_v12 }
  0xfe   :  { %v226_v15 = vpop.f32.mrf.mxu0 }
  0xff   :  { %347 = vst [vmem:[%s645_s4 + $0x30] sm:$0xff] %v334_v14  ;;  %v309_v18 = vadd.f32 %v548_v16, %v226_v15 }
 0x100   :  { %v420_v19 = vpop.f32.mrf.mxu0 }
 0x101   :  { %v335_v20 = vadd.f32 %v322_v17, %v309_v18 }
 0x103   :  { %348 = vst [vmem:[%s645_s4 + $0x38] sm:$0xff] %v335_v20 }

// kernel: deepspeech_forward.25
= control target key start
LH: loop header
LB: loop body
LE: loop exit
PB: predicated region body
PF: predicated region fallthrough
CT: control target
= control target key end

     0   :  { %v193_v0 = vmov 0.0   ;;  %vm194_vm0 = vmmov 0   ;;  %s248_s1 = inlined_call_operand.vmem [shape: bf16[128,128], index: 1, kind: input, shape index: {}]   ;;  %s249_s0 = inlined_call_operand.vmem [shape: bf16[8,128], index: 0, kind: input, shape index: {}]   ;;  %s250_s2 = inlined_call_operand.vmem [shape: f32[1,128], index: 2, kind: input, shape index: {}]   ;;  %s251_s3 = inlined_call_operand.vmem [shape: f32[8,128], index: 3, kind: output, shape index: {}]  }
   0x1   :  { %163 = vmatprep.subr.bf16.mxu0 %v193_v0  ;;  %v185_v1 = vld [vmem:[%s248_s1 + $0x38] sm:$0xff]   ;;  %179 = vmatprep.mubr.msk.bf16.mxu0 %vm194_vm0, %v193_v0  ;;  %v186_v2 = vld [vmem:[%s248_s1 + $0x30] sm:$0xff]   ;;  %v187_v3 = vld [vmem:[%s248_s1 + $0x28] sm:$0xff]  }
   0x2   :  { %164 = vmatpush3.bf16.msra.mxu0 %v185_v1  ;;  %v188_v4 = vld [vmem:[%s248_s1 + $0x20] sm:$0xff]   ;;  %v189_v5 = vld [vmem:[%s248_s1 + $0x18] sm:$0xff]   ;;  %v190_v6 = vld [vmem:[%s248_s1 + $0x10] sm:$0xff]  }
   0x3   :  { %165 = vmatprep.subr.bf16.mxu0 %v193_v0  ;;  %v191_v7 = vld [vmem:[%s248_s1 + $0x8] sm:$0xff]   ;;  %v192_v8 = vld [vmem:[%s248_s1] sm:$0xff]  }
   0x4   :  { %v21_v9 = vld [vmem:[%s249_s0] sm:$0xf] }
   0x5   :  { %v153_v10 = vld [vmem:[%s250_s2] ss:$0 sm:$0xff] }
   0x6   :  { %166 = vmatpush3.bf16.msra.mxu0 %v186_v2 }
   0x7   :  { %167 = vmatprep.subr.bf16.mxu0 %v193_v0 }
   0xa   :  { %168 = vmatpush3.bf16.msra.mxu0 %v187_v3 }
   0xb   :  { %169 = vmatprep.subr.bf16.mxu0 %v193_v0 }
   0xe   :  { %170 = vmatpush3.bf16.msra.mxu0 %v188_v4 }
   0xf   :  { %171 = vmatprep.subr.bf16.mxu0 %v193_v0 }
  0x12   :  { %172 = vmatpush3.bf16.msra.mxu0 %v189_v5 }
  0x13   :  { %173 = vmatprep.subr.bf16.mxu0 %v193_v0 }
  0x16   :  { %174 = vmatpush3.bf16.msra.mxu0 %v190_v6 }
  0x17   :  { %175 = vmatprep.subr.bf16.mxu0 %v193_v0 }
  0x1a   :  { %176 = vmatpush3.bf16.msra.mxu0 %v191_v7 }
  0x1b   :  { %177 = vmatprep.subr.bf16.mxu0 %v193_v0 }
  0x1e   :  { %178 = vmatpush3.bf16.msra.mxu0 %v192_v8 }
  0x21   :  { %180 = vmatmul.mubr.bf16.vlgmr.msra.gmra.mxu0 %v21_v9 }
  0xe1   :  { %v120_v11 = vpop.f32.mrf.mxu0 }
  0xe2   :  { %v139_v12 = vadd.f32 %v153_v10, %v120_v11 }
  0xe3   :  { %v181_v13 = vpop.f32.mrf.mxu0 }
  0xe4   :  { %140 = vst [vmem:[%s251_s3] sm:$0xff] %v139_v12 }
  0xe5   :  { %v123_v14 = vpop.f32.mrf.mxu0 }
  0xe7   :  { %v182_v15 = vpop.f32.mrf.mxu0 }

// kernel: deepspeech_forward.26
= control target key start
LH: loop header
LB: loop body
LE: loop exit
PB: predicated region body
PF: predicated region fallthrough
CT: control target
= control target key end

     0   :  { %s801_s12 = smov 0   ;;  %s803_s13 = smov 0   ;;  %s890_s0 = inlined_call_operand.vmem [shape: bf16[8,128], index: 0, kind: input, shape index: {}]   ;;  %s891_s1 = inlined_call_operand.vmem [shape: bf16[128,512], index: 1, kind: input, shape index: {}]   ;;  %s892_s2 = inlined_call_operand.vmem [shape: f32[1,512], index: 2, kind: input, shape index: {}]   ;;  %s893_s3 = inlined_call_operand.vmem [shape: f32[8,512], index: 3, kind: output, shape index: {}]  }
   0x1   :  { %s805_s14 = smov 0   ;;  %s807_s15 = smov 0  }
   0x2   :  { %s809_s16 = smov 0  }
   0x3 LB: > { %s28_s17 = sadd.s32 1, %s774_s15  ;;  %p76_p1 = scmp.ne.s32.totalorder %s766_s13, %s762_s12  ;;  %s778_s16 = sphi %s809_s16, %s13_s16   ;;  %s774_s15 = sphi %s807_s15, %s897_s15   ;;  %s770_s14 = sphi %s805_s14, %s896_s14   ;;  %s766_s13 = sphi %s803_s13, %s895_s13   ;;  %s762_s12 = sphi %s801_s12, %s894_s12  }
   0x4   : > { %p30_p0 = scmp.ge.s32.totalorder %s28_s17, 2  ;;  %p77_p2 = scmp.eq.s32.totalorder %s778_s16, 0 }
   0x5   : > { %s69_s19 = sadd.s32 1, %s766_s13  ;;  %p647_p5 = scmp.ge.s32.totalorder %s778_s16, 2 }
   0x6   : > { %s899_s17 = smov (%p30_p0, %s28_s17), 0  ;;  %p78_p3 = por %p77_p2, %p76_p1 }
   0x7   : > { %s65_s18 = ssub.s32 %s774_s15, %s899_s17  ;;  %166 = sbr.rel (%p647_p5) target bundleno = 24 (0x18), region = 20 }
   0x8   : > { %p67_p4 = scmp.eq.s32.totalorder %s65_s18, 0 }
   0xa   : > { %s836_s20 = scalar_select %p67_p4, %s766_s13, %s69_s19  }
   0xc   : > { %169 = sbr.rel (!%p78_p3) target bundleno = 24 (0x18), region = 24  ;;  %s171_s21 = sand.u32 (%p78_p3), 1, %s766_s13  }
   0xd   : > { %s674_s22 = sshll.u32 (%p78_p3), %s774_s15, 3  ;;  %s648_s23 = sshll.u32 (%p78_p3), %s171_s21, 7 }
   0xe   : > { %s844_s26 = scalar_lea.vmem (%p78_p3), %s891_s1, %s674_s22  ;;  %s173_s27 = scalar_lea.vmem (%p78_p3), [#allocation3], %s648_s23 }
   0xf   : > { %v238_v0 = vld [vmem:[%s844_s26] sm:$0xff] (%p78_p3)  ;;  %v240_v1 = vld [vmem:[%s844_s26 + $0x10] sm:$0xff] (%p78_p3) }
  0x10   : > { %v242_v2 = vld [vmem:[%s844_s26 + $0x20] sm:$0xff] (%p78_p3)  ;;  %239 = vst [vmem:[%s173_s27] sm:$0xff] (%p78_p3), %v238_v0  ;;  %241 = vst [vmem:[%s173_s27 + $0x8] sm:$0xff] (%p78_p3), %v240_v1  ;;  %v244_v3 = vld [vmem:[%s844_s26 + $0x30] sm:$0xff] (%p78_p3) }
  0x11   : > { %243 = vst [vmem:[%s173_s27 + $0x10] sm:$0xff] %v242_v2  ;;  %v246_v4 = vld [vmem:[%s844_s26 + $0x40] sm:$0xff]  ;;  %v248_v5 = vld [vmem:[%s844_s26 + $0x50] sm:$0xff]  ;;  %245 = vst [vmem:[%s173_s27 + $0x18] sm:$0xff] %v244_v3 }
  0x12   : > { %247 = vst [vmem:[%s173_s27 + $0x20] sm:$0xff] %v246_v4  ;;  %249 = vst [vmem:[%s173_s27 + $0x28] sm:$0xff] %v248_v5  ;;  %v250_v6 = vld [vmem:[%s844_s26 + $0x60] sm:$0xff]  ;;  %v252_v7 = vld [vmem:[%s844_s26 + $0x70] sm:$0xff] }
  0x13   : > { %v254_v8 = vld [vmem:[%s844_s26 + $0x80] sm:$0xff]  ;;  %251 = vst [vmem:[%s173_s27 + $0x30] sm:$0xff] %v250_v6  ;;  %253 = vst [vmem:[%s173_s27 + $0x38] sm:$0xff] %v252_v7  ;;  %v256_v9 = vld [vmem:[%s844_s26 + $0x90] sm:$0xff] }
  0x14   : > { %255 = vst [vmem:[%s173_s27 + $0x40] sm:$0xff] %v254_v8  ;;  %v258_v10 = vld [vmem:[%s844_s26 + $0xa0] sm:$0xff]  ;;  %v260_v11 = vld [vmem:[%s844_s26 + $0xb0] sm:$0xff]  ;;  %257 = vst [vmem:[%s173_s27 + $0x48] sm:$0xff] %v256_v9 }
  0x15   : > { %259 = vst [vmem:[%s173_s27 + $0x50] sm:$0xff] %v258_v10  ;;  %261 = vst [vmem:[%s173_s27 + $0x58] sm:$0xff] %v260_v11  ;;  %v262_v12 = vld [vmem:[%s844_s26 + $0xc0] sm:$0xff]  ;;  %v264_v13 = vld [vmem:[%s844_s26 + $0xd0] sm:$0xff] }
  0x16   : > { %v266_v14 = vld [vmem:[%s844_s26 + $0xe0] sm:$0xff]  ;;  %263 = vst [vmem:[%s173_s27 + $0x60] sm:$0xff] %v262_v12  ;;  %265 = vst [vmem:[%s173_s27 + $0x68] sm:$0xff] %v264_v13  ;;  %v268_v15 = vld [vmem:[%s844_s26 + $0xf0] sm:$0xff] }
  0x17   : > { %267 = vst [vmem:[%s173_s27 + $0x70] sm:$0xff] %v266_v14  ;;  %269 = vst [vmem:[%s173_s27 + $0x78] sm:$0xff] %v268_v15 }
  0x18 PF: > { %p651_p6 = scmp.ge.s32.totalorder %s778_s16, 1  ;;  %p282_p7 = scmp.lt.s32.totalorder %s778_s16, 3 }
  0x1a   : > { %p283_p8 = pnand %p651_p6, %p282_p7 }
  0x1b   : > { %s289_s28 = sand.u32 (!%p283_p8), 1, %s762_s12   ;;  %s653_s6 = sshll.u32 (!%p283_p8), %s770_s14, 1 }
  0x1c   : > { %286 = sbr.rel (%p283_p8) target bundleno = 265 (0x109), region = 66  ;;  %s652_s29 = sshll.u32 (!%p283_p8), %s289_s28, 7 }
  0x1d   : > { %s291_s30 = scalar_lea.vmem (!%p283_p8), [#allocation3], %s652_s29  ;;  %p337_p9 = scmp.lt.s32.totalorder (!%p283_p8), %s653_s6, 3 }
  0x21   : > { %v780_v16 = vmov 0   ;;  %v716_v17 = vld [vmem:[%s291_s30 + $0x74] ss:$8 sps:$4 sm:$0xff]   ;;  %v718_v18 = vld [vmem:[%s291_s30 + $0x70] ss:$8 sps:$4 sm:$0xff]   ;;  %v509_v34 = vlaneseq  ;;  %s901_s6 = smov (!%p337_p9, %s653_s6), 3 }
  0x22   : > { %489 = vmatprep.mubr.bf16.mxu0 %v780_v16  ;;  %457 = vmatprep.subr.bf16.mxu0 %v716_v17  ;;  %v719_v19 = vld [vmem:[%s291_s30 + $0x64] ss:$8 sps:$4 sm:$0xff]   ;;  %v721_v20 = vld [vmem:[%s291_s30 + $0x60] ss:$8 sps:$4 sm:$0xff]   ;;  %v722_v21 = vld [vmem:[%s291_s30 + $0x54] ss:$8 sps:$4 sm:$0xff]   ;;  %s339_s9 = scalar_lea.vmem %s892_s2, %s901_s6 }
  0x23   : > { %458 = vmatpush1.bf16.msra.mxu0 %v718_v18  ;;  %v724_v22 = vld [vmem:[%s291_s30 + $0x50] ss:$8 sps:$4 sm:$0xff]   ;;  %v725_v23 = vld [vmem:[%s291_s30 + $0x44] ss:$8 sps:$4 sm:$0xff]   ;;  %v727_v24 = vld [vmem:[%s291_s30 + $0x40] ss:$8 sps:$4 sm:$0xff]  }
  0x24   : > { %459 = vmatprep.subr.bf16.mxu0 %v719_v19  ;;  %v728_v25 = vld [vmem:[%s291_s30 + $0x34] ss:$8 sps:$4 sm:$0xff]   ;;  %v730_v26 = vld [vmem:[%s291_s30 + $0x30] ss:$8 sps:$4 sm:$0xff]   ;;  %v731_v27 = vld [vmem:[%s291_s30 + $0x24] ss:$8 sps:$4 sm:$0xff]  }
  0x25   : > { %v733_v28 = vld [vmem:[%s291_s30 + $0x20] ss:$8 sps:$4 sm:$0xff]   ;;  %v734_v29 = vld [vmem:[%s291_s30 + $0x14] ss:$8 sps:$4 sm:$0xff]   ;;  %v736_v30 = vld [vmem:[%s291_s30 + $0x10] ss:$8 sps:$4 sm:$0xff]  }
  0x26   : > { %v737_v31 = vld [vmem:[%s291_s30 + $0x4] ss:$8 sps:$4 sm:$0xff]   ;;  %v739_v32 = vld [vmem:[%s291_s30] ss:$8 sps:$4 sm:$0xff]   ;;  %v510_v35 = vshrl.u32 %v509_v34, 7  ;;  %s655_s10 = sshll.u32 %s901_s6, 3 }
  0x27   : > { %460 = vmatpush1.bf16.msra.mxu0 %v721_v20  ;;  %v360_v33 = vld [vmem:[%s890_s0] sm:$0xf]  ;;  %s349_s18 = scalar_lea.vmem %s893_s3, %s655_s10 }
  0x28   : > { %461 = vmatprep.subr.bf16.mxu0 %v722_v21  ;;  %v511_v36 = vsub.s32 0, %v510_v35  ;;  %v507_v37 = vld [vmem:[%s339_s9] sm:$0x3]  ;;  %v515_v38 = vsub.s32 1, %v510_v35 }
  0x2a   : > { %v512_v39 = vrot.slane %v507_v37, %v511_v36  ;;  %v516_v40 = vrot.slane %v507_v37, %v515_v38 }
  0x2b   : > { %462 = vmatpush1.bf16.msra.mxu0 %v724_v22 }
  0x2c   : > { %463 = vmatprep.subr.bf16.mxu0 %v725_v23 }
  0x2f   : > { %464 = vmatpush1.bf16.msra.mxu0 %v727_v24 }
  0x30   : > { %465 = vmatprep.subr.bf16.mxu0 %v728_v25 }
  0x33   : > { %466 = vmatpush1.bf16.msra.mxu0 %v730_v26 }
  0x34   : > { %467 = vmatprep.subr.bf16.mxu0 %v731_v27 }
  0x37   : > { %468 = vmatpush1.bf16.msra.mxu0 %v733_v28 }
  0x38   : > { %469 = vmatprep.subr.bf16.mxu0 %v734_v29 }
  0x3b   : > { %470 = vmatpush1.bf16.msra.mxu0 %v736_v30 }
  0x3c   : > { %471 = vmatprep.subr.bf16.mxu0 %v737_v31 }
  0x3f   : > { %472 = vmatpush1.bf16.msra.mxu0 %v739_v32 }
  0x42   : > { %490 = vmatmul.mubr.bf16.vlgmr.msra.gmra.mxu0 %v360_v33 }
 0x102   : > { %v491_v41 = vpop.f32.mrf.mxu0 }
 0x103   : > { %v519_v42 = vadd.f32 %v512_v39, %v491_v41 }
 0x104   : > { %v493_v43 = vpop.f32.mrf.mxu0 }
 0x105   : > { %521 = vst [vmem:[%s349_s18] sm:$0xff] %v519_v42  ;;  %v520_v44 = vadd.f32 %v516_v40, %v493_v43 }
 0x106   : > { %v495_v45 = vpop.f32.mrf.mxu0 }
 0x107   : > { %522 = vst [vmem:[%s349_s18 + $0x8] sm:$0xff] %v520_v44 }
 0x108   : > { %v496_v46 = vpop.f32.mrf.mxu0 }
 0x109 PF: > { %s13_s16 = sadd.s32 1, %s778_s16   ;;  %s894_s12 = smov %s766_s13 }
 0x10a   : > { %p10_p10 = scmp.ge.s32.totalorder %s13_s16, 4   ;;  %s895_s13 = smov %s836_s20 }
 0x10b   : > { %s896_s14 = smov %s774_s15  ;;  %s897_s15 = smov %s899_s17 }
 0x10c   :  { %12 = sbr.rel (!%p10_p10) target bundleno = 3 (0x3), region = 119 }

// kernel: deepspeech_forward.28
= control target key start
LH: loop header
LB: loop body
LE: loop exit
PB: predicated region body
PF: predicated region fallthrough
CT: control target
= control target key end

     0   :  { %s646_s9 = smov 0   ;;  %s774_s0 = inlined_call_operand.vmem [shape: f32[2,4,2,512], index: 0, kind: input, shape index: {}]   ;;  %s775_s1 = inlined_call_operand.vmem [shape: f32[2,128,512], index: 1, kind: input, shape index: {}]   ;;  %s776_s2 = inlined_call_operand.vmem [shape: f32[2,4,2,128], index: 2, kind: output, shape index: {}]  }
   0x1 LB: > { %s652_s10 = sadd.s32 4294967295, %s615_s9   ;;  %p528_p0 = scmp.ge.s32.totalorder %s615_s9, 1  ;;  %s615_s9 = sphi %s646_s9, %s12_s9  }
   0x2   : > { %p122_p1 = scmp.lt.s32.totalorder %s615_s9, 3 }
   0x4   : > { %p123_p2 = pnand %p528_p0, %p122_p1 }
   0x5   : > { %p149_p3 = scmp.lt.s32.totalorder (!%p123_p2), %s652_s10, 1  ;;  %s677_s24 = smov (!%p123_p2), 0  }
   0x6   : > { %126 = sbr.rel (%p123_p2) target bundleno = 309 (0x135), region = 28 }
   0xb   : > { %s150_s11 = scalar_select %p149_p3, %s652_s10, 1  ;;  %v673_v0 = vmov 0.0   ;;  %v675_v1 = vmov 0.0  }
   0xd   : > { %s543_s12 = sshll.u32 %s150_s11, 5  ;;  %s544_s13 = sshll.u32 %s150_s11, 9 }
   0xe   : > { %s661_s16 = scalar_lea.vmem %s774_s0, %s543_s12  ;;  %s666_s19 = scalar_lea.vmem %s775_s1, %s544_s13 }
   0xf   : > { %s545_s20 = sshll.u32 %s150_s11, 3 }
  0x10   : > { %s671_s23 = scalar_lea.vmem %s776_s2, %s545_s20 }
  0x11 LB: >> { %v240_v2 = vld [vmem:[%s666_s19 + $0x1e8] sm:$0xff]  ;;  %v242_v3 = vld [vmem:[%s666_s19 + $0x1f8] sm:$0xff]  ;;  %v239_v4 = vld [vmem:[%s666_s19 + $0x1e0] sm:$0xff]  ;;  %p172_p4 = scmp.eq.s32.totalorder %s652_s10, 0  ;;  %s173_s25 = ssub.s32 3, %s627_s24  ;;  %s627_s24 = sphi %s677_s24, %s169_s24   ;;  %v623_v1 = vphi %v675_v1, %v438_v1   ;;  %v619_v0 = vphi %v673_v0, %v436_v0  }
  0x12   : >> { %243 = vmatprep.subr.mxu0 %v240_v2  ;;  %314 = vmatprep.subr.mxu1 %v242_v3  ;;  %v241_v5 = vld [vmem:[%s666_s19 + $0x1f0] sm:$0xff]  ;;  %v236_v6 = vld [vmem:[%s666_s19 + $0x1c8] sm:$0xff]  ;;  %v238_v7 = vld [vmem:[%s666_s19 + $0x1d8] sm:$0xff] }
  0x13   : >> { %244 = vmatpush1.msra.mxu0 %v239_v4  ;;  %315 = vmatpush1.msra.mxu1 %v241_v5  ;;  %v235_v8 = vld [vmem:[%s666_s19 + $0x1c0] sm:$0xff]  ;;  %v237_v9 = vld [vmem:[%s666_s19 + $0x1d0] sm:$0xff]  ;;  %v232_v10 = vld [vmem:[%s666_s19 + $0x1a8] sm:$0xff]  ;;  %v629_v4 = vmov 0.0   ;;  %v630_v5 = vmov 1983009808   ;;  %s757_s26 = scalar_select %p172_p4, %s627_s24, %s173_s25 }
  0x14   : >> { %245 = vmatprep.subr.mxu0 %v236_v6  ;;  %316 = vmatprep.subr.mxu1 %v238_v7  ;;  %v234_v11 = vld [vmem:[%s666_s19 + $0x1b8] sm:$0xff]  ;;  %v231_v12 = vld [vmem:[%s666_s19 + $0x1a0] sm:$0xff]  ;;  %v233_v13 = vld [vmem:[%s666_s19 + $0x1b0] sm:$0xff]  ;;  %v392_v6 = vunpack.c.l.s4 %v630_v5  ;;  %v394_v7 = vlaneseq  ;;  %s169_s24 = sadd.s32 1, %s627_s24  }
  0x15   : >> { %246 = vmatpush1.msra.mxu0 %v235_v8  ;;  %317 = vmatpush1.msra.mxu1 %v237_v9  ;;  %v228_v14 = vld [vmem:[%s666_s19 + $0x188] sm:$0xff]  ;;  %v230_v15 = vld [vmem:[%s666_s19 + $0x198] sm:$0xff]  ;;  %v227_v16 = vld [vmem:[%s666_s19 + $0x180] sm:$0xff]  ;;  %s546_s27 = sshll.u32 %s757_s26, 3  ;;  %s540_s29 = sshll.u32 %s757_s26, 1 }
  0x16   : >> { %247 = vmatprep.subr.mxu0 %v232_v10  ;;  %318 = vmatprep.subr.mxu1 %v234_v11  ;;  %v229_v17 = vld [vmem:[%s666_s19 + $0x190] sm:$0xff]  ;;  %v224_v18 = vld [vmem:[%s666_s19 + $0x168] sm:$0xff]  ;;  %v226_v19 = vld [vmem:[%s666_s19 + $0x178] sm:$0xff]  ;;  %v393_v8 = vunpack.c.0.s8 %v392_v6  ;;  %v395_v9 = vshrl.u32 %v394_v7, 7  ;;  %s177_s28 = scalar_lea.vmem %s661_s16, %s546_s27  ;;  %s440_s30 = scalar_lea.vmem %s671_s23, %s540_s29 }
  0x17   : >> { %248 = vmatpush1.msra.mxu0 %v231_v12  ;;  %319 = vmatpush1.msra.mxu1 %v233_v13  ;;  %v223_v20 = vld [vmem:[%s666_s19 + $0x160] sm:$0xff]  ;;  %v225_v21 = vld [vmem:[%s666_s19 + $0x170] sm:$0xff]  ;;  %v220_v22 = vld [vmem:[%s666_s19 + $0x148] sm:$0xff]  ;;  %p166_p5 = scmp.ge.s32.totalorder %s169_s24, 4  }
  0x18   : >> { %249 = vmatprep.subr.mxu0 %v228_v14  ;;  %320 = vmatprep.subr.mxu1 %v230_v15  ;;  %v222_v23 = vld [vmem:[%s666_s19 + $0x158] sm:$0xff]  ;;  %v219_v24 = vld [vmem:[%s666_s19 + $0x140] sm:$0xff]  ;;  %v221_v25 = vld [vmem:[%s666_s19 + $0x150] sm:$0xff]  ;;  %v396_v12 = vsub.s32 %v393_v8, %v395_v9 }
  0x19   : >> { %250 = vmatpush1.msra.mxu0 %v227_v16  ;;  %321 = vmatpush1.msra.mxu1 %v229_v17  ;;  %v216_v26 = vld [vmem:[%s666_s19 + $0x128] sm:$0xff]  ;;  %v218_v27 = vld [vmem:[%s666_s19 + $0x138] sm:$0xff]  ;;  %v215_v28 = vld [vmem:[%s666_s19 + $0x120] sm:$0xff] }
  0x1a   : >> { %251 = vmatprep.subr.mxu0 %v224_v18  ;;  %322 = vmatprep.subr.mxu1 %v226_v19  ;;  %v217_v29 = vld [vmem:[%s666_s19 + $0x130] sm:$0xff]  ;;  %v212_v30 = vld [vmem:[%s666_s19 + $0x108] sm:$0xff]  ;;  %v214_v31 = vld [vmem:[%s666_s19 + $0x118] sm:$0xff] }
  0x1b   : >> { %252 = vmatpush1.msra.mxu0 %v223_v20  ;;  %323 = vmatpush1.msra.mxu1 %v225_v21  ;;  %v211_v32 = vld [vmem:[%s666_s19 + $0x100] sm:$0xff]  ;;  %v213_v33 = vld [vmem:[%s666_s19 + $0x110] sm:$0xff]  ;;  %v208_v34 = vld [vmem:[%s666_s19 + $0xe8] sm:$0xff] }
  0x1c   : >> { %253 = vmatprep.subr.mxu0 %v220_v22  ;;  %324 = vmatprep.subr.mxu1 %v222_v23  ;;  %v210_v35 = vld [vmem:[%s666_s19 + $0xf8] sm:$0xff]  ;;  %v207_v36 = vld [vmem:[%s666_s19 + $0xe0] sm:$0xff]  ;;  %v209_v37 = vld [vmem:[%s666_s19 + $0xf0] sm:$0xff] }
  0x1d   : >> { %254 = vmatpush1.msra.mxu0 %v219_v24  ;;  %325 = vmatpush1.msra.mxu1 %v221_v25  ;;  %v204_v38 = vld [vmem:[%s666_s19 + $0xc8] sm:$0xff]  ;;  %v206_v39 = vld [vmem:[%s666_s19 + $0xd8] sm:$0xff]  ;;  %v203_v40 = vld [vmem:[%s666_s19 + $0xc0] sm:$0xff] }
  0x1e   : >> { %255 = vmatprep.subr.mxu0 %v216_v26  ;;  %326 = vmatprep.subr.mxu1 %v218_v27  ;;  %v205_v41 = vld [vmem:[%s666_s19 + $0xd0] sm:$0xff]  ;;  %v200_v42 = vld [vmem:[%s666_s19 + $0xa8] sm:$0xff]  ;;  %v202_v43 = vld [vmem:[%s666_s19 + $0xb8] sm:$0xff] }
  0x1f   : >> { %256 = vmatpush1.msra.mxu0 %v215_v28  ;;  %327 = vmatpush1.msra.mxu1 %v217_v29  ;;  %v199_v44 = vld [vmem:[%s666_s19 + $0xa0] sm:$0xff]  ;;  %v201_v45 = vld [vmem:[%s666_s19 + $0xb0] sm:$0xff]  ;;  %v196_v46 = vld [vmem:[%s666_s19 + $0x88] sm:$0xff] }
  0x20   : >> { %257 = vmatprep.subr.mxu0 %v212_v30  ;;  %328 = vmatprep.subr.mxu1 %v214_v31  ;;  %v198_v47 = vld [vmem:[%s666_s19 + $0x98] sm:$0xff]  ;;  %v195_v48 = vld [vmem:[%s666_s19 + $0x80] sm:$0xff]  ;;  %v197_v49 = vld [vmem:[%s666_s19 + $0x90] sm:$0xff] }
  0x21   : >> { %258 = vmatpush1.msra.mxu0 %v211_v32  ;;  %329 = vmatpush1.msra.mxu1 %v213_v33  ;;  %v192_v50 = vld [vmem:[%s666_s19 + $0x68] sm:$0xff]  ;;  %v194_v51 = vld [vmem:[%s666_s19 + $0x78] sm:$0xff]  ;;  %v191_v52 = vld [vmem:[%s666_s19 + $0x60] sm:$0xff] }
  0x22   : >> { %259 = vmatprep.subr.mxu0 %v208_v34  ;;  %330 = vmatprep.subr.mxu1 %v210_v35  ;;  %v193_v53 = vld [vmem:[%s666_s19 + $0x70] sm:$0xff]  ;;  %v188_v54 = vld [vmem:[%s666_s19 + $0x48] sm:$0xff]  ;;  %v190_v55 = vld [vmem:[%s666_s19 + $0x58] sm:$0xff] }
  0x23   : >> { %260 = vmatpush1.msra.mxu0 %v207_v36  ;;  %331 = vmatpush1.msra.mxu1 %v209_v37  ;;  %v187_v56 = vld [vmem:[%s666_s19 + $0x40] sm:$0xff]  ;;  %v189_v57 = vld [vmem:[%s666_s19 + $0x50] sm:$0xff]  ;;  %v184_v58 = vld [vmem:[%s666_s19 + $0x28] sm:$0xff] }
  0x24   : >> { %261 = vmatprep.subr.mxu0 %v204_v38  ;;  %332 = vmatprep.subr.mxu1 %v206_v39  ;;  %v186_v59 = vld [vmem:[%s666_s19 + $0x38] sm:$0xff]  ;;  %v183_v60 = vld [vmem:[%s666_s19 + $0x20] sm:$0xff]  ;;  %v185_v61 = vld [vmem:[%s666_s19 + $0x30] sm:$0xff] }
  0x25   : >> { %262 = vmatpush1.msra.mxu0 %v203_v40  ;;  %333 = vmatpush1.msra.mxu1 %v205_v41  ;;  %v180_v62 = vld [vmem:[%s666_s19 + $0x8] sm:$0xff]  ;;  %v182_v63 = vld [vmem:[%s666_s19 + $0x18] sm:$0xff]  ;;  %v179_v2 = vld [vmem:[%s666_s19] sm:$0xff] }
  0x26   : >> { %263 = vmatprep.subr.mxu0 %v200_v42  ;;  %334 = vmatprep.subr.mxu1 %v202_v43  ;;  %v181_v3 = vld [vmem:[%s666_s19 + $0x10] sm:$0xff]  ;;  %v178_v18 = vld [vmem:[%s177_s28] sm:$0xff] }
  0x27   : >> { %264 = vmatpush1.msra.mxu0 %v199_v44  ;;  %335 = vmatpush1.msra.mxu1 %v201_v45 }
  0x28   : >> { %265 = vmatprep.subr.mxu0 %v196_v46  ;;  %336 = vmatprep.subr.mxu1 %v198_v47 }
  0x29   : >> { %266 = vmatpush1.msra.mxu0 %v195_v48  ;;  %337 = vmatpush1.msra.mxu1 %v197_v49 }
  0x2a   : >> { %267 = vmatprep.subr.mxu0 %v192_v50  ;;  %338 = vmatprep.subr.mxu1 %v194_v51 }
  0x2b   : >> { %268 = vmatpush1.msra.mxu0 %v191_v52  ;;  %339 = vmatpush1.msra.mxu1 %v193_v53 }
  0x2c   : >> { %269 = vmatprep.subr.mxu0 %v188_v54  ;;  %340 = vmatprep.subr.mxu1 %v190_v55 }
  0x2d   : >> { %270 = vmatpush1.msra.mxu0 %v187_v56  ;;  %341 = vmatpush1.msra.mxu1 %v189_v57 }
  0x2e   : >> { %271 = vmatprep.subr.mxu0 %v184_v58  ;;  %342 = vmatprep.subr.mxu1 %v186_v59 }
  0x2f   : >> { %272 = vmatpush1.msra.mxu0 %v183_v60  ;;  %343 = vmatpush1.msra.mxu1 %v185_v61 }
  0x30   : >> { %273 = vmatprep.subr.mxu0 %v180_v62  ;;  %344 = vmatprep.subr.mxu1 %v182_v63 }
  0x31   : >> { %274 = vmatpush1.msra.mxu0 %v179_v2  ;;  %307 = vmatprep.mubr.f32.mxu0 %v629_v4 }
  0x32   : >> { %345 = vmatpush1.msra.mxu1 %v181_v3  ;;  %378 = vmatprep.mubr.f32.mxu1 %v629_v4 }
  0x33   : >> { %308 = vmatmul.mubr.f32.vlgmr.msra.gmra.mxu0 %v623_v1  ;;  %379 = vmatmul.mubr.f32.vlgmr.msra.gmra.mxu1 %v623_v1 }
  0xf3   : >> { %v309_v10 = vpop.f32.mrf.mxu0  ;;  %v380_v11 = vpop.f32.mrf.mxu1 }
  0xf5   : >> { %v311_v13 = vpop.f32.mrf.mxu0  ;;  %v382_v14 = vpop.f32.mrf.mxu1 }
  0xf6   : >> { %v389_v15 = vcombine.low %v309_v10, %v311_v13  ;;  %v390_v1 = vcombine.low %v380_v11, %v382_v14 }
  0xf8   : >> { %v397_v16 = vrot.slane %v389_v15, %v396_v12  ;;  %v404_v17 = vrot.slane %v390_v1, %v396_v12 }
  0xfa   : >> { %v405_v19 = vcombine.low %v397_v16, %v404_v17 }
  0xfc   : >> { %v407_v20 = vadd.f32 %v405_v19, %v178_v18 }
  0xfe   : >> { %v537_v21 = vmul.f32 -1.442695, %v407_v20  ;;  %v415_v22 = vrot.slane %v407_v20, 2  ;;  %v426_v24 = vrot.slane %v407_v20, 6  ;;  %v423_v27 = vrot.slane %v407_v20, 4 }
 0x100   : >> { %581 = vpow2.f32 %v537_v21  ;;  %v538_v23 = vmul.f32 -1.442695, %v415_v22  ;;  %v539_v25 = vmul.f32 -1.442695, %v426_v24 }
 0x102   : >> { %583 = vpow2.f32 %v538_v23 }
 0x103   : >> { %585 = vpow2.f32 %v539_v25 }
 0x10d   : >> { %v582_v26 = vpop.eup %581 }
 0x10e   : >> { %v411_v28 = vadd.f32 1.0, %v582_v26 }
 0x10f   : >> { %v584_v29 = vpop.eup %583 }
 0x110   : >> { %587 = vrcp.f32 %v411_v28  ;;  %v420_v30 = vadd.f32 1.0, %v584_v29  ;;  %v586_v31 = vpop.eup %585 }
 0x111   : >> { %589 = vtanh.f32 %v423_v27  ;;  %v431_v35 = vadd.f32 1.0, %v586_v31 }
 0x112   : >> { %591 = vrcp.f32 %v420_v30 }
 0x113   : >> { %593 = vrcp.f32 %v431_v35 }
 0x11d   : >> { %v588_v32 = vpop.eup %587 }
 0x11e   : >> { %v590_v33 = vpop.eup %589 }
 0x11f   : >> { %v592_v34 = vpop.eup %591  ;;  %v435_v37 = vmul.f32 %v590_v33, %v588_v32 }
 0x120   : >> { %v434_v36 = vmul.f32 %v619_v0, %v592_v34  ;;  %v594_v38 = vpop.eup %593 }
 0x122   : >> { %v436_v0 = vadd.f32 %v435_v37, %v434_v36  }
 0x124   : >> { %595 = vtanh.f32 %v436_v0 }
 0x130   : > { %168 = sbr.rel (!%p166_p5) target bundleno = 17 (0x11), region = 70 }
 0x131   : >> { %v596_v39 = vpop.eup %595 }
 0x132   : >> { %v438_v1 = vmul.f32 %v596_v39, %v594_v38  }
 0x134   : >> { %441 = vst [vmem:[%s440_s30] sm:$0x3] %v438_v1 }
 0x135 PF: > { %s12_s9 = sadd.s32 1, %s615_s9  }
 0x136   : > { %p9_p6 = scmp.ge.s32.totalorder %s12_s9, 4  }
 0x138   :  { %11 = sbr.rel (!%p9_p6) target bundleno = 1 (0x1), region = 81 }

// kernel: deepspeech_forward.29
= control target key start
LH: loop header
LB: loop body
LE: loop exit
PB: predicated region body
PF: predicated region fallthrough
CT: control target
= control target key end

     0   :  { %s1020_s12 = smov 0   ;;  %s1022_s13 = smov 0   ;;  %s1199_s0 = inlined_call_operand.vmem [shape: bf16[8,256], index: 0, kind: input, shape index: {}]   ;;  %s1200_s1 = inlined_call_operand.vmem [shape: bf16[256,512], index: 1, kind: input, shape index: {}]   ;;  %s1201_s2 = inlined_call_operand.vmem [shape: f32[1,512], index: 2, kind: input, shape index: {}]   ;;  %s1202_s3 = inlined_call_operand.vmem [shape: f32[8,512], index: 3, kind: output, shape index: {}]  }
   0x1   :  { %s1024_s14 = smov 0   ;;  %s1026_s15 = smov 0  }
   0x2   :  { %s1028_s16 = smov 0  }
   0x3 LB: > { %s28_s17 = sadd.s32 1, %s994_s15  ;;  %p76_p1 = scmp.ne.s32.totalorder %s986_s13, %s982_s12  ;;  %s998_s16 = sphi %s1028_s16, %s13_s16   ;;  %s994_s15 = sphi %s1026_s15, %s1206_s15   ;;  %s990_s14 = sphi %s1024_s14, %s1205_s14   ;;  %s986_s13 = sphi %s1022_s13, %s1204_s13   ;;  %s982_s12 = sphi %s1020_s12, %s1203_s12  }
   0x4   : > { %p30_p0 = scmp.ge.s32.totalorder %s28_s17, 2  ;;  %p77_p2 = scmp.eq.s32.totalorder %s998_s16, 0 }
   0x5   : > { %s69_s19 = sadd.s32 1, %s986_s13  ;;  %p824_p5 = scmp.ge.s32.totalorder %s998_s16, 2 }
   0x6   : > { %s1208_s17 = smov (%p30_p0, %s28_s17), 0  ;;  %p78_p3 = por %p77_p2, %p76_p1 }
   0x7   : > { %s65_s18 = ssub.s32 %s994_s15, %s1208_s17  ;;  %169 = sbr.rel (%p824_p5) target bundleno = 32 (0x20), region = 20 }
   0x8   : > { %p67_p4 = scmp.eq.s32.totalorder %s65_s18, 0 }
   0xa   : > { %s1055_s20 = scalar_select %p67_p4, %s986_s13, %s69_s19  }
   0xc   : > { %172 = sbr.rel (!%p78_p3) target bundleno = 32 (0x20), region = 24  ;;  %s174_s21 = sand.u32 (%p78_p3), 1, %s986_s13  }
   0xd   : > { %s869_s22 = sshll.u32 (%p78_p3), %s994_s15, 3  ;;  %s825_s23 = sshll.u32 (%p78_p3), %s174_s21, 8 }
   0xe   : > { %s1063_s26 = scalar_lea.vmem (%p78_p3), %s1200_s1, %s869_s22  ;;  %s1068_s27 = scalar_lea.vmem (%p78_p3), [#allocation3], %s825_s23 }
   0xf   : > { %v273_v0 = vld [vmem:[%s1063_s26] sm:$0xff] (%p78_p3)  ;;  %v275_v1 = vld [vmem:[%s1063_s26 + $0x10] sm:$0xff] (%p78_p3) }
  0x10   : > { %v277_v2 = vld [vmem:[%s1063_s26 + $0x20] sm:$0xff] (%p78_p3)  ;;  %274 = vst [vmem:[%s1068_s27] sm:$0xff] (%p78_p3), %v273_v0  ;;  %276 = vst [vmem:[%s1068_s27 + $0x8] sm:$0xff] (%p78_p3), %v275_v1  ;;  %v279_v3 = vld [vmem:[%s1063_s26 + $0x30] sm:$0xff] (%p78_p3) }
  0x11   : > { %278 = vst [vmem:[%s1068_s27 + $0x10] sm:$0xff] %v277_v2  ;;  %v281_v4 = vld [vmem:[%s1063_s26 + $0x40] sm:$0xff]  ;;  %v283_v5 = vld [vmem:[%s1063_s26 + $0x50] sm:$0xff]  ;;  %280 = vst [vmem:[%s1068_s27 + $0x18] sm:$0xff] %v279_v3 }
  0x12   : > { %282 = vst [vmem:[%s1068_s27 + $0x20] sm:$0xff] %v281_v4  ;;  %284 = vst [vmem:[%s1068_s27 + $0x28] sm:$0xff] %v283_v5  ;;  %v285_v6 = vld [vmem:[%s1063_s26 + $0x60] sm:$0xff]  ;;  %v287_v7 = vld [vmem:[%s1063_s26 + $0x70] sm:$0xff] }
  0x13   : > { %v289_v8 = vld [vmem:[%s1063_s26 + $0x80] sm:$0xff]  ;;  %286 = vst [vmem:[%s1068_s27 + $0x30] sm:$0xff] %v285_v6  ;;  %288 = vst [vmem:[%s1068_s27 + $0x38] sm:$0xff] %v287_v7  ;;  %v291_v9 = vld [vmem:[%s1063_s26 + $0x90] sm:$0xff] }
  0x14   : > { %290 = vst [vmem:[%s1068_s27 + $0x40] sm:$0xff] %v289_v8  ;;  %v293_v10 = vld [vmem:[%s1063_s26 + $0xa0] sm:$0xff]  ;;  %v295_v11 = vld [vmem:[%s1063_s26 + $0xb0] sm:$0xff]  ;;  %292 = vst [vmem:[%s1068_s27 + $0x48] sm:$0xff] %v291_v9 }
  0x15   : > { %294 = vst [vmem:[%s1068_s27 + $0x50] sm:$0xff] %v293_v10  ;;  %296 = vst [vmem:[%s1068_s27 + $0x58] sm:$0xff] %v295_v11  ;;  %v297_v12 = vld [vmem:[%s1063_s26 + $0xc0] sm:$0xff]  ;;  %v299_v13 = vld [vmem:[%s1063_s26 + $0xd0] sm:$0xff] }
  0x16   : > { %v301_v14 = vld [vmem:[%s1063_s26 + $0xe0] sm:$0xff]  ;;  %298 = vst [vmem:[%s1068_s27 + $0x60] sm:$0xff] %v297_v12  ;;  %300 = vst [vmem:[%s1068_s27 + $0x68] sm:$0xff] %v299_v13  ;;  %v303_v15 = vld [vmem:[%s1063_s26 + $0xf0] sm:$0xff] }
  0x17   : > { %302 = vst [vmem:[%s1068_s27 + $0x70] sm:$0xff] %v301_v14  ;;  %v305_v16 = vld [vmem:[%s1063_s26 + $0x100] sm:$0xff]  ;;  %v307_v17 = vld [vmem:[%s1063_s26 + $0x110] sm:$0xff]  ;;  %304 = vst [vmem:[%s1068_s27 + $0x78] sm:$0xff] %v303_v15 }
  0x18   : > { %306 = vst [vmem:[%s1068_s27 + $0x80] sm:$0xff] %v305_v16  ;;  %308 = vst [vmem:[%s1068_s27 + $0x88] sm:$0xff] %v307_v17  ;;  %v309_v18 = vld [vmem:[%s1063_s26 + $0x120] sm:$0xff]  ;;  %v311_v19 = vld [vmem:[%s1063_s26 + $0x130] sm:$0xff] }
  0x19   : > { %v313_v20 = vld [vmem:[%s1063_s26 + $0x140] sm:$0xff]  ;;  %310 = vst [vmem:[%s1068_s27 + $0x90] sm:$0xff] %v309_v18  ;;  %312 = vst [vmem:[%s1068_s27 + $0x98] sm:$0xff] %v311_v19  ;;  %v315_v21 = vld [vmem:[%s1063_s26 + $0x150] sm:$0xff] }
  0x1a   : > { %314 = vst [vmem:[%s1068_s27 + $0xa0] sm:$0xff] %v313_v20  ;;  %v317_v22 = vld [vmem:[%s1063_s26 + $0x160] sm:$0xff]  ;;  %v319_v23 = vld [vmem:[%s1063_s26 + $0x170] sm:$0xff]  ;;  %316 = vst [vmem:[%s1068_s27 + $0xa8] sm:$0xff] %v315_v21 }
  0x1b   : > { %318 = vst [vmem:[%s1068_s27 + $0xb0] sm:$0xff] %v317_v22  ;;  %320 = vst [vmem:[%s1068_s27 + $0xb8] sm:$0xff] %v319_v23  ;;  %v321_v24 = vld [vmem:[%s1063_s26 + $0x180] sm:$0xff]  ;;  %v323_v25 = vld [vmem:[%s1063_s26 + $0x190] sm:$0xff] }
  0x1c   : > { %v325_v26 = vld [vmem:[%s1063_s26 + $0x1a0] sm:$0xff]  ;;  %322 = vst [vmem:[%s1068_s27 + $0xc0] sm:$0xff] %v321_v24  ;;  %324 = vst [vmem:[%s1068_s27 + $0xc8] sm:$0xff] %v323_v25  ;;  %v327_v27 = vld [vmem:[%s1063_s26 + $0x1b0] sm:$0xff] }
  0x1d   : > { %326 = vst [vmem:[%s1068_s27 + $0xd0] sm:$0xff] %v325_v26  ;;  %v329_v28 = vld [vmem:[%s1063_s26 + $0x1c0] sm:$0xff]  ;;  %v331_v29 = vld [vmem:[%s1063_s26 + $0x1d0] sm:$0xff]  ;;  %328 = vst [vmem:[%s1068_s27 + $0xd8] sm:$0xff] %v327_v27 }
  0x1e   : > { %330 = vst [vmem:[%s1068_s27 + $0xe0] sm:$0xff] %v329_v28  ;;  %332 = vst [vmem:[%s1068_s27 + $0xe8] sm:$0xff] %v331_v29  ;;  %v333_v30 = vld [vmem:[%s1063_s26 + $0x1e0] sm:$0xff]  ;;  %v335_v31 = vld [vmem:[%s1063_s26 + $0x1f0] sm:$0xff] }
  0x1f   : > { %334 = vst [vmem:[%s1068_s27 + $0xf0] sm:$0xff] %v333_v30  ;;  %336 = vst [vmem:[%s1068_s27 + $0xf8] sm:$0xff] %v335_v31 }
  0x20 PF: > { %p828_p6 = scmp.ge.s32.totalorder %s998_s16, 1  ;;  %p349_p7 = scmp.lt.s32.totalorder %s998_s16, 3 }
  0x22   : > { %p350_p8 = pnand %p828_p6, %p349_p7 }
  0x23   : > { %s356_s28 = sand.u32 (!%p350_p8), 1, %s982_s12   ;;  %s830_s6 = sshll.u32 (!%p350_p8), %s990_s14, 1 }
  0x24   : > { %353 = sbr.rel (%p350_p8) target bundleno = 305 (0x131), region = 66  ;;  %s829_s4 = sshll.u32 (!%p350_p8), %s356_s28, 8 }
  0x25   : > { %s1141_s5 = scalar_lea.vmem (!%p350_p8), [#allocation3], %s829_s4  ;;  %p409_p9 = scmp.lt.s32.totalorder (!%p350_p8), %s830_s6, 3 }
  0x29   : > { %v1137_v32 = vld [vmem:[%s1199_s0] sm:$0xff]  ;;  %v910_v34 = vld [vmem:[%s1141_s5 + $0x74] ss:$8 sps:$4 sm:$0xff]   ;;  %v912_v35 = vld [vmem:[%s1141_s5 + $0x70] ss:$8 sps:$4 sm:$0xff]   ;;  %v683_v3 = vlaneseq  ;;  %s1210_s6 = smov (!%p409_p9, %s830_s6), 3 }
  0x2a   : > { %v834_v33 = vcombine.high %v1137_v32, %v1137_v32  ;;  %631 = vmatprep.subr.bf16.mxu0 %v910_v34  ;;  %v913_v36 = vld [vmem:[%s1141_s5 + $0x64] ss:$8 sps:$4 sm:$0xff]   ;;  %v915_v37 = vld [vmem:[%s1141_s5 + $0x60] ss:$8 sps:$4 sm:$0xff]   ;;  %v916_v38 = vld [vmem:[%s1141_s5 + $0x54] ss:$8 sps:$4 sm:$0xff]   ;;  %v833_v2 = vcombine.low %v1137_v32, %v1137_v32  ;;  %s411_s9 = scalar_lea.vmem %s1201_s2, %s1210_s6 }
  0x2b   : > { %632 = vmatpush1.bf16.msra.mxu0 %v912_v35  ;;  %v918_v39 = vld [vmem:[%s1141_s5 + $0x50] ss:$8 sps:$4 sm:$0xff]   ;;  %v919_v40 = vld [vmem:[%s1141_s5 + $0x44] ss:$8 sps:$4 sm:$0xff]   ;;  %v921_v41 = vld [vmem:[%s1141_s5 + $0x40] ss:$8 sps:$4 sm:$0xff]  }
  0x2c   : > { %663 = vmatprep.mubr.bf16.mxu0 %v834_v33  ;;  %633 = vmatprep.subr.bf16.mxu0 %v913_v36  ;;  %v922_v42 = vld [vmem:[%s1141_s5 + $0x34] ss:$8 sps:$4 sm:$0xff]   ;;  %v924_v43 = vld [vmem:[%s1141_s5 + $0x30] ss:$8 sps:$4 sm:$0xff]   ;;  %v925_v44 = vld [vmem:[%s1141_s5 + $0x24] ss:$8 sps:$4 sm:$0xff]  }
  0x2d   : > { %v927_v45 = vld [vmem:[%s1141_s5 + $0x20] ss:$8 sps:$4 sm:$0xff]   ;;  %v928_v46 = vld [vmem:[%s1141_s5 + $0x14] ss:$8 sps:$4 sm:$0xff]   ;;  %v930_v47 = vld [vmem:[%s1141_s5 + $0x10] ss:$8 sps:$4 sm:$0xff]  }
  0x2e   : > { %v931_v48 = vld [vmem:[%s1141_s5 + $0x4] ss:$8 sps:$4 sm:$0xff]   ;;  %v933_v49 = vld [vmem:[%s1141_s5] ss:$8 sps:$4 sm:$0xff]   ;;  %v934_v50 = vld [vmem:[%s1141_s5 + $0xf4] ss:$8 sps:$4 sm:$0xff]  }
  0x2f   : > { %634 = vmatpush1.bf16.msra.mxu0 %v915_v37  ;;  %v936_v51 = vld [vmem:[%s1141_s5 + $0xf0] ss:$8 sps:$4 sm:$0xff]   ;;  %v937_v52 = vld [vmem:[%s1141_s5 + $0xe4] ss:$8 sps:$4 sm:$0xff]   ;;  %v939_v53 = vld [vmem:[%s1141_s5 + $0xe0] ss:$8 sps:$4 sm:$0xff]  }
  0x30   : > { %635 = vmatprep.subr.bf16.mxu0 %v916_v38  ;;  %v940_v54 = vld [vmem:[%s1141_s5 + $0xd4] ss:$8 sps:$4 sm:$0xff]   ;;  %v942_v55 = vld [vmem:[%s1141_s5 + $0xd0] ss:$8 sps:$4 sm:$0xff]   ;;  %v943_v56 = vld [vmem:[%s1141_s5 + $0xc4] ss:$8 sps:$4 sm:$0xff]  }
  0x31   : > { %v945_v57 = vld [vmem:[%s1141_s5 + $0xc0] ss:$8 sps:$4 sm:$0xff]   ;;  %v946_v58 = vld [vmem:[%s1141_s5 + $0xb4] ss:$8 sps:$4 sm:$0xff]   ;;  %v948_v59 = vld [vmem:[%s1141_s5 + $0xb0] ss:$8 sps:$4 sm:$0xff]  }
  0x32   : > { %v949_v60 = vld [vmem:[%s1141_s5 + $0xa4] ss:$8 sps:$4 sm:$0xff]   ;;  %v951_v61 = vld [vmem:[%s1141_s5 + $0xa0] ss:$8 sps:$4 sm:$0xff]   ;;  %v952_v62 = vld [vmem:[%s1141_s5 + $0x94] ss:$8 sps:$4 sm:$0xff]  }
  0x33   : > { %636 = vmatpush1.bf16.msra.mxu0 %v918_v39  ;;  %v954_v63 = vld [vmem:[%s1141_s5 + $0x90] ss:$8 sps:$4 sm:$0xff]   ;;  %v955_v0 = vld [vmem:[%s1141_s5 + $0x84] ss:$8 sps:$4 sm:$0xff]   ;;  %v957_v1 = vld [vmem:[%s1141_s5 + $0x80] ss:$8 sps:$4 sm:$0xff]  }
  0x34   : > { %637 = vmatprep.subr.bf16.mxu0 %v919_v40  ;;  %v684_v4 = vshrl.u32 %v683_v3, 7  ;;  %v681_v6 = vld [vmem:[%s411_s9] sm:$0x3]  ;;  %s832_s10 = sshll.u32 %s1210_s6, 3 }
  0x35   : > { %s421_s18 = scalar_lea.vmem %s1202_s3, %s832_s10 }
  0x36   : > { %v685_v5 = vsub.s32 0, %v684_v4  ;;  %v689_v7 = vsub.s32 1, %v684_v4 }
  0x37   : > { %638 = vmatpush1.bf16.msra.mxu0 %v921_v41 }
  0x38   : > { %639 = vmatprep.subr.bf16.mxu0 %v922_v42  ;;  %v686_v8 = vrot.slane %v681_v6, %v685_v5  ;;  %v690_v9 = vrot.slane %v681_v6, %v689_v7 }
  0x3b   : > { %640 = vmatpush1.bf16.msra.mxu0 %v924_v43 }
  0x3c   : > { %641 = vmatprep.subr.bf16.mxu0 %v925_v44 }
  0x3f   : > { %642 = vmatpush1.bf16.msra.mxu0 %v927_v45 }
  0x40   : > { %643 = vmatprep.subr.bf16.mxu0 %v928_v46 }
  0x43   : > { %644 = vmatpush1.bf16.msra.mxu0 %v930_v47 }
  0x44   : > { %645 = vmatprep.subr.bf16.mxu0 %v931_v48 }
  0x47   : > { %646 = vmatpush1.bf16.msra.mxu0 %v933_v49 }
  0x48   : > { %647 = vmatprep.subr.bf16.mxu0 %v934_v50 }
  0x4b   : > { %648 = vmatpush2.bf16.msra.mxu0 %v936_v51 }
  0x4c   : > { %649 = vmatprep.subr.bf16.mxu0 %v937_v52 }
  0x4f   : > { %650 = vmatpush2.bf16.msra.mxu0 %v939_v53 }
  0x50   : > { %651 = vmatprep.subr.bf16.mxu0 %v940_v54 }
  0x53   : > { %652 = vmatpush2.bf16.msra.mxu0 %v942_v55 }
  0x54   : > { %653 = vmatprep.subr.bf16.mxu0 %v943_v56 }
  0x57   : > { %654 = vmatpush2.bf16.msra.mxu0 %v945_v57 }
  0x58   : > { %655 = vmatprep.subr.bf16.mxu0 %v946_v58 }
  0x5b   : > { %656 = vmatpush2.bf16.msra.mxu0 %v948_v59 }
  0x5c   : > { %657 = vmatprep.subr.bf16.mxu0 %v949_v60 }
  0x5f   : > { %658 = vmatpush2.bf16.msra.mxu0 %v951_v61 }
  0x60   : > { %659 = vmatprep.subr.bf16.mxu0 %v952_v62 }
  0x63   : > { %660 = vmatpush2.bf16.msra.mxu0 %v954_v63 }
  0x64   : > { %661 = vmatprep.subr.bf16.mxu0 %v955_v0 }
  0x67   : > { %662 = vmatpush2.bf16.msra.mxu0 %v957_v1 }
  0x6a   : > { %664 = vmatmul.mubr.bf16.vlgmr.msra.gmra.mxu0 %v833_v2 }
 0x12a   : > { %v665_v10 = vpop.f32.mrf.mxu0 }
 0x12b   : > { %v693_v11 = vadd.f32 %v686_v8, %v665_v10 }
 0x12c   : > { %v667_v12 = vpop.f32.mrf.mxu0 }
 0x12d   : > { %695 = vst [vmem:[%s421_s18] sm:$0xff] %v693_v11  ;;  %v694_v13 = vadd.f32 %v690_v9, %v667_v12 }
 0x12e   : > { %v669_v14 = vpop.f32.mrf.mxu0 }
 0x12f   : > { %696 = vst [vmem:[%s421_s18 + $0x8] sm:$0xff] %v694_v13 }
 0x130   : > { %v670_v15 = vpop.f32.mrf.mxu0 }
 0x131 PF: > { %s13_s16 = sadd.s32 1, %s998_s16   ;;  %s1203_s12 = smov %s986_s13 }
 0x132   : > { %p10_p10 = scmp.ge.s32.totalorder %s13_s16, 4   ;;  %s1204_s13 = smov %s1055_s20 }
 0x133   : > { %s1205_s14 = smov %s994_s15  ;;  %s1206_s15 = smov %s1208_s17 }
 0x134   :  { %12 = sbr.rel (!%p10_p10) target bundleno = 3 (0x3), region = 119 }

// kernel: deepspeech_forward.32
= control target key start
LH: loop header
LB: loop body
LE: loop exit
PB: predicated region body
PF: predicated region fallthrough
CT: control target
= control target key end

     0   :  { %v229_v0 = vmov 0.0   ;;  %vm230_vm0 = vmmov 0   ;;  %s284_s1 = inlined_call_operand.vmem [shape: bf16[128,128], index: 1, kind: input, shape index: {}]   ;;  %s285_s0 = inlined_call_operand.vmem [shape: bf16[8,128], index: 0, kind: input, shape index: {}]   ;;  %s286_s2 = inlined_call_operand.vmem [shape: f32[1,128], index: 2, kind: input, shape index: {}]   ;;  %s287_s3 = inlined_call_operand.vmem [shape: f32[8,128], index: 3, kind: output, shape index: {}]  }
   0x1   :  { %197 = vmatprep.subr.bf16.mxu0 %v229_v0  ;;  %v219_v1 = vld [vmem:[%s284_s1 + $0x38] sm:$0xff]   ;;  %213 = vmatprep.mubr.msk.bf16.mxu0 %vm230_vm0, %v229_v0  ;;  %v220_v2 = vld [vmem:[%s284_s1 + $0x30] sm:$0xff]   ;;  %v221_v3 = vld [vmem:[%s284_s1 + $0x28] sm:$0xff]  }
   0x2   :  { %198 = vmatpush3.bf16.msra.mxu0 %v219_v1  ;;  %v222_v4 = vld [vmem:[%s284_s1 + $0x20] sm:$0xff]   ;;  %v223_v5 = vld [vmem:[%s284_s1 + $0x18] sm:$0xff]   ;;  %v224_v6 = vld [vmem:[%s284_s1 + $0x10] sm:$0xff]  }
   0x3   :  { %199 = vmatprep.subr.bf16.mxu0 %v229_v0  ;;  %v225_v7 = vld [vmem:[%s284_s1 + $0x8] sm:$0xff]   ;;  %v226_v8 = vld [vmem:[%s284_s1] sm:$0xff]  }
   0x4   :  { %v21_v9 = vld [vmem:[%s285_s0] sm:$0xf] }
   0x5   :  { %v185_v10 = vld [vmem:[%s286_s2] ss:$0 sm:$0xff] }
   0x6   :  { %200 = vmatpush3.bf16.msra.mxu0 %v220_v2 }
   0x7   :  { %201 = vmatprep.subr.bf16.mxu0 %v229_v0 }
   0xa   :  { %202 = vmatpush3.bf16.msra.mxu0 %v221_v3 }
   0xb   :  { %203 = vmatprep.subr.bf16.mxu0 %v229_v0 }
   0xe   :  { %204 = vmatpush3.bf16.msra.mxu0 %v222_v4 }
   0xf   :  { %205 = vmatprep.subr.bf16.mxu0 %v229_v0 }
  0x12   :  { %206 = vmatpush3.bf16.msra.mxu0 %v223_v5 }
  0x13   :  { %207 = vmatprep.subr.bf16.mxu0 %v229_v0 }
  0x16   :  { %208 = vmatpush3.bf16.msra.mxu0 %v224_v6 }
  0x17   :  { %209 = vmatprep.subr.bf16.mxu0 %v229_v0 }
  0x1a   :  { %210 = vmatpush3.bf16.msra.mxu0 %v225_v7 }
  0x1b   :  { %211 = vmatprep.subr.bf16.mxu0 %v229_v0 }
  0x1e   :  { %212 = vmatpush3.bf16.msra.mxu0 %v226_v8 }
  0x21   :  { %214 = vmatmul.mubr.bf16.vlgmr.msra.gmra.mxu0 %v21_v9 }
  0xe1   :  { %v120_v11 = vpop.f32.mrf.mxu0 }
  0xe2   :  { %v139_v12 = vadd.f32 %v185_v10, %v120_v11 }
  0xe3   :  { %v215_v13 = vpop.f32.mrf.mxu0 }
  0xe4   :  { %v141_v14 = vmul.f32 0.70710677, %v139_v12  ;;  %v140_v43 = vmul.f32 0.5, %v139_v12 }
  0xe5   :  { %v123_v15 = vpop.f32.mrf.mxu0 }
  0xe6   :  { %v186_v16 = vclamps-f32 %v141_v14, 4.0 }
  0xe7   :  { %v216_v17 = vpop.f32.mrf.mxu0 }
  0xe8   :  { %v144_v18 = vmul.f32 %v186_v16, %v186_v16 }
  0xea   :  { %v145_v19 = vmul.f32 -2.7261424e-10, %v144_v18  ;;  %v158_v20 = vmul.f32 -1.45660715e-05, %v144_v18 }
  0xec   :  { %v146_v21 = vadd.f32 2.7706815e-08, %v145_v19  ;;  %v159_v22 = vadd.f32 -0.00021337405, %v158_v20 }
  0xee   :  { %v147_v23 = vmul.f32 %v146_v21, %v144_v18  ;;  %v160_v24 = vmul.f32 %v159_v22, %v144_v18 }
  0xf0   :  { %v148_v25 = vadd.f32 -2.101024e-06, %v147_v23  ;;  %v161_v26 = vadd.f32 -0.001682827, %v160_v24 }
  0xf2   :  { %v149_v27 = vmul.f32 %v148_v25, %v144_v18  ;;  %v162_v28 = vmul.f32 %v161_v26, %v144_v18 }
  0xf4   :  { %v150_v29 = vadd.f32 -5.6925062e-05, %v149_v27  ;;  %v163_v30 = vadd.f32 -0.0073733293, %v162_v28 }
  0xf6   :  { %v151_v31 = vmul.f32 %v150_v29, %v144_v18  ;;  %v164_v32 = vmul.f32 %v163_v30, %v144_v18 }
  0xf8   :  { %v152_v33 = vadd.f32 -0.00073499064, %v151_v31  ;;  %v165_v34 = vadd.f32 -0.014264739, %v164_v32 }
  0xfa   :  { %v153_v35 = vmul.f32 %v152_v33, %v144_v18  ;;  %227 = vrcp.f32 %v165_v34 }
  0xfc   :  { %v154_v36 = vadd.f32 -0.0029546001, %v153_v35 }
  0xfe   :  { %v155_v37 = vmul.f32 %v154_v36, %v144_v18 }
 0x100   :  { %v156_v38 = vadd.f32 -0.016096033, %v155_v37 }
 0x102   :  { %v157_v39 = vmul.f32 %v186_v16, %v156_v38 }
 0x107   :  { %v228_v40 = vpop.eup %227 }
 0x108   :  { %v167_v41 = vmul.f32 %v228_v40, %v157_v39 }
 0x10a   :  { %v187_v42 = vclamps-f32 %v167_v41, 1.0 }
 0x10c   :  { %v170_v44 = vadd.f32 1.0, %v187_v42 }
 0x10e   :  { %v171_v45 = vmul.f32 %v170_v44, %v140_v43 }
 0x110   :  { %172 = vst [vmem:[%s287_s3] sm:$0xff] %v171_v45 }

</bundles_post_ra>
